<compile_context>
chip_gen: v7x
topology: tpu7x:2x2x1
jax: 0.10.0
libtpu: 0.0.40
codegen_flags: <defaults>
</compile_context>

<pallas_src>
import jax
import jax.numpy as jnp
from jax.experimental import pallas as pl
from jax.experimental.pallas import tpu as pltpu


def _cmad(w, h):
    """(O, Cin) x (Cin, L) -> (O, L) as Cin unrolled broadcast mul-adds (VPU).

    Used for the C=4 contraction, which would badly under-utilize the MXU and
    pay push/drain latency for nothing.
    """
    acc = w[:, 0:1] * h[0:1, :]
    for ci in range(1, w.shape[1]):
        acc = acc + w[:, ci:ci + 1] * h[ci:ci + 1, :]
    return acc


def _mlp_hidden(pool_col, m1t):
    """Linear(C -> NUM, no bias) of one pooled column vector on the VPU/XLU.

    pool_col: (C, 1)   m1t: (C, NUM)   ->   (1, NUM)
    """
    return jnp.sum(pool_col * m1t, axis=0, keepdims=True)


def cpa_kernel(x_ref, w0e_ref, waug_ref, bnb_ref, m1t_ref, m2_ref, o_ref):
    # x_ref/o_ref: (NB, C, L)    w0e: (K, C) f32      waug: (8, K) bf16
    # bnb: (C, 1) f32            m1t: (C, NUM) f32    m2: (C, NUM) f32
    nb = x_ref.shape[0]
    cc = o_ref.shape[-2]

    # Hoist weight loads out of the (static) batch loop.
    w0e = w0e_ref[...]
    waug = waug_ref[...]
    bnb = bnb_ref[...]
    m1t = m1t_ref[...]
    m2 = m2_ref[...]

    for b in range(nb):                                   # nb in {1, 2}, static
        x = x_ref[b]                                      # (C, L) f32

        # conv1 + linear_0 (both 1x1, folded host-side): s = (w0 @ wc1) @ x.
        s = _cmad(w0e, x)                                 # (K, L) f32

        # Softmax over the spatial dim (torch dim=2 -> lane axis).  Row stats
        # in f32, exp output cast straight to bf16 for the MXU; exact divide.
        s = s - jnp.max(s, axis=1, keepdims=True)
        e = jnp.exp(s)                                    # (K, L) f32
        rs = jnp.sum(e, axis=1, keepdims=True)            # (K, 1) f32
        att = e.astype(jnp.bfloat16) * (1.0 / rs).astype(jnp.bfloat16)

        # One MXU contraction over K=192 (bf16 operands, f32 accumulation).
        # Rows 0..C-1 of waug carry bn_scale * layer_conv @ tied-linear_1
        # weight; row C is all-ones and yields the per-lane k-sum of the
        # softmaxed attention, so the k-normalization is applied post-dot.
        out8 = jnp.dot(waug, att, preferred_element_type=jnp.float32)  # (8, L)
        ksum = out8[cc:cc + 1, :]                         # (1, L)
        out = out8[0:cc, :] * (1.0 / (1e-5 + ksum)) + bnb
        out = jnp.maximum(out, 0.0)                       # ReLU; Dropout = id

        # Adaptive avg / max pool over spatial (lane reductions, XLU).
        avg = jnp.mean(out, axis=1, keepdims=True)        # (C, 1)
        mx = jnp.max(out, axis=1, keepdims=True)          # (C, 1)

        # Shared MLP channel gate, fully on the VPU.  The second Linear is
        # linear, so it is applied once to relu(W1@avg) + relu(W1@max).
        hid = (jnp.maximum(_mlp_hidden(avg, m1t), 0.0)
               + jnp.maximum(_mlp_hidden(mx, m1t), 0.0))  # (1, NUM)
        z = jnp.sum(m2 * hid, axis=1, keepdims=True)      # (C, 1)
        gate = jax.nn.sigmoid(z)                          # (C, 1)

        # Channel gating + residual (lane-dense store, L multiple of 128).
        o_ref[b] = out * gate + x


def _tensorcores_per_chip() -> int:
    """2 on dual-TensorCore v7x, else 1 (v5e/v6e).  Perf heuristic only."""
    try:
        kind = jax.devices()[0].device_kind.lower()
    except Exception:
        return 1
    return 2 if ("v7" in kind or "7x" in kind) else 1


def cp_attention(x_nchw, wc1, w0, wl, bn_scale, bn_shift, m1, m2):
    n, c, hh, ww = x_nchw.shape
    L = hh * ww
    k = w0.shape[0]
    num = m1.shape[0]

    # NCHW is already (N, C, H*W) in memory: reshape only, no transpose.
    x_ncl = x_nchw.reshape(n, c, L).astype(jnp.float32)

    # Host-side algebraic folds (exact in f32, done once per call):
    #   conv1 into linear_0:   w0_eff = w0 @ wc1                          (K, C)
    #   layer conv + BN scale into the tied linear_1 weight:
    #       w_eff = diag(bn_scale) @ wl @ w0.T                            (C, K)
    #   + all-ones row (per-lane k-sum) + zero padding to 8 MXU rows (bf16).
    w0f = w0.astype(jnp.float32)
    w0_eff = w0f @ wc1.astype(jnp.float32)                               # (K, C)
    w_eff = (bn_scale.astype(jnp.float32)[:, None]
             * wl.astype(jnp.float32)) @ w0f.T                           # (C, K)
    pad_rows = (-(c + 1)) % 8
    w_aug = jnp.concatenate(
        [w_eff, jnp.ones((1, k), jnp.float32),
         jnp.zeros((pad_rows, k), jnp.float32)], axis=0).astype(jnp.bfloat16)
    rows = c + 1 + pad_rows
    bnb = bn_shift.reshape(c, 1).astype(jnp.float32)
    m1t = jnp.transpose(m1).astype(jnp.float32)                          # (C, NUM)
    m2f = m2.astype(jnp.float32)                                         # (C, NUM)

    # Batch mapping: one grid step per TensorCore.  Dual-TC v7x keeps the
    # batch as a "parallel" grid axis (one element per core); single-TC
    # v5e/v6e merge the whole batch into a single grid step.
    tc = _tensorcores_per_chip()
    grid_n = tc if (n >= tc and n % tc == 0) else 1
    nb = n // grid_n

    grid_spec = pltpu.PrefetchScalarGridSpec(
        num_scalar_prefetch=0,
        grid=(grid_n,),
        in_specs=[
            pl.BlockSpec((nb, c, L), lambda b: (b, 0, 0)),   # x
            pl.BlockSpec((k, c), lambda b: (0, 0)),          # w0_eff (folded)
            pl.BlockSpec((rows, k), lambda b: (0, 0)),       # w_aug (folded, bf16)
            pl.BlockSpec((c, 1), lambda b: (0, 0)),          # BN shift (folded)
            pl.BlockSpec((c, num), lambda b: (0, 0)),        # MLP W1^T
            pl.BlockSpec((c, num), lambda b: (0, 0)),        # MLP W2
        ],
        out_specs=pl.BlockSpec((nb, c, L), lambda b: (b, 0, 0)),
    )

    # Advisory cost hint: the kernel is launch/DMA-latency bound at this size.
    cost = pl.CostEstimate(
        flops=int(n * (2 * k * c * L + 2 * rows * k * L + 16 * c * L
                       + 6 * c * num)),
        transcendentals=int(n * (k * L + c)),
        bytes_accessed=int(8 * n * c * L + 4 * k * c + 2 * rows * k
                           + 4 * (c + 2 * c * num)),
    )

    out_ncl = pl.pallas_call(
        cpa_kernel,
        out_shape=jax.ShapeDtypeStruct((n, c, L), jnp.float32),
        grid_spec=grid_spec,
        compiler_params=pltpu.CompilerParams(
            dimension_semantics=("parallel",)),   # batch shards across TCs on v7x
        cost_estimate=cost,
    )(x_ncl, w0_eff, w_aug, bnb, m1t, m2f)

    return out_ncl.reshape(n, c, hh, ww)


def cp_attention_ref(x_nchw, wc1, w0, wl, bn_scale, bn_shift, m1, m2):
    """Pure-JAX reference of the same eval-mode forward (f32, exact)."""
    n, c, hh, ww = x_nchw.shape
    L = hh * ww
    x = x_nchw.reshape(n, c, L)
    y = jnp.einsum('oc,ncl->nol', wc1, x)
    att = jnp.einsum('kc,ncl->nkl', w0, y)
    att = jax.nn.softmax(att, axis=2)
    att = att / (1e-5 + jnp.sum(att, axis=1, keepdims=True))
    out = jnp.einsum('kc,nkl->ncl', w0, att)          # tied linear_1 weight
    out = jnp.einsum('oc,ncl->nol', wl, out)
    out = out * bn_scale.reshape(1, c, 1) + bn_shift.reshape(1, c, 1)
    out = jnp.maximum(out, 0.0)
    avg = jnp.mean(out, axis=2)
    mx = jnp.max(out, axis=2)

    def mlp(v):
        return jnp.maximum(v @ m1.T, 0.0) @ m2.T

    gate = jax.nn.sigmoid(mlp(avg) + mlp(mx))[:, :, None]
    out = out * gate + x
    return out.reshape(n, c, hh, ww)


if __name__ == "__main__":
    N, C, H, W = 2, 4, 16, 16
    K, NUM = 192, 64

    key = jax.random.PRNGKey(0)
    k1, k2, k3, k4, k5, kx = jax.random.split(key, 6)

    # Deterministic synthetic parameters (shapes follow the module __init__).
    wc1 = jax.random.normal(k1, (C, C), dtype=jnp.float32) * 0.1   # conv1 (out,in)
    w0 = jax.random.normal(k2, (K, C), dtype=jnp.float32) * 0.1    # linear_0 (k,c)
    wl = jax.random.normal(k3, (C, C), dtype=jnp.float32) * 0.1    # layer conv weight
    m1 = jax.random.normal(k4, (NUM, C), dtype=jnp.float32) * 0.1  # MLP Linear(c->num)
    m2 = jax.random.normal(k5, (C, NUM), dtype=jnp.float32) * 0.1  # MLP Linear(num->c)

    # BatchNorm2d eval-mode fold: gamma=1, beta=0, running_mean=0, running_var=1
    gamma = jnp.ones((C,), jnp.float32)
    beta = jnp.zeros((C,), jnp.float32)
    r_mean = jnp.zeros((C,), jnp.float32)
    r_var = jnp.ones((C,), jnp.float32)
    bn_scale = gamma / jnp.sqrt(r_var + 1e-5)
    bn_shift = beta - r_mean * bn_scale

    x = jax.random.normal(kx, (N, C, H, W), dtype=jnp.float32)

    out = cp_attention(x, wc1, w0, wl, bn_scale, bn_shift, m1, m2)
    jax.block_until_ready(out)
    assert out.shape == (N, C, H, W)

    ref = cp_attention_ref(x, wc1, w0, wl, bn_scale, bn_shift, m1, m2)
    jax.block_until_ready(ref)
    # Loose tolerance: MXU operands (folded weights + attention map) are bf16.
    assert bool(jnp.allclose(out, ref, rtol=5e-2, atol=5e-3))

    print("KERNEL_OK")
</pallas_src>

<mosaic_0001>
module attributes {stable_mosaic.version = 11 : i64} {
  func.func @cpa_kernel(%arg0: i32, %arg1: memref<2x4x256xf32, #tpu.memory_space<vmem>>, %arg2: memref<192x4xf32, #tpu.memory_space<vmem>>, %arg3: memref<8x192xbf16, #tpu.memory_space<vmem>>, %arg4: memref<4x1xf32, #tpu.memory_space<vmem>>, %arg5: memref<4x64xf32, #tpu.memory_space<vmem>>, %arg6: memref<4x64xf32, #tpu.memory_space<vmem>>, %arg7: memref<2x4x256xf32, #tpu.memory_space<vmem>>) attributes {dimension_semantics = [#tpu.dimension_semantics<parallel>], iteration_bounds = array<i64: 1>, scalar_prefetch = 0 : i64, scratch_operands = 0 : i64, tpu.core_type = #tpu.core_type<tc>, window_params = [{transform_indices = @transform_0, window_bounds = array<i64: 2, 4, 256>}, {pipeline_mode = #tpu.pipeline_mode<synchronous>, transform_indices = @transform_1, window_bounds = array<i64: 192, 4>}, {pipeline_mode = #tpu.pipeline_mode<synchronous>, transform_indices = @transform_2, window_bounds = array<i64: 8, 192>}, {pipeline_mode = #tpu.pipeline_mode<synchronous>, transform_indices = @transform_3, window_bounds = array<i64: 4, 1>}, {pipeline_mode = #tpu.pipeline_mode<synchronous>, transform_indices = @transform_4, window_bounds = array<i64: 4, 64>}, {pipeline_mode = #tpu.pipeline_mode<synchronous>, transform_indices = @transform_5, window_bounds = array<i64: 4, 64>}, {transform_indices = @transform_6, window_bounds = array<i64: 2, 4, 256>}]} {
    %c0 = arith.constant 0 : index
    %c0_0 = arith.constant 0 : index
    %0 = vector.load %arg2[%c0, %c0_0] : memref<192x4xf32, #tpu.memory_space<vmem>>, vector<192x4xf32>
    %c0_1 = arith.constant 0 : index
    %c0_2 = arith.constant 0 : index
    %1 = vector.load %arg3[%c0_1, %c0_2] : memref<8x192xbf16, #tpu.memory_space<vmem>>, vector<8x192xbf16>
    %c0_3 = arith.constant 0 : index
    %c0_4 = arith.constant 0 : index
    %2 = vector.load %arg4[%c0_3, %c0_4] : memref<4x1xf32, #tpu.memory_space<vmem>>, vector<4x1xf32>
    %c0_5 = arith.constant 0 : index
    %c0_6 = arith.constant 0 : index
    %3 = vector.load %arg5[%c0_5, %c0_6] : memref<4x64xf32, #tpu.memory_space<vmem>>, vector<4x64xf32>
    %c0_7 = arith.constant 0 : index
    %c0_8 = arith.constant 0 : index
    %4 = vector.load %arg6[%c0_7, %c0_8] : memref<4x64xf32, #tpu.memory_space<vmem>>, vector<4x64xf32>
    %c0_9 = arith.constant 0 : index
    %c0_10 = arith.constant 0 : index
    %c0_11 = arith.constant 0 : index
    %5 = vector.load %arg1[%c0_9, %c0_10, %c0_11] : memref<2x4x256xf32, #tpu.memory_space<vmem>>, vector<1x4x256xf32>
    %6 = vector.shape_cast %5 : vector<1x4x256xf32> to vector<4x256xf32>
    %7 = vector.extract_strided_slice %0 {offsets = [0, 0], sizes = [192, 1], strides = [1, 1]} : vector<192x4xf32> to vector<192x1xf32>
    %8 = vector.extract_strided_slice %6 {offsets = [0, 0], sizes = [1, 256], strides = [1, 1]} : vector<4x256xf32> to vector<1x256xf32>
    %9 = vector.broadcast %7 : vector<192x1xf32> to vector<192x256xf32>
    %10 = vector.broadcast %8 : vector<1x256xf32> to vector<192x256xf32>
    %11 = arith.mulf %9, %10 : vector<192x256xf32>
    %12 = vector.extract_strided_slice %0 {offsets = [0, 1], sizes = [192, 1], strides = [1, 1]} : vector<192x4xf32> to vector<192x1xf32>
    %13 = vector.extract_strided_slice %6 {offsets = [1, 0], sizes = [1, 256], strides = [1, 1]} : vector<4x256xf32> to vector<1x256xf32>
    %14 = vector.broadcast %12 : vector<192x1xf32> to vector<192x256xf32>
    %15 = vector.broadcast %13 : vector<1x256xf32> to vector<192x256xf32>
    %16 = arith.mulf %14, %15 : vector<192x256xf32>
    %17 = arith.addf %11, %16 : vector<192x256xf32>
    %18 = vector.extract_strided_slice %0 {offsets = [0, 2], sizes = [192, 1], strides = [1, 1]} : vector<192x4xf32> to vector<192x1xf32>
    %19 = vector.extract_strided_slice %6 {offsets = [2, 0], sizes = [1, 256], strides = [1, 1]} : vector<4x256xf32> to vector<1x256xf32>
    %20 = vector.broadcast %18 : vector<192x1xf32> to vector<192x256xf32>
    %21 = vector.broadcast %19 : vector<1x256xf32> to vector<192x256xf32>
    %22 = arith.mulf %20, %21 : vector<192x256xf32>
    %23 = arith.addf %17, %22 : vector<192x256xf32>
    %24 = vector.extract_strided_slice %0 {offsets = [0, 3], sizes = [192, 1], strides = [1, 1]} : vector<192x4xf32> to vector<192x1xf32>
    %25 = vector.extract_strided_slice %6 {offsets = [3, 0], sizes = [1, 256], strides = [1, 1]} : vector<4x256xf32> to vector<1x256xf32>
    %26 = vector.broadcast %24 : vector<192x1xf32> to vector<192x256xf32>
    %27 = vector.broadcast %25 : vector<1x256xf32> to vector<192x256xf32>
    %28 = arith.mulf %26, %27 : vector<192x256xf32>
    %29 = arith.addf %23, %28 : vector<192x256xf32>
    %cst = arith.constant dense<0xFF800000> : vector<192xf32>
    %30 = vector.multi_reduction <maximumf>, %29, %cst [1] : vector<192x256xf32> to vector<192xf32>
    %31 = vector.shape_cast %30 : vector<192xf32> to vector<192x1xf32>
    %32 = vector.broadcast %31 : vector<192x1xf32> to vector<192x256xf32>
    %33 = arith.subf %29, %32 : vector<192x256xf32>
    %34 = math.exp %33 : vector<192x256xf32>
    %cst_12 = arith.constant dense<0.000000e+00> : vector<192xf32>
    %35 = vector.multi_reduction <add>, %34, %cst_12 [1] : vector<192x256xf32> to vector<192xf32>
    %36 = vector.shape_cast %35 : vector<192xf32> to vector<192x1xf32>
    %37 = arith.truncf %34 : vector<192x256xf32> to vector<192x256xbf16>
    %cst_13 = arith.constant 1.000000e+00 : f32
    %38 = vector.broadcast %cst_13 : f32 to vector<192x1xf32>
    %39 = arith.divf %38, %36 : vector<192x1xf32>
    %40 = arith.truncf %39 : vector<192x1xf32> to vector<192x1xbf16>
    %41 = vector.broadcast %40 : vector<192x1xbf16> to vector<192x256xbf16>
    %42 = arith.mulf %37, %41 : vector<192x256xbf16>
    %cst_14 = arith.constant dense<0.000000e+00> : vector<8x256xf32>
    %43 = tpu.matmul %1, %42, %cst_14 {dimension_numbers = #tpu.dot_dimension_numbers<[1], [0], [0], [1], [0, 0, 1, 1], [], []>} : vector<8x192xbf16>, vector<192x256xbf16>, vector<8x256xf32> -> vector<8x256xf32>
    %44 = vector.extract_strided_slice %43 {offsets = [4, 0], sizes = [1, 256], strides = [1, 1]} : vector<8x256xf32> to vector<1x256xf32>
    %45 = vector.extract_strided_slice %43 {offsets = [0, 0], sizes = [4, 256], strides = [1, 1]} : vector<8x256xf32> to vector<4x256xf32>
    %cst_15 = arith.constant 9.99999974E-6 : f32
    %46 = vector.broadcast %cst_15 : f32 to vector<1x256xf32>
    %47 = arith.addf %46, %44 : vector<1x256xf32>
    %cst_16 = arith.constant 1.000000e+00 : f32
    %48 = vector.broadcast %cst_16 : f32 to vector<1x256xf32>
    %49 = arith.divf %48, %47 : vector<1x256xf32>
    %50 = vector.broadcast %49 : vector<1x256xf32> to vector<4x256xf32>
    %51 = arith.mulf %45, %50 : vector<4x256xf32>
    %52 = vector.broadcast %2 : vector<4x1xf32> to vector<4x256xf32>
    %53 = arith.addf %51, %52 : vector<4x256xf32>
    %cst_17 = arith.constant 0.000000e+00 : f32
    %54 = vector.broadcast %cst_17 : f32 to vector<4x256xf32>
    %55 = arith.maximumf %53, %54 : vector<4x256xf32>
    %cst_18 = arith.constant dense<0.000000e+00> : vector<4xf32>
    %56 = vector.multi_reduction <add>, %55, %cst_18 [1] : vector<4x256xf32> to vector<4xf32>
    %57 = vector.shape_cast %56 : vector<4xf32> to vector<4x1xf32>
    %cst_19 = arith.constant 2.560000e+02 : f32
    %58 = vector.broadcast %cst_19 : f32 to vector<4x1xf32>
    %59 = arith.divf %57, %58 : vector<4x1xf32>
    %cst_20 = arith.constant dense<0xFF800000> : vector<4xf32>
    %60 = vector.multi_reduction <maximumf>, %55, %cst_20 [1] : vector<4x256xf32> to vector<4xf32>
    %61 = vector.shape_cast %60 : vector<4xf32> to vector<4x1xf32>
    %62 = vector.broadcast %59 : vector<4x1xf32> to vector<4x64xf32>
    %63 = arith.mulf %62, %3 : vector<4x64xf32>
    %cst_21 = arith.constant dense<0.000000e+00> : vector<64xf32>
    %64 = vector.multi_reduction <add>, %63, %cst_21 [0] : vector<4x64xf32> to vector<64xf32>
    %65 = vector.shape_cast %64 : vector<64xf32> to vector<1x64xf32>
    %cst_22 = arith.constant 0.000000e+00 : f32
    %66 = vector.broadcast %cst_22 : f32 to vector<1x64xf32>
    %67 = arith.maximumf %65, %66 : vector<1x64xf32>
    %68 = vector.broadcast %61 : vector<4x1xf32> to vector<4x64xf32>
    %69 = arith.mulf %68, %3 : vector<4x64xf32>
    %cst_23 = arith.constant dense<0.000000e+00> : vector<64xf32>
    %70 = vector.multi_reduction <add>, %69, %cst_23 [0] : vector<4x64xf32> to vector<64xf32>
    %71 = vector.shape_cast %70 : vector<64xf32> to vector<1x64xf32>
    %cst_24 = arith.constant 0.000000e+00 : f32
    %72 = vector.broadcast %cst_24 : f32 to vector<1x64xf32>
    %73 = arith.maximumf %71, %72 : vector<1x64xf32>
    %74 = arith.addf %67, %73 : vector<1x64xf32>
    %75 = vector.broadcast %74 : vector<1x64xf32> to vector<4x64xf32>
    %76 = arith.mulf %4, %75 : vector<4x64xf32>
    %cst_25 = arith.constant dense<0.000000e+00> : vector<4xf32>
    %77 = vector.multi_reduction <add>, %76, %cst_25 [1] : vector<4x64xf32> to vector<4xf32>
    %78 = vector.shape_cast %77 : vector<4xf32> to vector<4x1xf32>
    %79 = arith.negf %78 : vector<4x1xf32>
    %80 = math.exp %79 : vector<4x1xf32>
    %cst_26 = arith.constant 1.000000e+00 : f32
    %81 = vector.broadcast %cst_26 : f32 to vector<4x1xf32>
    %82 = arith.addf %81, %80 : vector<4x1xf32>
    %83 = arith.divf %81, %82 : vector<4x1xf32>
    %84 = vector.broadcast %83 : vector<4x1xf32> to vector<4x256xf32>
    %85 = arith.mulf %55, %84 : vector<4x256xf32>
    %86 = arith.addf %85, %6 : vector<4x256xf32>
    %c0_27 = arith.constant 0 : index
    %c0_28 = arith.constant 0 : index
    %c0_29 = arith.constant 0 : index
    %87 = vector.load %arg7[%c0_27, %c0_28, %c0_29] : memref<2x4x256xf32, #tpu.memory_space<vmem>>, vector<1x4x256xf32>
    %88 = vector.shape_cast %87 : vector<1x4x256xf32> to vector<4x256xf32>
    %89 = vector.shape_cast %86 : vector<4x256xf32> to vector<1x4x256xf32>
    tpu.vector_store %arg7[%c0_27, %c0_28, %c0_29], %89 {strides = array<i32>} : memref<2x4x256xf32, #tpu.memory_space<vmem>>, vector<1x4x256xf32>,
    %c1 = arith.constant 1 : index
    %c0_30 = arith.constant 0 : index
    %c0_31 = arith.constant 0 : index
    %90 = vector.load %arg1[%c1, %c0_30, %c0_31] : memref<2x4x256xf32, #tpu.memory_space<vmem>>, vector<1x4x256xf32>
    %91 = vector.shape_cast %90 : vector<1x4x256xf32> to vector<4x256xf32>
    %92 = vector.extract_strided_slice %0 {offsets = [0, 0], sizes = [192, 1], strides = [1, 1]} : vector<192x4xf32> to vector<192x1xf32>
    %93 = vector.extract_strided_slice %91 {offsets = [0, 0], sizes = [1, 256], strides = [1, 1]} : vector<4x256xf32> to vector<1x256xf32>
    %94 = vector.broadcast %92 : vector<192x1xf32> to vector<192x256xf32>
    %95 = vector.broadcast %93 : vector<1x256xf32> to vector<192x256xf32>
    %96 = arith.mulf %94, %95 : vector<192x256xf32>
    %97 = vector.extract_strided_slice %0 {offsets = [0, 1], sizes = [192, 1], strides = [1, 1]} : vector<192x4xf32> to vector<192x1xf32>
    %98 = vector.extract_strided_slice %91 {offsets = [1, 0], sizes = [1, 256], strides = [1, 1]} : vector<4x256xf32> to vector<1x256xf32>
    %99 = vector.broadcast %97 : vector<192x1xf32> to vector<192x256xf32>
    %100 = vector.broadcast %98 : vector<1x256xf32> to vector<192x256xf32>
    %101 = arith.mulf %99, %100 : vector<192x256xf32>
    %102 = arith.addf %96, %101 : vector<192x256xf32>
    %103 = vector.extract_strided_slice %0 {offsets = [0, 2], sizes = [192, 1], strides = [1, 1]} : vector<192x4xf32> to vector<192x1xf32>
    %104 = vector.extract_strided_slice %91 {offsets = [2, 0], sizes = [1, 256], strides = [1, 1]} : vector<4x256xf32> to vector<1x256xf32>
    %105 = vector.broadcast %103 : vector<192x1xf32> to vector<192x256xf32>
    %106 = vector.broadcast %104 : vector<1x256xf32> to vector<192x256xf32>
    %107 = arith.mulf %105, %106 : vector<192x256xf32>
    %108 = arith.addf %102, %107 : vector<192x256xf32>
    %109 = vector.extract_strided_slice %0 {offsets = [0, 3], sizes = [192, 1], strides = [1, 1]} : vector<192x4xf32> to vector<192x1xf32>
    %110 = vector.extract_strided_slice %91 {offsets = [3, 0], sizes = [1, 256], strides = [1, 1]} : vector<4x256xf32> to vector<1x256xf32>
    %111 = vector.broadcast %109 : vector<192x1xf32> to vector<192x256xf32>
    %112 = vector.broadcast %110 : vector<1x256xf32> to vector<192x256xf32>
    %113 = arith.mulf %111, %112 : vector<192x256xf32>
    %114 = arith.addf %108, %113 : vector<192x256xf32>
    %cst_32 = arith.constant dense<0xFF800000> : vector<192xf32>
    %115 = vector.multi_reduction <maximumf>, %114, %cst_32 [1] : vector<192x256xf32> to vector<192xf32>
    %116 = vector.shape_cast %115 : vector<192xf32> to vector<192x1xf32>
    %117 = vector.broadcast %116 : vector<192x1xf32> to vector<192x256xf32>
    %118 = arith.subf %114, %117 : vector<192x256xf32>
    %119 = math.exp %118 : vector<192x256xf32>
    %cst_33 = arith.constant dense<0.000000e+00> : vector<192xf32>
    %120 = vector.multi_reduction <add>, %119, %cst_33 [1] : vector<192x256xf32> to vector<192xf32>
    %121 = vector.shape_cast %120 : vector<192xf32> to vector<192x1xf32>
    %122 = arith.truncf %119 : vector<192x256xf32> to vector<192x256xbf16>
    %cst_34 = arith.constant 1.000000e+00 : f32
    %123 = vector.broadcast %cst_34 : f32 to vector<192x1xf32>
    %124 = arith.divf %123, %121 : vector<192x1xf32>
    %125 = arith.truncf %124 : vector<192x1xf32> to vector<192x1xbf16>
    %126 = vector.broadcast %125 : vector<192x1xbf16> to vector<192x256xbf16>
    %127 = arith.mulf %122, %126 : vector<192x256xbf16>
    %cst_35 = arith.constant dense<0.000000e+00> : vector<8x256xf32>
    %128 = tpu.matmul %1, %127, %cst_35 {dimension_numbers = #tpu.dot_dimension_numbers<[1], [0], [0], [1], [0, 0, 1, 1], [], []>} : vector<8x192xbf16>, vector<192x256xbf16>, vector<8x256xf32> -> vector<8x256xf32>
    %129 = vector.extract_strided_slice %128 {offsets = [4, 0], sizes = [1, 256], strides = [1, 1]} : vector<8x256xf32> to vector<1x256xf32>
    %130 = vector.extract_strided_slice %128 {offsets = [0, 0], sizes = [4, 256], strides = [1, 1]} : vector<8x256xf32> to vector<4x256xf32>
    %cst_36 = arith.constant 9.99999974E-6 : f32
    %131 = vector.broadcast %cst_36 : f32 to vector<1x256xf32>
    %132 = arith.addf %131, %129 : vector<1x256xf32>
    %cst_37 = arith.constant 1.000000e+00 : f32
    %133 = vector.broadcast %cst_37 : f32 to vector<1x256xf32>
    %134 = arith.divf %133, %132 : vector<1x256xf32>
    %135 = vector.broadcast %134 : vector<1x256xf32> to vector<4x256xf32>
    %136 = arith.mulf %130, %135 : vector<4x256xf32>
    %137 = vector.broadcast %2 : vector<4x1xf32> to vector<4x256xf32>
    %138 = arith.addf %136, %137 : vector<4x256xf32>
    %cst_38 = arith.constant 0.000000e+00 : f32
    %139 = vector.broadcast %cst_38 : f32 to vector<4x256xf32>
    %140 = arith.maximumf %138, %139 : vector<4x256xf32>
    %cst_39 = arith.constant dense<0.000000e+00> : vector<4xf32>
    %141 = vector.multi_reduction <add>, %140, %cst_39 [1] : vector<4x256xf32> to vector<4xf32>
    %142 = vector.shape_cast %141 : vector<4xf32> to vector<4x1xf32>
    %cst_40 = arith.constant 2.560000e+02 : f32
    %143 = vector.broadcast %cst_40 : f32 to vector<4x1xf32>
    %144 = arith.divf %142, %143 : vector<4x1xf32>
    %cst_41 = arith.constant dense<0xFF800000> : vector<4xf32>
    %145 = vector.multi_reduction <maximumf>, %140, %cst_41 [1] : vector<4x256xf32> to vector<4xf32>
    %146 = vector.shape_cast %145 : vector<4xf32> to vector<4x1xf32>
    %147 = vector.broadcast %144 : vector<4x1xf32> to vector<4x64xf32>
    %148 = arith.mulf %147, %3 : vector<4x64xf32>
    %cst_42 = arith.constant dense<0.000000e+00> : vector<64xf32>
    %149 = vector.multi_reduction <add>, %148, %cst_42 [0] : vector<4x64xf32> to vector<64xf32>
    %150 = vector.shape_cast %149 : vector<64xf32> to vector<1x64xf32>
    %cst_43 = arith.constant 0.000000e+00 : f32
    %151 = vector.broadcast %cst_43 : f32 to vector<1x64xf32>
    %152 = arith.maximumf %150, %151 : vector<1x64xf32>
    %153 = vector.broadcast %146 : vector<4x1xf32> to vector<4x64xf32>
    %154 = arith.mulf %153, %3 : vector<4x64xf32>
    %cst_44 = arith.constant dense<0.000000e+00> : vector<64xf32>
    %155 = vector.multi_reduction <add>, %154, %cst_44 [0] : vector<4x64xf32> to vector<64xf32>
    %156 = vector.shape_cast %155 : vector<64xf32> to vector<1x64xf32>
    %cst_45 = arith.constant 0.000000e+00 : f32
    %157 = vector.broadcast %cst_45 : f32 to vector<1x64xf32>
    %158 = arith.maximumf %156, %157 : vector<1x64xf32>
    %159 = arith.addf %152, %158 : vector<1x64xf32>
    %160 = vector.broadcast %159 : vector<1x64xf32> to vector<4x64xf32>
    %161 = arith.mulf %4, %160 : vector<4x64xf32>
    %cst_46 = arith.constant dense<0.000000e+00> : vector<4xf32>
    %162 = vector.multi_reduction <add>, %161, %cst_46 [1] : vector<4x64xf32> to vector<4xf32>
    %163 = vector.shape_cast %162 : vector<4xf32> to vector<4x1xf32>
    %164 = arith.negf %163 : vector<4x1xf32>
    %165 = math.exp %164 : vector<4x1xf32>
    %cst_47 = arith.constant 1.000000e+00 : f32
    %166 = vector.broadcast %cst_47 : f32 to vector<4x1xf32>
    %167 = arith.addf %166, %165 : vector<4x1xf32>
    %168 = arith.divf %166, %167 : vector<4x1xf32>
    %169 = vector.broadcast %168 : vector<4x1xf32> to vector<4x256xf32>
    %170 = arith.mulf %140, %169 : vector<4x256xf32>
    %171 = arith.addf %170, %91 : vector<4x256xf32>
    %c1_48 = arith.constant 1 : index
    %c0_49 = arith.constant 0 : index
    %c0_50 = arith.constant 0 : index
    %172 = vector.load %arg7[%c1_48, %c0_49, %c0_50] : memref<2x4x256xf32, #tpu.memory_space<vmem>>, vector<1x4x256xf32>
    %173 = vector.shape_cast %172 : vector<1x4x256xf32> to vector<4x256xf32>
    %174 = vector.shape_cast %171 : vector<4x256xf32> to vector<1x4x256xf32>
    tpu.vector_store %arg7[%c1_48, %c0_49, %c0_50], %174 {strides = array<i32>} : memref<2x4x256xf32, #tpu.memory_space<vmem>>, vector<1x4x256xf32>,
    return
  }
  func.func @transform_0(%arg0: i32) -> (i32, i32, i32) {
    %c0_i32 = arith.constant 0 : i32
    %c0_i32_0 = arith.constant 0 : i32
    %c0_i32_1 = arith.constant 0 : i32
    return %arg0, %c0_i32, %c0_i32_0 : i32, i32, i32
  }
  func.func @transform_1(%arg0: i32) -> (i32, i32) {
    %c0_i32 = arith.constant 0 : i32
    %c0_i32_0 = arith.constant 0 : i32
    %c0_i32_1 = arith.constant 0 : i32
    return %c0_i32, %c0_i32_0 : i32, i32
  }
  func.func @transform_2(%arg0: i32) -> (i32, i32) {
    %c0_i32 = arith.constant 0 : i32
    %c0_i32_0 = arith.constant 0 : i32
    %c0_i32_1 = arith.constant 0 : i32
    return %c0_i32, %c0_i32_0 : i32, i32
  }
  func.func @transform_3(%arg0: i32) -> (i32, i32) {
    %c0_i32 = arith.constant 0 : i32
    %c0_i32_0 = arith.constant 0 : i32
    %c0_i32_1 = arith.constant 0 : i32
    return %c0_i32, %c0_i32_0 : i32, i32
  }
  func.func @transform_4(%arg0: i32) -> (i32, i32) {
    %c0_i32 = arith.constant 0 : i32
    %c0_i32_0 = arith.constant 0 : i32
    %c0_i32_1 = arith.constant 0 : i32
    return %c0_i32, %c0_i32_0 : i32, i32
  }
  func.func @transform_5(%arg0: i32) -> (i32, i32) {
    %c0_i32 = arith.constant 0 : i32
    %c0_i32_0 = arith.constant 0 : i32
    %c0_i32_1 = arith.constant 0 : i32
    return %c0_i32, %c0_i32_0 : i32, i32
  }
  func.func @transform_6(%arg0: i32) -> (i32, i32, i32) {
    %c0_i32 = arith.constant 0 : i32
    %c0_i32_0 = arith.constant 0 : i32
    %c0_i32_1 = arith.constant 0 : i32
    return %arg0, %c0_i32, %c0_i32_0 : i32, i32, i32
  }
}

</mosaic_0001>

<bundles_post_ra>
// kernel: tpu_custom_call.1
= control target key start
LH: loop header
LB: loop body
LE: loop exit
PB: predicated region body
PF: predicated region fallthrough
CT: control target
= control target key end

     0   :  { %v5038_v1 = vmov 1   ;;  %v5040_v2 = vmov 0   ;;  %s5027_s0 = inlined_call_operand.vmem [shape: f32[2,4,256], index: 0, kind: input, shape index: {}]   ;;  %s5028_s1 = inlined_call_operand.vmem [shape: f32[192,4], index: 1, kind: input, shape index: {}]   ;;  %s5029_s2 = inlined_call_operand.vmem [shape: bf16[8,192], index: 2, kind: input, shape index: {}]   ;;  %s5030_s3 = inlined_call_operand.vmem [shape: f32[4,1], index: 3, kind: input, shape index: {}]   ;;  %s5031_s4 = inlined_call_operand.vmem [shape: f32[4,64], index: 4, kind: input, shape index: {}]   ;;  %s5032_s5 = inlined_call_operand.vmem [shape: f32[4,64], index: 5, kind: input, shape index: {}]   ;;  %s5033_s6 = inlined_call_operand.hbm [shape: f32[2,4,256], index: 6, kind: output, shape index: {}]  }
   0x1   :  { %v2777_v0 = vld [vmem:[%s5028_s1] sm:$0xff]  ;;  %2348 = vset.pattern.permute.xlu1 %v5038_v1  ;;  %2347 = vset.pattern.permute.xlu0 %v5040_v2  ;;  %v26_v3 = vld [vmem:[%s5028_s1 + $0x8] sm:$0xff]  ;;  %v2789_v4 = vld [vmem:[%s5028_s1 + $0x18] sm:$0xff] }
   0x2   :  { %242 = vperm.xlu1 %2348, %v2777_v0   ;;  %56 = vperm.xlu0 %2347, %v2777_v0  }
   0x6   :  { %246 = vperm.xlu1 %2348, %v26_v3   ;;  %61 = vperm.xlu0 %2347, %v26_v3  }
   0x7   :  { %11 = vsyncpa [#allocation3], 0  ;;  %v5034_v5 = vmov 2   ;;  %v2796_v6 = vld [vmem:[%s5028_s1 + $0x30] sm:$0xff]  ;;  %v2806_v8 = vld [vmem:[%s5028_s1 + $0x48] sm:$0xff]  ;;  %v5036_v12 = vmov 3   ;;  %v175_v60 = vlaneseq }
   0x8   :  { %v27_v7 = vld [vmem:[%s5028_s1 + $0x10] sm:$0xff]  ;;  %v2812_v9 = vld [vmem:[%s5028_s1 + $0x60] sm:$0xff]  ;;  %v2819_v10 = vld [vmem:[%s5028_s1 + $0x78] sm:$0xff]  ;;  %vm1273_vm0 = vcmask 523264   ;;  %vm1343_vm1 = vcmask 1043456   ;;  %vm1357_vm2 = vcmask 519168  }
   0x9   :  { %v2826_v11 = vld [vmem:[%s5028_s1 + $0x90] sm:$0xff]  ;;  %v2833_v13 = vld [vmem:[%s5028_s1 + $0xa8] sm:$0xff]  ;;  %v29_v14 = vld [vmem:[%s5028_s1 + $0x20] sm:$0xff]  ;;  %v176_v63 = vshrl.u32 %v175_v60, 7  ;;  %s2736_s8 = smov [#allocation2]  }
   0xa   :  { %2349 = vset.pattern.permute.xlu1 %v5034_v5  ;;  %71 = vperm.xlu0 %2347, %v2789_v4   ;;  %v30_v15 = vld [vmem:[%s5028_s1 + $0x28] sm:$0xff]  ;;  %v32_v16 = vld [vmem:[%s5028_s1 + $0x38] sm:$0xff]  ;;  %v2867_v17 = vld [vmem:[%s5028_s1 + $0x50] sm:$0xff]  ;;  %s2322_s9 = sshll.u32 %s2736_s8, 4  ;;  %s2323_s9 = int_to_ptr.vmem [resolvable:$true] %s2322_s9 }
   0xb   :  { %456 = vperm.xlu1 %2349, %v26_v3   ;;  %v2873_v18 = vld [vmem:[%s5028_s1 + $0x68] sm:$0xff]  ;;  %v2879_v19 = vld [vmem:[%s5028_s1 + $0x80] sm:$0xff]  ;;  %v2889_v21 = vld [vmem:[%s5028_s1 + $0x98] sm:$0xff]  ;;  %s2708_s10 = scalar_lea.vmem %s2323_s9, 256  ;;  %p2713_p1 = scmp.lt.s32.totalorder %s2323_s9, %s2323_s9 }
   0xc   :  { %v33_v20 = vld [vmem:[%s5028_s1 + $0x40] sm:$0xff]  ;;  %v2896_v22 = vld [vmem:[%s5028_s1 + $0xb0] sm:$0xff]  ;;  %v36_v23 = vld [vmem:[%s5028_s1 + $0x58] sm:$0xff]  ;;  %p2709_p0 = scmp.ne.s32.totalorder %s2323_s9, %s2708_s10  ;;  %p2714_p2 = scmp.lt.s32.totalorder %s2708_s10, %s2708_s10 }
   0xd   :  { %5219 = vst [vmem:[#allocation5_spill] sm:$0xff] %v2896_v22  ;;  %v39_v41 = vld [vmem:[%s5028_s1 + $0x70] sm:$0xff]  ;;  %v3005_v55 = vld [vmem:[%s5028_s1 + $0x88] sm:$0xff] }
   0xe   :  { %86 = vperm.xlu0 %2347, %v2796_v6   ;;  %p2715_p3 = por %p2714_p2, %p2713_p1 }
   0xf   :  { %2350 = vset.pattern.permute.xlu1 %v5040_v2 }
  0x10   :  { %66 = vperm.xlu1 %2350, %v27_v7   ;;  %p2716_p4 = pnand %p2715_p3, %p2709_p0 }
  0x12   :  { %101 = vperm.xlu0 %2347, %v2806_v8  }
  0x14   :  { %2351 = vset.pattern.permute.xlu1 %v5038_v1 }
  0x15   :  { %250 = vperm.xlu1 %2351, %v27_v7  }
  0x16   :  { %116 = vperm.xlu0 %2347, %v2812_v9  }
  0x19   :  { %254 = vperm.xlu1 %2351, %v2789_v4  }
  0x1a   :  { %131 = vperm.xlu0 %2347, %v2819_v10  }
  0x1d   :  { %2352 = vset.pattern.permute.xlu1 %v5036_v12 }
  0x1e   :  { %666 = vperm.xlu1 %2352, %v26_v3   ;;  %146 = vperm.xlu0 %2347, %v2826_v11  }
  0x22   :  { %2353 = vset.pattern.permute.xlu1 %v5034_v5  ;;  %161 = vperm.xlu0 %2347, %v2833_v13  }
  0x23   :  { %460 = vperm.xlu1 %2353, %v27_v7  }
  0x26   :  { %2387 = vset.pattern.permute.xlu0 %v5034_v5 }
  0x27   :  { %2354 = vset.pattern.permute.xlu1 %v5040_v2  ;;  %452 = vperm.xlu0 %2387, %v2777_v0  }
  0x28   :  { %76 = vperm.xlu1 %2354, %v29_v14  }
  0x2b   :  { %464 = vperm.xlu0 %2387, %v2789_v4  }
  0x2c   :  { %81 = vperm.xlu1 %2354, %v30_v15  }
  0x2f   :  { %476 = vperm.xlu0 %2387, %v2796_v6  }
  0x30   :  { %2355 = vset.pattern.permute.xlu1 %v5038_v1 }
  0x31   :  { %262 = vperm.xlu1 %2355, %v30_v15  }
  0x33   :  { %488 = vperm.xlu0 %2387, %v2806_v8  }
  0x35   :  { %2356 = vset.pattern.permute.xlu1 %v5036_v12 }
  0x36   :  { %670 = vperm.xlu1 %2356, %v27_v7   ;;  %v177_v7 = vsub.s32 0, %v176_v63 }
  0x37   :  { %500 = vperm.xlu0 %2387, %v2812_v9  }
  0x3a   :  { %2357 = vset.pattern.permute.xlu1 %v5034_v5 }
  0x3b   :  { %468 = vperm.xlu1 %2357, %v29_v14   ;;  %512 = vperm.xlu0 %2387, %v2819_v10  }
  0x3f   :  { %472 = vperm.xlu1 %2357, %v30_v15   ;;  %524 = vperm.xlu0 %2387, %v2826_v11  }
  0x43   :  { %2358 = vset.pattern.permute.xlu1 %v5040_v2  ;;  %536 = vperm.xlu0 %2387, %v2833_v13  }
  0x44   :  { %91 = vperm.xlu1 %2358, %v32_v16  }
  0x47   :  { %2391 = vset.pattern.permute.xlu0 %v5038_v1 }
  0x48   :  { %2359 = vset.pattern.permute.xlu1 %v5038_v1  ;;  %258 = vperm.xlu0 %2391, %v29_v14  }
  0x49   :  { %266 = vperm.xlu1 %2359, %v2796_v6  }
  0x4c   :  { %270 = vperm.xlu0 %2391, %v32_v16  }
  0x4d   :  { %2360 = vset.pattern.permute.xlu1 %v5036_v12 }
  0x4e   :  { %678 = vperm.xlu1 %2360, %v29_v14   ;;  %v2337_v14 = vld [vmem:[%s5027_s0 + $0x8] sm:$0xff] }
  0x50   :  { %282 = vperm.xlu0 %2391, %v2867_v17  }
  0x52   :  { %682 = vperm.xlu1 %2360, %v30_v15   ;;  %v549_v15 = vsub.s32 2, %v176_v63 }
  0x54   :  { %294 = vperm.xlu0 %2391, %v2873_v18  }
  0x56   :  { %2361 = vset.pattern.permute.xlu1 %v5034_v5 }
  0x57   :  { %480 = vperm.xlu1 %2361, %v32_v16  }
  0x58   :  { %306 = vperm.xlu0 %2391, %v2879_v19  }
  0x5b   :  { %2362 = vset.pattern.permute.xlu1 %v5040_v2 }
  0x5c   :  { %96 = vperm.xlu1 %2362, %v33_v20   ;;  %318 = vperm.xlu0 %2391, %v2889_v21  }
  0x60   :  { %2363 = vset.pattern.permute.xlu1 %v5038_v1  ;;  %330 = vperm.xlu0 %2391, %v2896_v22  }
  0x61   :  { %274 = vperm.xlu1 %2363, %v33_v20  }
  0x64   :  { %2393 = vset.pattern.permute.xlu0 %v5036_v12 }
  0x65   :  { %278 = vperm.xlu1 %2363, %v2806_v8   ;;  %662 = vperm.xlu0 %2393, %v2777_v0  }
  0x69   :  { %2364 = vset.pattern.permute.xlu1 %v5036_v12  ;;  %674 = vperm.xlu0 %2393, %v2789_v4   ;;  %v339_v4 = vsub.s32 1, %v176_v63 }
  0x6a   :  { %690 = vperm.xlu1 %2364, %v32_v16   ;;  %v553_v16 = vsub.s32 6, %v176_v63 }
  0x6d   :  { %686 = vperm.xlu0 %2393, %v2796_v6   ;;  %v343_v6 = vsub.s32 5, %v176_v63 }
  0x6e   :  { %2365 = vset.pattern.permute.xlu1 %v5034_v5 }
  0x6f   :  { %484 = vperm.xlu1 %2365, %v33_v20  }
  0x71   :  { %698 = vperm.xlu0 %2393, %v2806_v8   ;;  %v3028_v8 = vsub.s32 4, %v176_v63 }
  0x73   :  { %2366 = vset.pattern.permute.xlu1 %v5040_v2  ;;  %5243 = vst [vmem:[#allocation29_spill] sm:$0xff] %v3028_v8 }
  0x74   :  { %106 = vperm.xlu1 %2366, %v2867_v17  }
  0x75   :  { %710 = vperm.xlu0 %2393, %v2812_v9  }
  0x78   :  { %111 = vperm.xlu1 %2366, %v36_v23  }
  0x79   :  { %722 = vperm.xlu0 %2393, %v2819_v10  }
  0x7c   :  { %2367 = vset.pattern.permute.xlu1 %v5038_v1 }
  0x7d   :  { %286 = vperm.xlu1 %2367, %v36_v23   ;;  %734 = vperm.xlu0 %2393, %v2826_v11  }
  0x81   :  { %2368 = vset.pattern.permute.xlu1 %v5036_v12  ;;  %v2918_v24 = vpop.permute.xlu1 %242  ;;  %v2920_v25 = vpop.permute.xlu0 %56  ;;  %746 = vperm.xlu0 %2393, %v2833_v13  }
  0x82   :  { %694 = vperm.xlu1 %2368, %v33_v20  }
  0x85   :  { %v2923_v26 = vpop.permute.xlu1 %246  ;;  %v2925_v27 = vpop.permute.xlu0 %61  ;;  %750 = vperm.xlu0 %2393, %v2896_v22  }
  0x86   :  { %5220 = vst [vmem:[#allocation6_spill] sm:$0xff] %v2923_v26  ;;  %5221 = vst [vmem:[#allocation7_spill] sm:$0xff] %v2925_v27  ;;  %2369 = vset.pattern.permute.xlu1 %v5034_v5 }
  0x87   :  { %492 = vperm.xlu1 %2369, %v2867_v17  }
  0x89   :  { %v2930_v28 = vpop.permute.xlu0 %71  ;;  %2399 = vset.pattern.permute.xlu0 %v5040_v2 }
  0x8a   :  { %v2933_v29 = vpop.permute.xlu1 %456 }
  0x8b   :  { %496 = vperm.xlu1 %2369, %v36_v23  }
  0x8d   :  { %v2935_v30 = vpop.permute.xlu0 %86 }
  0x8e   :  { %5222 = vst [vmem:[#allocation8_spill] sm:$0xff] %v2935_v30 }
  0x8f   :  { %2370 = vset.pattern.permute.xlu1 %v5040_v2  ;;  %v2938_v31 = vpop.permute.xlu1 %66 }
  0x90   :  { %5223 = vst [vmem:[#allocation9_spill] sm:$0xff] %v2938_v31  ;;  %121 = vperm.xlu1 %2370, %v2873_v18  }
  0x91   :  { %v2941_v32 = vpop.permute.xlu0 %101 }
  0x94   :  { %2371 = vset.pattern.permute.xlu1 %v5038_v1  ;;  %v2944_v33 = vpop.permute.xlu1 %250 }
  0x95   :  { %5224 = vst [vmem:[#allocation10_spill] sm:$0xff] %v2944_v33  ;;  %290 = vperm.xlu1 %2371, %v2812_v9   ;;  %v2947_v34 = vpop.permute.xlu0 %116 }
  0x96   :  { %5225 = vst [vmem:[#allocation11_spill] sm:$0xff] %v2947_v34 }
  0x98   :  { %v2949_v35 = vpop.permute.xlu1 %254 }
  0x99   :  { %2372 = vset.pattern.permute.xlu1 %v5036_v12  ;;  %v2952_v36 = vpop.permute.xlu0 %131 }
  0x9a   :  { %5226 = vst [vmem:[#allocation12_spill] sm:$0xff] %v2952_v36  ;;  %702 = vperm.xlu1 %2372, %v2867_v17  }
  0x9d   :  { %v2955_v37 = vpop.permute.xlu1 %666  ;;  %v2957_v38 = vpop.permute.xlu0 %146 }
  0x9e   :  { %5227 = vst [vmem:[#allocation13_spill] sm:$0xff] %v2957_v38  ;;  %706 = vperm.xlu1 %2372, %v36_v23  }
  0xa1   :  { %v2959_v39 = vpop.permute.xlu0 %161 }
  0xa2   :  { %5228 = vst [vmem:[#allocation14_spill] sm:$0xff] %v2959_v39  ;;  %2373 = vset.pattern.permute.xlu1 %v5034_v5  ;;  %v2962_v40 = vpop.permute.xlu1 %460 }
  0xa3   :  { %5229 = vst [vmem:[#allocation15_spill] sm:$0xff] %v2962_v40  ;;  %504 = vperm.xlu1 %2373, %v2873_v18  }
  0xa6   :  { %v2968_v42 = vpop.permute.xlu0 %452 }
  0xa7   :  { %2374 = vset.pattern.permute.xlu1 %v5040_v2  ;;  %v2971_v43 = vpop.permute.xlu1 %76 }
  0xa8   :  { %5230 = vst [vmem:[#allocation16_spill] sm:$0xff] %v2971_v43  ;;  %126 = vperm.xlu1 %2374, %v39_v41  }
  0xaa   :  { %v2973_v44 = vpop.permute.xlu0 %464 }
  0xab   :  { %v2975_v45 = vpop.permute.xlu1 %81 }
  0xac   :  { %2375 = vset.pattern.permute.xlu1 %v5038_v1 }
  0xad   :  { %298 = vperm.xlu1 %2375, %v39_v41  }
  0xae   :  { %v2978_v46 = vpop.permute.xlu0 %476 }
  0xaf   :  { %5231 = vst [vmem:[#allocation17_spill] sm:$0xff] %v2978_v46 }
  0xb0   :  { %v2980_v47 = vpop.permute.xlu1 %262 }
  0xb1   :  { %302 = vperm.xlu1 %2375, %v2819_v10   ;;  %v53_v10 = vld [vmem:[%s5027_s0] sm:$0xff] }
  0xb2   :  { %v2983_v48 = vpop.permute.xlu0 %488  ;;  %v344_v20 = vrot.slane %v53_v10, %v343_v6  ;;  %v178_v23 = vrot.slane %v53_v10, %v177_v7 }
  0xb3   :  { %5232 = vst [vmem:[#allocation18_spill] sm:$0xff] %v2983_v48 }
  0xb5   :  { %2376 = vset.pattern.permute.xlu1 %v5036_v12  ;;  %v2986_v49 = vpop.permute.xlu1 %670 }
  0xb6   :  { %5233 = vst [vmem:[#allocation19_spill] sm:$0xff] %v2986_v49  ;;  %714 = vperm.xlu1 %2376, %v2873_v18   ;;  %v2989_v50 = vpop.permute.xlu0 %500  ;;  %v340_v18 = vrot.slane %v53_v10, %v339_v4 }
  0xb7   :  { %5234 = vst [vmem:[#allocation20_spill] sm:$0xff] %v2989_v50  ;;  %v3048_v50 = vrot.slane %v344_v20, %v339_v4 }
  0xba   :  { %2377 = vset.pattern.permute.xlu1 %v5034_v5  ;;  %v2992_v51 = vpop.permute.xlu1 %468  ;;  %v2994_v52 = vpop.permute.xlu0 %512 }
  0xbb   :  { %5235 = vst [vmem:[#allocation21_spill] sm:$0xff] %v2992_v51  ;;  %5236 = vst [vmem:[#allocation22_spill] sm:$0xff] %v2994_v52  ;;  %508 = vperm.xlu1 %2377, %v39_v41   ;;  %v3046_v51 = vrot.slane %v340_v18, %v339_v4  ;;  %v5248_v52 = vmov 0  }
  0xbe   :  { %v2996_v53 = vpop.permute.xlu1 %472  ;;  %v2998_v54 = vpop.permute.xlu0 %524 }
  0xbf   :  { %5237 = vst [vmem:[#allocation23_spill] sm:$0xff] %v2998_v54  ;;  %2378 = vset.pattern.permute.xlu1 %v5040_v2  ;;  %v1407_v2 = vrot.slane %v2337_v14, %v3028_v8  ;;  %v1583_v54 = vrot.slane %v2337_v14, %v549_v15 }
  0xc0   :  { %136 = vperm.xlu1 %2378, %v2879_v19  }
  0xc2   :  { %v3007_v56 = vpop.permute.xlu0 %536 }
  0xc3   :  { %5238 = vst [vmem:[#allocation24_spill] sm:$0xff] %v3007_v56  ;;  %v3009_v57 = vpop.permute.xlu1 %91  ;;  %v554_v56 = vrot.slane %v53_v10, %v553_v16 }
  0xc4   :  { %141 = vperm.xlu1 %2378, %v3005_v55  }
  0xc5   :  { %v3070_v20 = vrot.slane %v554_v56, %v549_v15 }
  0xc7   :  { %v3012_v58 = vpop.permute.xlu0 %258  ;;  %v566_v39 = vmul.f32 %v3070_v20, %v2968_v42 }
  0xc8   :  { %5239 = vst [vmem:[#allocation25_spill] sm:$0xff] %v3012_v58  ;;  %2379 = vset.pattern.permute.xlu1 %v5038_v1  ;;  %v3015_v59 = vpop.permute.xlu1 %266  ;;  %v1403_v1 = vrot.slane %v2337_v14, %v177_v7  ;;  %v3050_v58 = vrot.slane %v178_v23, %v177_v7  ;;  %v1587_v23 = vrot.slane %v2337_v14, %v553_v16 }
  0xc9   :  { %5240 = vst [vmem:[#allocation26_spill] sm:$0xff] %v3015_v59  ;;  %310 = vperm.xlu1 %2379, %v3005_v55   ;;  %v763_v59 = vsub.s32 7, %v176_v63 }
  0xca   :  { %5246 = vst [vmem:[#allocation32_spill] sm:$0xff] %v3050_v58  ;;  %v3063_v43 = vrot.slane %v1403_v1, %v177_v7  ;;  %v356_v1 = vmul.f32 %v3048_v50, %v2918_v24  ;;  %v3104_v38 = vrot.slane %v1587_v23, %v549_v15 }
  0xcb   :  { %v3018_v61 = vpop.permute.xlu0 %270 }
  0xcc   :  { %5251 = vst [vmem:[#allocation36_spill] sm:$0xff] %v3063_v43 }
  0xcd   :  { %2380 = vset.pattern.permute.xlu1 %v5036_v12  ;;  %v3021_v62 = vpop.permute.xlu1 %678  ;;  %v1473_v12 = vrot.slane %v2337_v14, %v343_v6 }
  0xce   :  { %5241 = vst [vmem:[#allocation27_spill] sm:$0xff] %v3021_v62  ;;  %718 = vperm.xlu1 %2380, %v39_v41   ;;  %v182_v41 = vrot.slane %v53_v10, %v3028_v8  ;;  %v759_v62 = vsub.s32 3, %v176_v63  ;;  %v3065_v63 = vrot.slane %v1407_v2, %v177_v7  ;;  %v193_v2 = vmul.f32 %v3050_v58, %v2920_v25 }
  0xcf   :  { %v3023_v0 = vpop.permute.xlu0 %282  ;;  %v3061_v46 = vrot.slane %v1473_v12, %v339_v4  ;;  %v355_v12 = vmul.f32 %v3046_v51, %v2918_v24 }
  0xd0   :  { %5242 = vst [vmem:[#allocation28_spill] sm:$0xff] %v3023_v0  ;;  %v550_v0 = vrot.slane %v53_v10, %v549_v15  ;;  %v3052_v49 = vrot.slane %v182_v41, %v177_v7  ;;  %5252 = vst [vmem:[#allocation37_spill] sm:$0xff] %v3065_v63  ;;  %v3072_v41 = vrot.slane %v1583_v54, %v549_v15 }
  0xd1   :  { %v3025_v3 = vpop.permute.xlu1 %682  ;;  %v1419_v7 = vmul.f32 %v3065_v63, %v2920_v25  ;;  %v1487_v36 = vmul.f32 %v3061_v46, %v2923_v26  ;;  %v403_v34 = vadd.f32 %v355_v12, %v193_v2 }
  0xd2   :  { %2381 = vset.pattern.permute.xlu1 %v5034_v5  ;;  %v1469_v5 = vrot.slane %v2337_v14, %v339_v4  ;;  %5247 = vst [vmem:[#allocation33_spill] sm:$0xff] %v3052_v49  ;;  %v3068_v18 = vrot.slane %v550_v0, %v549_v15  ;;  %v194_v56 = vmul.f32 %v3052_v49, %v2920_v25 }
  0xd3   :  { %516 = vperm.xlu1 %2381, %v2879_v19   ;;  %v3031_v9 = vpop.permute.xlu0 %294  ;;  %v1598_v15 = vmul.f32 %v3072_v41, %v2968_v42 }
  0xd4   :  { %5244 = vst [vmem:[#allocation30_spill] sm:$0xff] %v3031_v9  ;;  %v3059_v8 = vrot.slane %v1469_v5, %v339_v4  ;;  %v764_v9 = vrot.slane %v53_v10, %v763_v59  ;;  %v1701_v5 = vrot.slane %v2337_v14, %v763_v59  ;;  %v1485_v59 = vmul.f32 %v3061_v46, %v2918_v24 }
  0xd5   :  { %v1418_v4 = vmul.f32 %v3063_v43, %v2920_v25  ;;  %v404_v31 = vadd.f32 %v356_v1, %v194_v56 }
  0xd6   :  { %v3039_v17 = vpop.permute.xlu1 %480  ;;  %v1484_v54 = vmul.f32 %v3059_v8, %v2918_v24  ;;  %v1486_v16 = vmul.f32 %v3059_v8, %v2923_v26  ;;  %v565_v24 = vmul.f32 %v3068_v18, %v2968_v42  ;;  %v3108_v40 = vrot.slane %v764_v9, %v759_v62 }
  0xd7   :  { %520 = vperm.xlu1 %2381, %v3005_v55   ;;  %v3043_v60 = vpop.permute.xlu0 %306  ;;  %v1599_v9 = vmul.f32 %v3104_v38, %v2968_v42  ;;  %v614_v26 = vadd.f32 %v566_v39, %v404_v31  ;;  %v1533_v48 = vadd.f32 %v1485_v59, %v1419_v7  ;;  %v199_v42 = vmul.f32 %v3050_v58, %v2930_v28 }
  0xd8   :  { %5245 = vst [vmem:[#allocation31_spill] sm:$0xff] %v3043_v60  ;;  %v1532_v22 = vadd.f32 %v1484_v54, %v1418_v4  ;;  %v613_v23 = vadd.f32 %v565_v24, %v403_v34  ;;  %v1600_v34 = vmul.f32 %v3072_v41, %v2933_v29  ;;  %v1601_v31 = vmul.f32 %v3104_v38, %v2933_v29 }
  0xd9   :  { %v200_v54 = vmul.f32 %v3052_v49, %v2930_v28 }
  0xdb   :  { %2382 = vset.pattern.permute.xlu1 %v5248_v52  ;;  %v3055_v60 = vpop.permute.xlu1 %96  ;;  %v3057_v6 = vpop.permute.xlu0 %318 }
  0xdc   :  { %5249 = vst [vmem:[#allocation34_spill] sm:$0xff] %v3055_v60  ;;  %5250 = vst [vmem:[#allocation35_spill] sm:$0xff] %v3057_v6  ;;  %151 = vperm.xlu1 %2382, %v2889_v21   ;;  %v760_v60 = vrot.slane %v53_v10, %v759_v62  ;;  %v1697_v6 = vrot.slane %v2337_v14, %v759_v62  ;;  %v5254_v10 = vmov 1  }
  0xde   :  { %v3106_v25 = vrot.slane %v760_v60, %v759_v62  ;;  %v3122_v60 = vrot.slane %v1701_v5, %v759_v62  ;;  %v1646_v5 = vadd.f32 %v1598_v15, %v1532_v22 }
  0xdf   :  { %v3082_v0 = vpop.permute.xlu0 %330 }
  0xe0   :  { %5253 = vst [vmem:[#allocation38_spill] sm:$0xff] %v3082_v0  ;;  %2383 = vset.pattern.permute.xlu1 %v5254_v10  ;;  %v3093_v14 = vpop.permute.xlu1 %274  ;;  %v1420_v0 = vmul.f32 %v3063_v43, %v2925_v27  ;;  %v1715_v4 = vmul.f32 %v3122_v60, %v2955_v37 }
  0xe1   :  { %5255 = vst [vmem:[#allocation39_spill] sm:$0xff] %v3093_v14  ;;  %314 = vperm.xlu1 %2383, %v2826_v11   ;;  %v3110_v14 = vrot.slane %v1697_v6, %v759_v62  ;;  %v1421_v11 = vmul.f32 %v3065_v63, %v2925_v27  ;;  %v5256_v6 = vmov 3  }
  0xe2   :  { %v1534_v27 = vadd.f32 %v1486_v16, %v1420_v0  ;;  %v1647_v0 = vadd.f32 %v1599_v9, %v1533_v48  ;;  %v1424_v16 = vmul.f32 %v3063_v43, %v2930_v28  ;;  %v1425_v9 = vmul.f32 %v3065_v63, %v2930_v28 }
  0xe3   :  { %v1535_v62 = vadd.f32 %v1487_v36, %v1421_v11  ;;  %v1714_v36 = vmul.f32 %v3110_v14, %v2955_v37 }
  0xe4   :  { %v3116_v33 = vpop.permute.xlu1 %278  ;;  %v663_v30 = vpop.permute.xlu0 %662  ;;  %v1648_v11 = vadd.f32 %v1600_v34, %v1534_v27 }
  0xe5   :  { %2384 = vset.pattern.permute.xlu1 %v5256_v6  ;;  %v775_v12 = vmul.f32 %v3106_v25, %v663_v30  ;;  %v776_v1 = vmul.f32 %v3108_v40, %v663_v30  ;;  %v1712_v2 = vmul.f32 %v3110_v14, %v663_v30  ;;  %v1713_v56 = vmul.f32 %v3122_v60, %v663_v30 }
  0xe6   :  { %726 = vperm.xlu1 %2384, %v2879_v19   ;;  %v361_v30 = vmul.f32 %v3046_v51, %v2949_v35  ;;  %v1649_v15 = vadd.f32 %v1601_v31, %v1535_v62  ;;  %v5263_v62 = vmov 2  }
  0xe7   :  { %v3136_v39 = vadd.f32 %v775_v12, %v613_v23  ;;  %v3138_v19 = vadd.f32 %v776_v1, %v614_v26  ;;  %v362_v26 = vmul.f32 %v3048_v50, %v2949_v35  ;;  %v3155_v48 = vadd.f32 %v1712_v2, %v1646_v5 }
  0xe8   :  { %v3157_v7 = vadd.f32 %v1713_v56, %v1647_v0  ;;  %v675_v24 = vpop.permute.xlu0 %674  ;;  %v1490_v23 = vmul.f32 %v3059_v8, %v2949_v35  ;;  %v572_v12 = vmul.f32 %v3070_v20, %v2973_v44  ;;  %v1491_v1 = vmul.f32 %v3061_v46, %v2949_v35 }
  0xe9   :  { %5257 = vst [vmem:[#allocation40_spill] sm:$0xff] %v3136_v39  ;;  %5258 = vst [vmem:[#allocation41_spill] sm:$0xff] %v3138_v19  ;;  %v3144_v59 = vpop.permute.xlu1 %690  ;;  %v871_v22 = vmax.f32 %v3136_v39, %v3138_v19  ;;  %v3171_v2 = vadd.f32 %v1714_v36, %v1648_v11  ;;  %v3173_v27 = vadd.f32 %v1715_v4, %v1649_v15  ;;  %v3196_v15 = vld [vmem:[%s5028_s1 + $0xa0] sm:$0xff] }
  0xea   :  { %730 = vperm.xlu1 %2384, %v3005_v55   ;;  %5259 = vst [vmem:[#allocation42_spill] sm:$0xff] %v3155_v48  ;;  %5260 = vst [vmem:[#allocation43_spill] sm:$0xff] %v3157_v7  ;;  %v571_v55 = vmul.f32 %v3068_v18, %v2973_v44  ;;  %v409_v56 = vadd.f32 %v361_v30, %v199_v42  ;;  %v1808_v34 = vmax.f32 %v3155_v48, %v3157_v7 }
  0xeb   :  { %872 = vmax.xlane.f32.xlu0 %v871_v22  ;;  %5261 = vst [vmem:[#allocation44_spill] sm:$0xff] %v3171_v2  ;;  %5262 = vst [vmem:[#allocation45_spill] sm:$0xff] %v3173_v27  ;;  %v410_v31 = vadd.f32 %v362_v26, %v200_v54  ;;  %v781_v5 = vmul.f32 %v3106_v25, %v675_v24  ;;  %v782_v0 = vmul.f32 %v3108_v40, %v675_v24 }
  0xec   :  { %v1604_v35 = vmul.f32 %v3072_v41, %v2973_v44  ;;  %v619_v36 = vadd.f32 %v571_v55, %v409_v56  ;;  %v1538_v30 = vadd.f32 %v1490_v23, %v1424_v16  ;;  %v1605_v4 = vmul.f32 %v3104_v38, %v2973_v44 }
  0xed   :  { %v620_v42 = vadd.f32 %v572_v12, %v410_v31  ;;  %v365_v22 = vmul.f32 %v3046_v51, %v2980_v47  ;;  %v366_v54 = vmul.f32 %v3048_v50, %v2980_v47  ;;  %v1811_v26 = vmax.f32 %v3171_v2, %v3173_v27 }
  0xee   :  { %2385 = vset.pattern.permute.xlu1 %v5263_v62  ;;  %v3176_v28 = vpop.permute.xlu1 %484  ;;  %v1539_v11 = vadd.f32 %v1491_v1, %v1425_v9  ;;  %v3198_v55 = vadd.f32 %v781_v5, %v619_v36  ;;  %v1718_v44 = vmul.f32 %v3110_v14, %v675_v24  ;;  %v1719_v23 = vmul.f32 %v3122_v60, %v675_v24 }
  0xef   :  { %5264 = vst [vmem:[#allocation46_spill] sm:$0xff] %v3176_v28  ;;  %528 = vperm.xlu1 %2385, %v2889_v21   ;;  %1809 = vmax.xlane.f32.xlu0 %v1808_v34  ;;  %v3200_v16 = vadd.f32 %v782_v0, %v620_v42  ;;  %v203_v12 = vmul.f32 %v3050_v58, %v2975_v45 }
  0xf0   :  { %5265 = vst [vmem:[#allocation47_spill] sm:$0xff] %v3198_v55  ;;  %v204_v56 = vmul.f32 %v3052_v49, %v2975_v45  ;;  %v1428_v9 = vmul.f32 %v3063_v43, %v2975_v45  ;;  %v1652_v34 = vadd.f32 %v1604_v35, %v1538_v30  ;;  %v1494_v31 = vmul.f32 %v3059_v8, %v2980_v47 }
  0xf1   :  { %5266 = vst [vmem:[#allocation48_spill] sm:$0xff] %v3200_v16  ;;  %v1653_v5 = vadd.f32 %v1605_v4, %v1539_v11  ;;  %v575_v24 = vmul.f32 %v3068_v18, %v2996_v53  ;;  %v576_v0 = vmul.f32 %v3070_v20, %v2996_v53  ;;  %v1495_v36 = vmul.f32 %v3061_v46, %v2980_v47 }
  0xf2   :  { %v413_v42 = vadd.f32 %v365_v22, %v203_v12  ;;  %v414_v19 = vadd.f32 %v366_v54, %v204_v56  ;;  %v785_v35 = vmul.f32 %v3106_v25, %v3025_v3  ;;  %v880_v30 = vmax.f32 %v3198_v55, %v3200_v16 }
  0xf3   :  { %2386 = vset.pattern.permute.xlu1 %v5248_v52  ;;  %v3211_v1 = vpop.permute.xlu1 %106  ;;  %1812 = vmax.xlane.f32.xlu0 %v1811_v26  ;;  %v3226_v4 = vadd.f32 %v1718_v44, %v1652_v34  ;;  %v3228_v26 = vadd.f32 %v1719_v23, %v1653_v5  ;;  %v786_v11 = vmul.f32 %v3108_v40, %v3025_v3 }
  0xf4   :  { %5267 = vst [vmem:[#allocation49_spill] sm:$0xff] %v3211_v1  ;;  %156 = vperm.xlu1 %2386, %v3196_v15   ;;  %v3234_v47 = vmul.f32 %v3050_v58, %v2941_v32  ;;  %v3238_v22 = vmul.f32 %v3052_v49, %v2941_v32  ;;  %v1429_v54 = vmul.f32 %v3065_v63, %v2975_v45 }
  0xf5   :  { %5268 = vst [vmem:[#allocation50_spill] sm:$0xff] %v3226_v4  ;;  %5269 = vst [vmem:[#allocation51_spill] sm:$0xff] %v3228_v26  ;;  %v1608_v44 = vmul.f32 %v3072_v41, %v2996_v53  ;;  %v623_v23 = vadd.f32 %v575_v24, %v413_v42  ;;  %v624_v56 = vadd.f32 %v576_v0, %v414_v19 }
  0xf6   :  { %v1542_v34 = vadd.f32 %v1494_v31, %v1428_v9  ;;  %v1609_v5 = vmul.f32 %v3104_v38, %v2996_v53  ;;  %v369_v16 = vmul.f32 %v3046_v51, %v3018_v61  ;;  %v370_v55 = vmul.f32 %v3048_v50, %v3018_v61 }
  0xf7   :  { %v3242_v12 = vpop.permute.xlu1 %111  ;;  %881 = vmax.xlane.f32.xlu0 %v880_v30  ;;  %v1543_v45 = vadd.f32 %v1495_v36, %v1429_v54  ;;  %v1722_v39 = vmul.f32 %v3110_v14, %v3025_v3  ;;  %v1817_v19 = vmax.f32 %v3226_v4, %v3228_v26  ;;  %v3258_v9 = vadd.f32 %v785_v35, %v623_v23 }
  0xf8   :  { %2388 = vset.pattern.permute.xlu1 %v5254_v10  ;;  %v3260_v53 = vadd.f32 %v786_v11, %v624_v56  ;;  %v1723_v31 = vmul.f32 %v3122_v60, %v3025_v3  ;;  %v1436_v24 = vmul.f32 %v3063_v43, %v2941_v32  ;;  %v207_v0 = vmul.f32 %v3050_v58, %v3009_v57  ;;  %v3280_v56 = vpop.permute.xlu0 %686 }
  0xf9   :  { %322 = vperm.xlu1 %2388, %v3196_v15   ;;  %5270 = vst [vmem:[#allocation52_spill] sm:$0xff] %v3258_v9  ;;  %v208_v36 = vmul.f32 %v3052_v49, %v3009_v57  ;;  %v1656_v42 = vadd.f32 %v1608_v44, %v1542_v34  ;;  %v1498_v30 = vmul.f32 %v3059_v8, %v3018_v61  ;;  %5272 = vst [vmem:[#allocation54_spill] sm:$0xff] %v3280_v56 }
  0xfa   :  { %5271 = vst [vmem:[#allocation53_spill] sm:$0xff] %v3260_v53  ;;  %v1657_v11 = vadd.f32 %v1609_v5, %v1543_v45  ;;  %v579_v3 = vmul.f32 %v3068_v18, %v3039_v17  ;;  %v580_v54 = vmul.f32 %v3070_v20, %v3039_v17  ;;  %v1499_v23 = vmul.f32 %v3061_v46, %v3018_v61 }
  0xfb   :  { %1818 = vmax.xlane.f32.xlu0 %v1817_v19  ;;  %v3282_v26 = vadd.f32 %v1722_v39, %v1656_v42  ;;  %v417_v44 = vadd.f32 %v369_v16, %v207_v0  ;;  %v418_v34 = vadd.f32 %v370_v55, %v208_v36  ;;  %v886_v5 = vmax.f32 %v3258_v9, %v3260_v53 }
  0xfc   :  { %v3272_v35 = vpop.permute.xlu1 %286  ;;  %v3287_v45 = vadd.f32 %v1723_v31, %v1657_v11  ;;  %v789_v19 = vmul.f32 %v3106_v25, %v3144_v59  ;;  %v790_v4 = vmul.f32 %v3108_v40, %v3144_v59  ;;  %v1432_v61 = vmul.f32 %v3063_v43, %v3009_v57 }
  0xfd   :  { %5273 = vst [vmem:[#allocation55_spill] sm:$0xff] %v3282_v26  ;;  %326 = vperm.xlu1 %2388, %v2833_v13   ;;  %v1433_v39 = vmul.f32 %v3065_v63, %v3009_v57  ;;  %v1612_v13 = vmul.f32 %v3072_v41, %v3039_v17  ;;  %v1613_v55 = vmul.f32 %v3104_v38, %v3039_v17 }
  0xfe   :  { %5274 = vst [vmem:[#allocation56_spill] sm:$0xff] %v3287_v45  ;;  %v373_v16 = vmul.f32 %v3046_v51, %v3116_v33  ;;  %v374_v31 = vmul.f32 %v3048_v50, %v3116_v33  ;;  %v627_v0 = vadd.f32 %v579_v3, %v417_v44  ;;  %v628_v36 = vadd.f32 %v580_v54, %v418_v34  ;;  %v5278_v34 = vld [vmem:[#allocation18_spill] sm:$0xff] }
  0xff   :  { %887 = vmax.xlane.f32.xlu0 %v886_v5  ;;  %v1546_v11 = vadd.f32 %v1498_v30, %v1432_v61  ;;  %v1547_v53 = vadd.f32 %v1499_v23, %v1433_v39  ;;  %v1726_v57 = vmul.f32 %v3110_v14, %v3144_v59  ;;  %v1727_v9 = vmul.f32 %v3122_v60, %v3144_v59  ;;  %v699_v23 = vpop.permute.xlu0 %698 }
 0x100   :  { %v1437_v17 = vmul.f32 %v3065_v63, %v2941_v32  ;;  %v1823_v5 = vmax.f32 %v3282_v26, %v3287_v45  ;;  %v3316_v3 = vadd.f32 %v789_v19, %v627_v0  ;;  %v3318_v54 = vadd.f32 %v790_v4, %v628_v36  ;;  %v5305_v26 = vld [vmem:[#allocation15_spill] sm:$0xff] }
 0x101   :  { %v3305_v42 = vpop.permute.xlu1 %694  ;;  %2389 = vset.pattern.permute.xlu1 %v5256_v6  ;;  %v1502_v30 = vmul.f32 %v3059_v8, %v3116_v33  ;;  %v1660_v44 = vadd.f32 %v1612_v13, %v1546_v11  ;;  %v1661_v59 = vadd.f32 %v1613_v55, %v1547_v53  ;;  %v583_v32 = vmul.f32 %v3068_v18, %v5278_v34 }
 0x102   :  { %5275 = vst [vmem:[#allocation57_spill] sm:$0xff] %v3305_v42  ;;  %5276 = vst [vmem:[#allocation58_spill] sm:$0xff] %v3316_v3  ;;  %738 = vperm.xlu1 %2389, %v2889_v21   ;;  %v1503_v61 = vmul.f32 %v3061_v46, %v3116_v33  ;;  %v421_v19 = vadd.f32 %v373_v16, %v3234_v47  ;;  %v422_v4 = vadd.f32 %v374_v31, %v3238_v22 }
 0x103   :  { %5277 = vst [vmem:[#allocation59_spill] sm:$0xff] %v3318_v54  ;;  %1824 = vmax.xlane.f32.xlu0 %v1823_v5  ;;  %v584_v39 = vmul.f32 %v3070_v20, %v5278_v34  ;;  %v3331_v0 = vadd.f32 %v1726_v57, %v1660_v44  ;;  %v3333_v36 = vadd.f32 %v1727_v9, %v1661_v59 }
 0x104   :  { %v892_v53 = vmax.f32 %v3316_v3, %v3318_v54  ;;  %v793_v13 = vmul.f32 %v3106_v25, %v699_v23  ;;  %v794_v33 = vmul.f32 %v3108_v40, %v699_v23  ;;  %v1550_v47 = vadd.f32 %v1502_v30, %v1436_v24  ;;  %v5304_v3 = vld [vmem:[#allocation12_spill] sm:$0xff] }
 0x105   :  { %5279 = vst [vmem:[#allocation18_spill] sm:$0xff] %v3331_v0  ;;  %5280 = vst [vmem:[#allocation60_spill] sm:$0xff] %v3333_v36  ;;  %v1616_v22 = vmul.f32 %v3072_v41, %v5278_v34  ;;  %v1617_v55 = vmul.f32 %v3104_v38, %v5278_v34  ;;  %v631_v9 = vadd.f32 %v583_v32, %v421_v19  ;;  %v5284_v32 = vld [vmem:[#allocation5_spill] sm:$0xff] }
 0x106   :  { %v3335_v21 = vpop.permute.xlu1 %492  ;;  %2390 = vset.pattern.permute.xlu1 %v5263_v62  ;;  %v632_v16 = vadd.f32 %v584_v39, %v422_v4  ;;  %v1551_v31 = vadd.f32 %v1503_v61, %v1437_v17  ;;  %v1829_v11 = vmax.f32 %v3331_v0, %v3333_v36  ;;  %v1730_v24 = vmul.f32 %v3110_v14, %v699_v23  ;;  %v3362_v61 = vld [vmem:[%s5028_s1 + $0xb8] sm:$0xff] }
 0x107   :  { %5281 = vst [vmem:[#allocation61_spill] sm:$0xff] %v3335_v21  ;;  %532 = vperm.xlu1 %2390, %v3196_v15   ;;  %893 = vmax.xlane.f32.xlu0 %v892_v53  ;;  %v3349_v5 = vadd.f32 %v793_v13, %v631_v9  ;;  %v1731_v30 = vmul.f32 %v3122_v60, %v699_v23  ;;  %v5288_v13 = vld [vmem:[#allocation6_spill] sm:$0xff] }
 0x108   :  { %v3351_v44 = vadd.f32 %v794_v33, %v632_v16  ;;  %v1664_v59 = vadd.f32 %v1616_v22, %v1550_v47  ;;  %v1665_v34 = vadd.f32 %v1617_v55, %v1551_v31  ;;  %v357_v33 = vmul.f32 %v3046_v51, %v5288_v13  ;;  %v5289_v47 = vld [vmem:[#allocation7_spill] sm:$0xff] }
 0x109   :  { %5282 = vst [vmem:[#allocation62_spill] sm:$0xff] %v3349_v5  ;;  %v195_v22 = vmul.f32 %v3050_v58, %v5289_v47  ;;  %v358_v55 = vmul.f32 %v3048_v50, %v5288_v13  ;;  %v196_v9 = vmul.f32 %v3052_v49, %v5289_v47  ;;  %v567_v16 = vmul.f32 %v3068_v18, %v2933_v29 }
 0x10a   :  { %v497_v57 = vpop.permute.xlu1 %496  ;;  %5283 = vst [vmem:[#allocation63_spill] sm:$0xff] %v3351_v44  ;;  %v898_v17 = vmax.f32 %v3349_v5, %v3351_v44  ;;  %v3364_v19 = vadd.f32 %v1730_v24, %v1664_v59  ;;  %v3366_v4 = vadd.f32 %v1731_v30, %v1665_v34  ;;  %v377_v31 = vmul.f32 %v3046_v51, %v3272_v35 }
 0x10b   :  { %2392 = vset.pattern.permute.xlu1 %v5248_v52  ;;  %1830 = vmax.xlane.f32.xlu0 %v1829_v11  ;;  %v378_v11 = vmul.f32 %v3048_v50, %v3272_v35  ;;  %v215_v30 = vmul.f32 %v3050_v58, %v3242_v12  ;;  %v216_v59 = vmul.f32 %v3052_v49, %v3242_v12 }
 0x10c   :  { %166 = vperm.xlu1 %2392, %v5284_v32   ;;  %5285 = vst [vmem:[#allocation5_spill] sm:$0xff] %v3364_v19  ;;  %5286 = vst [vmem:[#allocation64_spill] sm:$0xff] %v3366_v4  ;;  %v1835_v39 = vmax.f32 %v3364_v19, %v3366_v4  ;;  %v587_v34 = vmul.f32 %v3068_v18, %v497_v57  ;;  %v1507_v13 = vmul.f32 %v3061_v46, %v3272_v35 }
 0x10d   :  { %v568_v47 = vmul.f32 %v3070_v20, %v2933_v29  ;;  %v426_v4 = vadd.f32 %v378_v11, %v216_v59  ;;  %v1440_v44 = vmul.f32 %v3063_v43, %v3242_v12  ;;  %v1441_v5 = vmul.f32 %v3065_v63, %v3242_v12  ;;  %v5291_v12 = vld [vmem:[#allocation8_spill] sm:$0xff] }
 0x10e   :  { %v1620_v0 = vmul.f32 %v3072_v41, %v497_v57  ;;  %v3437_v59 = vmul.f32 %v3065_v63, %v5291_v12  ;;  %v223_v45 = vmul.f32 %v3050_v58, %v5304_v3  ;;  %v569_v27 = vmul.f32 %v3068_v18, %v5305_v26 }
 0x10f   :  { %v3368_v23 = vpop.permute.xlu1 %121  ;;  %899 = vmax.xlane.f32.xlu0 %v898_v17  ;;  %v588_v17 = vmul.f32 %v3070_v20, %v497_v57 }
 0x110   :  { %171 = vperm.xlu1 %2392, %v3362_v61  }
 0x113   :  { %1836 = vmax.xlane.f32.xlu0 %v1835_v39  ;;  %v1506_v39 = vmul.f32 %v3059_v8, %v3272_v35  ;;  %v1621_v35 = vmul.f32 %v3104_v38, %v497_v57 }
 0x114   :  { %v3373_v53 = vpop.permute.xlu1 %290  ;;  %2394 = vset.pattern.permute.xlu1 %v5254_v10  ;;  %v405_v10 = vadd.f32 %v357_v33, %v195_v22  ;;  %v406_v33 = vadd.f32 %v358_v55, %v196_v9  ;;  %v425_v22 = vadd.f32 %v377_v31, %v215_v30 }
 0x115   :  { %5287 = vst [vmem:[#allocation65_spill] sm:$0xff] %v3373_v53  ;;  %334 = vperm.xlu1 %2394, %v3362_v61   ;;  %v1554_v9 = vadd.f32 %v1506_v39, %v1440_v44 }
 0x116   :  { %v615_v19 = vadd.f32 %v567_v16, %v405_v10  ;;  %v635_v54 = vadd.f32 %v587_v34, %v425_v22  ;;  %v1555_v16 = vadd.f32 %v1507_v13, %v1441_v5  ;;  %v3420_v10 = vmul.f32 %v3050_v58, %v5291_v12  ;;  %v5297_v22 = vld [vmem:[#allocation9_spill] sm:$0xff] }
 0x117   :  { %v616_v30 = vadd.f32 %v568_v47, %v406_v33  ;;  %v3433_v5 = vmul.f32 %v3063_v43, %v5291_v12 }
 0x118   :  { %v1669_v44 = vadd.f32 %v1621_v35, %v1555_v16  ;;  %v197_v35 = vmul.f32 %v3050_v58, %v5297_v22  ;;  %v1423_v16 = vmul.f32 %v3065_v63, %v5297_v22 }
 0x119   :  { %v3391_v24 = vpop.permute.xlu1 %702  ;;  %2395 = vset.pattern.permute.xlu1 %v5256_v6 }
 0x11a   :  { %5290 = vst [vmem:[#allocation6_spill] sm:$0xff] %v3391_v24  ;;  %742 = vperm.xlu1 %2395, %v3196_v15   ;;  %v636_v15 = vadd.f32 %v588_v17, %v426_v4 }
 0x11d   :  { %v707_v36 = vpop.permute.xlu1 %706 }
 0x11e   :  { %v797_v55 = vmul.f32 %v3106_v25, %v707_v36  ;;  %v798_v29 = vmul.f32 %v3108_v40, %v707_v36  ;;  %2396 = vset.pattern.permute.xlu1 %v5263_v62  ;;  %v1734_v31 = vmul.f32 %v3110_v14, %v707_v36  ;;  %v1735_v11 = vmul.f32 %v3122_v60, %v707_v36 }
 0x11f   :  { %540 = vperm.xlu1 %2396, %v5284_v32   ;;  %v3429_v62 = vmul.f32 %v3052_v49, %v5291_v12  ;;  %v1668_v36 = vadd.f32 %v1620_v0, %v1554_v9  ;;  %v5294_v32 = vld [vmem:[#allocation10_spill] sm:$0xff]  ;;  %v1422_v9 = vmul.f32 %v3063_v43, %v5297_v22 }
 0x120   :  { %v3423_v57 = vadd.f32 %v797_v55, %v635_v54  ;;  %v3425_v4 = vadd.f32 %v798_v29, %v636_v15  ;;  %v359_v54 = vmul.f32 %v3046_v51, %v5294_v32  ;;  %v360_v34 = vmul.f32 %v3048_v50, %v5294_v32 }
 0x121   :  { %v1488_v13 = vmul.f32 %v3059_v8, %v5294_v32  ;;  %v1489_v0 = vmul.f32 %v3061_v46, %v5294_v32  ;;  %v3451_v33 = vadd.f32 %v1734_v31, %v1668_v36  ;;  %v3453_v47 = vadd.f32 %v1735_v11, %v1669_v44  ;;  %v5298_v31 = vld [vmem:[#allocation11_spill] sm:$0xff] }
 0x122   :  { %5292 = vst [vmem:[#allocation7_spill] sm:$0xff] %v3423_v57  ;;  %5293 = vst [vmem:[#allocation8_spill] sm:$0xff] %v3425_v4  ;;  %v3443_v17 = vpop.permute.xlu1 %504  ;;  %v904_v39 = vmax.f32 %v3423_v57, %v3425_v4  ;;  %v777_v15 = vmul.f32 %v3106_v25, %v2955_v37  ;;  %v778_v55 = vmul.f32 %v3108_v40, %v2955_v37 }
 0x123   :  { %5295 = vst [vmem:[#allocation10_spill] sm:$0xff] %v3451_v33  ;;  %5296 = vst [vmem:[#allocation66_spill] sm:$0xff] %v3453_v47  ;;  %544 = vperm.xlu1 %2396, %v3362_v61   ;;  %v198_v29 = vmul.f32 %v3052_v49, %v5297_v22  ;;  %v3470_v11 = vmul.f32 %v3050_v58, %v5298_v31  ;;  %v3474_v12 = vmul.f32 %v3052_v49, %v5298_v31 }
 0x124   :  { %905 = vmax.xlane.f32.xlu0 %v904_v39  ;;  %v3478_v37 = vmul.f32 %v3063_v43, %v5298_v31  ;;  %v3482_v36 = vmul.f32 %v3065_v63, %v5298_v31  ;;  %v407_v44 = vadd.f32 %v359_v54, %v197_v35  ;;  %v1841_v39 = vmax.f32 %v3451_v33, %v3453_v47 }
 0x125   :  { %5299 = vst [vmem:[#allocation9_spill] sm:$0xff] %v3470_v11  ;;  %5300 = vst [vmem:[#allocation11_spill] sm:$0xff] %v3474_v12  ;;  %v408_v22 = vadd.f32 %v360_v34, %v198_v29  ;;  %v1536_v4 = vadd.f32 %v1488_v13, %v1422_v9  ;;  %v1537_v57 = vadd.f32 %v1489_v0, %v1423_v16 }
 0x126   :  { %5301 = vst [vmem:[#allocation67_spill] sm:$0xff] %v3478_v37  ;;  %5302 = vst [vmem:[#allocation68_spill] sm:$0xff] %v3482_v36  ;;  %v3493_v2 = vadd.f32 %v777_v15, %v615_v19  ;;  %v3495_v31 = vadd.f32 %v778_v55, %v616_v30  ;;  %v570_v54 = vmul.f32 %v3070_v20, %v5305_v26  ;;  %v5308_v30 = vld [vmem:[#allocation13_spill] sm:$0xff]  ;;  %v5313_v55 = vld [vmem:[#allocation14_spill] sm:$0xff] }
 0x127   :  { %v3484_v32 = vpop.permute.xlu1 %126  ;;  %2397 = vset.pattern.permute.xlu1 %v5256_v6  ;;  %v1602_v34 = vmul.f32 %v3072_v41, %v5305_v26  ;;  %v1603_v13 = vmul.f32 %v3104_v38, %v5305_v26  ;;  %v224_v0 = vmul.f32 %v3052_v49, %v5304_v3  ;;  %v3508_v6 = vmul.f32 %v3063_v43, %v5304_v3 }
 0x128   :  { %5303 = vst [vmem:[#allocation69_spill] sm:$0xff] %v3484_v32  ;;  %5306 = vst [vmem:[#allocation12_spill] sm:$0xff] %v3493_v2  ;;  %754 = vperm.xlu1 %2397, %v3362_v61   ;;  %1842 = vmax.xlane.f32.xlu0 %v1841_v39  ;;  %v3512_v19 = vmul.f32 %v3065_v63, %v5304_v3  ;;  %v3516_v35 = vmul.f32 %v3050_v58, %v5308_v30 }
 0x129   :  { %5307 = vst [vmem:[#allocation15_spill] sm:$0xff] %v3495_v31  ;;  %v3520_v26 = vmul.f32 %v3052_v49, %v5308_v30  ;;  %v3524_v61 = vmul.f32 %v3063_v43, %v5308_v30  ;;  %v3528_v15 = vmul.f32 %v3065_v63, %v5308_v30  ;;  %v3532_v3 = vmul.f32 %v3050_v58, %v5313_v55 }
 0x12a   :  { %5309 = vst [vmem:[#allocation13_spill] sm:$0xff] %v3516_v35  ;;  %v3536_v29 = vmul.f32 %v3052_v49, %v5313_v55  ;;  %v3540_v9 = vmul.f32 %v3063_v43, %v5313_v55  ;;  %v3544_v16 = vmul.f32 %v3065_v63, %v5313_v55  ;;  %v3550_v47 = vadd.f32 %v569_v27, %v407_v44  ;;  %v5322_v35 = vld [vmem:[#allocation17_spill] sm:$0xff] }
 0x12b   :  { %5310 = vst [vmem:[#allocation70_spill] sm:$0xff] %v3520_v26  ;;  %5311 = vst [vmem:[#allocation71_spill] sm:$0xff] %v3524_v61  ;;  %v3552_v33 = vadd.f32 %v570_v54, %v408_v22  ;;  %v220_v27 = vmul.f32 %v3052_v49, %v3368_v23  ;;  %v1445_v44 = vmul.f32 %v3065_v63, %v3368_v23  ;;  %v5320_v22 = vld [vmem:[#allocation16_spill] sm:$0xff] }
 0x12c   :  { %5312 = vst [vmem:[#allocation72_spill] sm:$0xff] %v3528_v15  ;;  %5314 = vst [vmem:[#allocation14_spill] sm:$0xff] %v3532_v3  ;;  %v3546_v39 = vpop.permute.xlu1 %298  ;;  %v3554_v3 = vadd.f32 %v1602_v34, %v1536_v4  ;;  %2398 = vset.pattern.permute.xlu1 %v5248_v52  ;;  %v1444_v52 = vmul.f32 %v3063_v43, %v3368_v23  ;;  %v3577_v54 = vmul.f32 %v3050_v58, %v5320_v22 }
 0x12d   :  { %5315 = vst [vmem:[#allocation73_spill] sm:$0xff] %v3536_v29  ;;  %5316 = vst [vmem:[#allocation74_spill] sm:$0xff] %v3540_v9  ;;  %v3556_v29 = vadd.f32 %v1603_v13, %v1537_v57  ;;  %v5319_v9 = vld [vmem:[#allocation30_spill] sm:$0xff]  ;;  %v3581_v34 = vmul.f32 %v3052_v49, %v5320_v22  ;;  %v3583_v13 = vpop.permute.xlu0 %710  ;;  %v592_v48 = vmul.f32 %v3070_v20, %v3443_v17 }
 0x12e   :  { %5317 = vst [vmem:[#allocation75_spill] sm:$0xff] %v3544_v16  ;;  %5318 = vst [vmem:[#allocation76_spill] sm:$0xff] %v3546_v39  ;;  %v381_v7 = vmul.f32 %v3046_v51, %v5319_v9  ;;  %v382_v55 = vmul.f32 %v3048_v50, %v5319_v9  ;;  %v219_v16 = vmul.f32 %v3050_v58, %v3368_v23 }
 0x12f   :  { %v1510_v4 = vmul.f32 %v3059_v8, %v5319_v9  ;;  %v1511_v57 = vmul.f32 %v3061_v46, %v5319_v9  ;;  %5321 = vst [vmem:[#allocation30_spill] sm:$0xff] %v3583_v13  ;;  %v591_v9 = vmul.f32 %v3068_v18, %v3443_v17  ;;  %v3591_v23 = vmul.f32 %v3063_v43, %v5320_v22 }
 0x130   :  { %v303_v30 = vpop.permute.xlu1 %302  ;;  %v3595_v15 = vmul.f32 %v3065_v63, %v5320_v22  ;;  %v3601_v39 = vmul.f32 %v3068_v18, %v5322_v35  ;;  %v3605_v32 = vmul.f32 %v3070_v20, %v5322_v35  ;;  %v429_v36 = vadd.f32 %v381_v7, %v219_v16 }
 0x131   :  { %v385_v61 = vmul.f32 %v3046_v51, %v303_v30  ;;  %v386_v26 = vmul.f32 %v3048_v50, %v303_v30  ;;  %v430_v13 = vadd.f32 %v382_v55, %v220_v27  ;;  %v3609_v24 = vmul.f32 %v3072_v41, %v5322_v35  ;;  %v723_v21 = vpop.permute.xlu0 %722 }
 0x132   :  { %v3613_v22 = vmul.f32 %v3104_v38, %v5322_v35  ;;  %v1558_v37 = vadd.f32 %v1510_v4, %v1444_v52  ;;  %v1559_v12 = vadd.f32 %v1511_v57, %v1445_v44  ;;  %v639_v11 = vadd.f32 %v591_v9, %v429_v36  ;;  %v5323_v57 = vld [vmem:[#allocation22_spill] sm:$0xff] }
 0x133   :  { %v640_v42 = vadd.f32 %v592_v48, %v430_v13  ;;  %v1624_v53 = vmul.f32 %v3072_v41, %v3443_v17  ;;  %v1625_v7 = vmul.f32 %v3104_v38, %v3443_v17  ;;  %v1514_v16 = vmul.f32 %v3059_v8, %v303_v30 }
 0x134   :  { %v1515_v55 = vmul.f32 %v3061_v46, %v303_v30  ;;  %v433_v1 = vadd.f32 %v385_v61, %v223_v45  ;;  %v434_v28 = vadd.f32 %v386_v26, %v224_v0  ;;  %v595_v52 = vmul.f32 %v3068_v18, %v5323_v57  ;;  %v5324_v30 = vld [vmem:[#allocation19_spill] sm:$0xff] }
 0x135   :  { %v715_v27 = vpop.permute.xlu1 %714  ;;  %v596_v17 = vmul.f32 %v3070_v20, %v5323_v57  ;;  %v805_v44 = vmul.f32 %v3106_v25, %v723_v21  ;;  %v779_v45 = vmul.f32 %v3106_v25, %v5324_v30  ;;  %v1672_v61 = vadd.f32 %v1624_v53, %v1558_v37 }
 0x136   :  { %v801_v35 = vmul.f32 %v3106_v25, %v715_v27  ;;  %v802_v4 = vmul.f32 %v3108_v40, %v715_v27  ;;  %v1738_v36 = vmul.f32 %v3110_v14, %v715_v27  ;;  %v1739_v48 = vmul.f32 %v3122_v60, %v715_v27 }
 0x137   :  { %v1673_v13 = vadd.f32 %v1625_v7, %v1559_v12  ;;  %v643_v9 = vadd.f32 %v595_v52, %v433_v1  ;;  %v806_v27 = vmul.f32 %v3108_v40, %v723_v21  ;;  %v1562_v63 = vadd.f32 %v1514_v16, %v3508_v6 }
 0x138   :  { %v3632_v0 = vadd.f32 %v801_v35, %v639_v11  ;;  %v3634_v26 = vadd.f32 %v802_v4, %v640_v42  ;;  %v1563_v43 = vadd.f32 %v1515_v55, %v3512_v19  ;;  %v3643_v56 = vadd.f32 %v1738_v36, %v1672_v61  ;;  %v5329_v19 = vld [vmem:[#allocation25_spill] sm:$0xff] }
 0x139   :  { %v3645_v11 = vadd.f32 %v1739_v48, %v1673_v13  ;;  %v644_v42 = vadd.f32 %v596_v17, %v434_v28  ;;  %v1628_v53 = vmul.f32 %v3072_v41, %v5323_v57  ;;  %v780_v1 = vmul.f32 %v3108_v40, %v5324_v30 }
 0x13a   :  { %5325 = vst [vmem:[#allocation16_spill] sm:$0xff] %v3632_v0  ;;  %5326 = vst [vmem:[#allocation17_spill] sm:$0xff] %v3634_v26  ;;  %v3639_v49 = vpop.permute.xlu1 %508  ;;  %v910_v58 = vmax.f32 %v3632_v0, %v3634_v26  ;;  %v1716_v12 = vmul.f32 %v3110_v14, %v5324_v30  ;;  %v1717_v37 = vmul.f32 %v3122_v60, %v5324_v30  ;;  %v5332_v30 = vld [vmem:[#allocation20_spill] sm:$0xff]  ;;  %v5365_v0 = vld [vmem:[#allocation33_spill] sm:$0xff] }
 0x13b   :  { %5327 = vst [vmem:[#allocation22_spill] sm:$0xff] %v3643_v56  ;;  %5328 = vst [vmem:[#allocation19_spill] sm:$0xff] %v3645_v11  ;;  %v1629_v6 = vmul.f32 %v3104_v38, %v5323_v57  ;;  %v363_v7 = vmul.f32 %v3046_v51, %v5329_v19  ;;  %v364_v28 = vmul.f32 %v3048_v50, %v5329_v19 }
 0x13c   :  { %v1492_v16 = vmul.f32 %v3059_v8, %v5329_v19  ;;  %911 = vmax.xlane.f32.xlu0 %v910_v58  ;;  %v1493_v55 = vmul.f32 %v3061_v46, %v5329_v19  ;;  %v1676_v35 = vadd.f32 %v1628_v53, %v1562_v63  ;;  %v1742_v4 = vmul.f32 %v3110_v14, %v723_v21 }
 0x13d   :  { %v1743_v36 = vmul.f32 %v3122_v60, %v723_v21  ;;  %v1847_v48 = vmax.f32 %v3643_v56, %v3645_v11  ;;  %v3669_v57 = vadd.f32 %v805_v44, %v643_v9  ;;  %v3671_v52 = vadd.f32 %v806_v27, %v644_v42  ;;  %v5337_v42 = vld [vmem:[#allocation21_spill] sm:$0xff] }
 0x13e   :  { %v1677_v17 = vadd.f32 %v1629_v6, %v1563_v43  ;;  %v3675_v61 = vmul.f32 %v3068_v18, %v5332_v30  ;;  %v3679_v58 = vmul.f32 %v3070_v20, %v5332_v30  ;;  %v3683_v63 = vmul.f32 %v3072_v41, %v5332_v30 }
 0x13f   :  { %5330 = vst [vmem:[#allocation25_spill] sm:$0xff] %v3669_v57  ;;  %5331 = vst [vmem:[#allocation77_spill] sm:$0xff] %v3671_v52  ;;  %v3687_v21 = vmul.f32 %v3104_v38, %v5332_v30  ;;  %v3689_v44 = vpop.permute.xlu1 %136  ;;  %v3692_v43 = vadd.f32 %v779_v45, %v3550_v47  ;;  %v3695_v13 = vadd.f32 %v780_v1, %v3552_v33 }
 0x140   :  { %1848 = vmax.xlane.f32.xlu0 %v1847_v48  ;;  %v3698_v9 = vadd.f32 %v1716_v12, %v3554_v3  ;;  %v3701_v27 = vadd.f32 %v1717_v37, %v3556_v29  ;;  %v573_v53 = vmul.f32 %v3068_v18, %v5337_v42  ;;  %v411_v6 = vadd.f32 %v363_v7, %v3577_v54  ;;  %v5341_v37 = vld [vmem:[#allocation27_spill] sm:$0xff] }
 0x141   :  { %5333 = vst [vmem:[#allocation20_spill] sm:$0xff] %v3692_v43  ;;  %5334 = vst [vmem:[#allocation78_spill] sm:$0xff] %v3695_v13  ;;  %v412_v19 = vadd.f32 %v364_v28, %v3581_v34  ;;  %v1540_v48 = vadd.f32 %v1492_v16, %v3591_v23  ;;  %v916_v47 = vmax.f32 %v3669_v57, %v3671_v52  ;;  %v5340_v34 = vld [vmem:[#allocation26_spill] sm:$0xff]  ;;  %v5342_v52 = vld [vmem:[#allocation23_spill] sm:$0xff] }
 0x142   :  { %5335 = vst [vmem:[#allocation79_spill] sm:$0xff] %v3698_v9  ;;  %5336 = vst [vmem:[#allocation80_spill] sm:$0xff] %v3701_v27  ;;  %v3710_v33 = vadd.f32 %v1742_v4, %v1676_v35  ;;  %v3712_v45 = vadd.f32 %v1743_v36, %v1677_v17  ;;  %v1541_v3 = vadd.f32 %v1493_v55, %v3595_v15 }
 0x143   :  { %v574_v29 = vmul.f32 %v3070_v20, %v5337_v42  ;;  %v1606_v1 = vmul.f32 %v3072_v41, %v5337_v42  ;;  %v1607_v54 = vmul.f32 %v3104_v38, %v5337_v42  ;;  %v367_v23 = vmul.f32 %v3046_v51, %v5340_v34  ;;  %v3723_v12 = vpop.permute.xlu1 %141 }
 0x144   :  { %5338 = vst [vmem:[#allocation21_spill] sm:$0xff] %v3710_v33  ;;  %5339 = vst [vmem:[#allocation81_spill] sm:$0xff] %v3712_v45  ;;  %917 = vmax.xlane.f32.xlu0 %v916_v47  ;;  %v783_v7 = vmul.f32 %v3106_v25, %v5341_v37  ;;  %v784_v15 = vmul.f32 %v3108_v40, %v5341_v37  ;;  %v1720_v28 = vmul.f32 %v3110_v14, %v5341_v37 }
 0x145   :  { %v1721_v16 = vmul.f32 %v3122_v60, %v5341_v37  ;;  %v368_v55 = vmul.f32 %v3048_v50, %v5340_v34  ;;  %v1496_v35 = vmul.f32 %v3059_v8, %v5340_v34  ;;  %v1497_v4 = vmul.f32 %v3061_v46, %v5340_v34 }
 0x146   :  { %v621_v36 = vadd.f32 %v573_v53, %v411_v6  ;;  %v1853_v17 = vmax.f32 %v3710_v33, %v3712_v45  ;;  %v622_v30 = vadd.f32 %v574_v29, %v412_v19  ;;  %v1654_v42 = vadd.f32 %v1606_v1, %v1540_v48 }
 0x147   :  { %v1655_v47 = vadd.f32 %v1607_v54, %v1541_v3  ;;  %v3743_v57 = vmul.f32 %v3068_v18, %v5342_v52  ;;  %v877_v37 = vmax.f32 %v3692_v43, %v3695_v13  ;;  %v415_v56 = vadd.f32 %v367_v23, %v3420_v10 }
 0x148   :  { %v3750_v34 = vpop.permute.xlu1 %310  ;;  %1854 = vmax.xlane.f32.xlu0 %v1853_v17  ;;  %v3752_v53 = vadd.f32 %v783_v7, %v621_v36  ;;  %v3754_v6 = vadd.f32 %v784_v15, %v622_v30  ;;  %v3756_v19 = vadd.f32 %v1720_v28, %v1654_v42  ;;  %v3762_v3 = vmul.f32 %v3070_v20, %v5342_v52  ;;  %v5350_v7 = vld [vmem:[#allocation24_spill] sm:$0xff]  ;;  %v5355_v17 = vld [vmem:[#allocation31_spill] sm:$0xff] }
 0x149   :  { %5343 = vst [vmem:[#allocation26_spill] sm:$0xff] %v3743_v57  ;;  %v3758_v48 = vadd.f32 %v1721_v16, %v1655_v47  ;;  %v416_v29 = vadd.f32 %v368_v55, %v3429_v62  ;;  %v1544_v1 = vadd.f32 %v1496_v35, %v3433_v5  ;;  %v1545_v10 = vadd.f32 %v1497_v4, %v3437_v59  ;;  %v5354_v5 = vld [vmem:[#allocation28_spill] sm:$0xff] }
 0x14a   :  { %5344 = vst [vmem:[#allocation27_spill] sm:$0xff] %v3752_v53  ;;  %5345 = vst [vmem:[#allocation23_spill] sm:$0xff] %v3754_v6  ;;  %v3769_v54 = vmul.f32 %v3072_v41, %v5342_v52  ;;  %v3773_v23 = vmul.f32 %v3104_v38, %v5342_v52  ;;  %v3777_v15 = vmul.f32 %v3068_v18, %v5350_v7 }
 0x14b   :  { %5346 = vst [vmem:[#allocation82_spill] sm:$0xff] %v3758_v48  ;;  %5347 = vst [vmem:[#allocation83_spill] sm:$0xff] %v3762_v3  ;;  %v3781_v28 = vmul.f32 %v3070_v20, %v5350_v7  ;;  %v3785_v62 = vmul.f32 %v3072_v41, %v5350_v7  ;;  %v3789_v59 = vmul.f32 %v3046_v51, %v5354_v5 }
 0x14c   :  { %5348 = vst [vmem:[#allocation84_spill] sm:$0xff] %v3769_v54  ;;  %5349 = vst [vmem:[#allocation85_spill] sm:$0xff] %v3773_v23  ;;  %v3793_v52 = vmul.f32 %v3048_v50, %v5354_v5  ;;  %v3797_v16 = vmul.f32 %v3059_v8, %v5354_v5  ;;  %v3801_v55 = vmul.f32 %v3061_v46, %v5354_v5 }
 0x14d   :  { %5351 = vst [vmem:[#allocation86_spill] sm:$0xff] %v3777_v15  ;;  %5352 = vst [vmem:[#allocation87_spill] sm:$0xff] %v3781_v28  ;;  %v883_v35 = vmax.f32 %v3752_v53, %v3754_v6  ;;  %v625_v36 = vadd.f32 %v3601_v39, %v415_v56  ;;  %v3810_v30 = vmul.f32 %v3046_v51, %v5355_v17  ;;  %v3815_v47 = vpop.permute.xlu1 %718  ;;  %v5360_v39 = vld [vmem:[#allocation54_spill] sm:$0xff]  ;;  %v5366_v53 = vld [vmem:[#allocation36_spill] sm:$0xff] }
 0x14e   :  { %5353 = vst [vmem:[#allocation88_spill] sm:$0xff] %v3785_v62  ;;  %v5357_v42 = vmax.f32 %v3493_v2, %v3495_v31  ;;  %v626_v5 = vadd.f32 %v3605_v32, %v416_v29  ;;  %v1658_v11 = vadd.f32 %v3609_v24, %v1544_v1  ;;  %v1659_v45 = vadd.f32 %v3613_v22, %v1545_v10  ;;  %v5362_v24 = vld [vmem:[#allocation34_spill] sm:$0xff]  ;;  %v5363_v22 = vld [vmem:[#allocation32_spill] sm:$0xff]  ;;  %v5364_v1 = vld [vmem:[#allocation39_spill] sm:$0xff] }
 0x14f   :  { %5356 = vst [vmem:[#allocation28_spill] sm:$0xff] %v3810_v30  ;;  %v3822_v4 = vmul.f32 %v3048_v50, %v5355_v17  ;;  %v3826_v56 = vmul.f32 %v3059_v8, %v5355_v17  ;;  %v787_v33 = vmul.f32 %v3106_v25, %v5360_v39  ;;  %v3834_v32 = vmul.f32 %v3061_v46, %v5355_v17  ;;  %v5367_v31 = vld [vmem:[#allocation37_spill] sm:$0xff]  ;;  %v5368_v62 = vld [vmem:[#allocation35_spill] sm:$0xff] }
 0x150   :  { %875 = vmax.xlane.f32.xlu1 %v5357_v42  ;;  %v788_v42 = vmul.f32 %v3108_v40, %v5360_v39  ;;  %v209_v29 = vmul.f32 %v5363_v22, %v5362_v24  ;;  %v371_v10 = vmul.f32 %v3046_v51, %v5364_v1  ;;  %v372_v26 = vmul.f32 %v3048_v50, %v5364_v1 }
 0x151   :  { %5358 = vst [vmem:[#allocation31_spill] sm:$0xff] %v3822_v4  ;;  %5359 = vst [vmem:[#allocation89_spill] sm:$0xff] %v3826_v56  ;;  %v210_v6 = vmul.f32 %v5365_v0, %v5362_v24  ;;  %v1434_v13 = vmul.f32 %v5366_v53, %v5362_v24  ;;  %v1500_v43 = vmul.f32 %v3059_v8, %v5364_v1  ;;  %v5381_v4 = vld [vmem:[#allocation57_spill] sm:$0xff] }
 0x152   :  { %5361 = vst [vmem:[#allocation54_spill] sm:$0xff] %v3834_v32  ;;  %v1501_v17 = vmul.f32 %v3061_v46, %v5364_v1  ;;  %v1435_v2 = vmul.f32 %v5367_v31, %v5362_v24  ;;  %v3854_v23 = vmul.f32 %v3046_v51, %v5368_v62  ;;  %v3858_v54 = vmul.f32 %v3048_v50, %v5368_v62  ;;  %v3864_v28 = vpop.permute.xlu1 %516  ;;  %v5376_v32 = vld [vmem:[#allocation49_spill] sm:$0xff] }
 0x153   :  { %v3862_v7 = vmul.f32 %v3059_v8, %v5368_v62  ;;  %v3866_v15 = vadd.f32 %v787_v33, %v625_v36  ;;  %v3868_v1 = vadd.f32 %v788_v42, %v626_v5  ;;  %v1724_v24 = vmul.f32 %v3110_v14, %v5360_v39 }
 0x154   :  { %5369 = vst [vmem:[#allocation34_spill] sm:$0xff] %v3854_v23  ;;  %5370 = vst [vmem:[#allocation32_spill] sm:$0xff] %v3858_v54  ;;  %878 = vmax.xlane.f32.xlu1 %v877_v37  ;;  %v1725_v3 = vmul.f32 %v3122_v60, %v5360_v39  ;;  %v3876_v57 = vmul.f32 %v3061_v46, %v5368_v62  ;;  %v5375_v54 = vld [vmem:[#allocation46_spill] sm:$0xff]  ;;  %v419_v37 = vadd.f32 %v371_v10, %v209_v29  ;;  %v5380_v10 = vld [vmem:[#allocation65_spill] sm:$0xff] }
 0x155   :  { %5371 = vst [vmem:[#allocation39_spill] sm:$0xff] %v3862_v7  ;;  %5372 = vst [vmem:[#allocation33_spill] sm:$0xff] %v3866_v15  ;;  %v581_v7 = vmul.f32 %v3068_v18, %v5375_v54  ;;  %v420_v23 = vadd.f32 %v372_v26, %v210_v6  ;;  %v582_v33 = vmul.f32 %v3070_v20, %v5375_v54 }
 0x156   :  { %5373 = vst [vmem:[#allocation36_spill] sm:$0xff] %v3868_v1  ;;  %5374 = vst [vmem:[#allocation37_spill] sm:$0xff] %v3876_v57  ;;  %v1614_v36 = vmul.f32 %v3072_v41, %v5375_v54  ;;  %v1548_v5 = vadd.f32 %v1500_v43, %v1434_v13  ;;  %v1549_v42 = vadd.f32 %v1501_v17, %v1435_v2  ;;  %v3897_v2 = vpop.permute.xlu1 %520 }
 0x157   :  { %v1615_v39 = vmul.f32 %v3104_v38, %v5375_v54  ;;  %v213_v62 = vmul.f32 %v5363_v22, %v5376_v32  ;;  %v214_v57 = vmul.f32 %v5365_v0, %v5376_v32  ;;  %v1438_v26 = vmul.f32 %v5366_v53, %v5376_v32 }
 0x158   :  { %v5377_v6 = vmax.f32 %v3698_v9, %v3701_v27  ;;  %v1439_v43 = vmul.f32 %v5367_v31, %v5376_v32  ;;  %v889_v13 = vmax.f32 %v3866_v15, %v3868_v1  ;;  %v3901_v54 = vadd.f32 %v1724_v24, %v1658_v11 }
 0x159   :  { %v3903_v29 = vadd.f32 %v1725_v3, %v1659_v45  ;;  %v379_v17 = vmul.f32 %v3046_v51, %v5380_v10  ;;  %v629_v56 = vadd.f32 %v581_v7, %v419_v37  ;;  %v791_v27 = vmul.f32 %v3106_v25, %v5381_v4 }
 0x15a   :  { %1815 = vmax.xlane.f32.xlu1 %v5377_v6  ;;  %5378 = vst [vmem:[#allocation35_spill] sm:$0xff] %v3901_v54  ;;  %v792_v6 = vmul.f32 %v3108_v40, %v5381_v4  ;;  %v380_v32 = vmul.f32 %v3048_v50, %v5380_v10  ;;  %v1508_v1 = vmul.f32 %v3059_v8, %v5380_v10 }
 0x15b   :  { %5379 = vst [vmem:[#allocation46_spill] sm:$0xff] %v3903_v29  ;;  %v630_v11 = vadd.f32 %v582_v33, %v420_v23  ;;  %v1662_v24 = vadd.f32 %v1614_v36, %v1548_v5  ;;  %v1663_v45 = vadd.f32 %v1615_v39, %v1549_v42  ;;  %v1728_v3 = vmul.f32 %v3110_v14, %v5381_v4  ;;  %v3927_v33 = vpop.permute.xlu1 %151  ;;  %v5385_v42 = vld [vmem:[#allocation61_spill] sm:$0xff] }
 0x15c   :  { %v1729_v7 = vmul.f32 %v3122_v60, %v5381_v4  ;;  %v423_v37 = vadd.f32 %v3789_v59, %v213_v62  ;;  %v1826_v15 = vmax.f32 %v3901_v54, %v3903_v29  ;;  %v424_v9 = vadd.f32 %v3793_v52, %v214_v57  ;;  %v5384_v4 = vld [vmem:[#allocation9_spill] sm:$0xff]  ;;  %v5386_v52 = vld [vmem:[#allocation11_spill] sm:$0xff] }
 0x15d   :  { %v1552_v30 = vadd.f32 %v3797_v16, %v1438_v26  ;;  %v1553_v23 = vadd.f32 %v3801_v55, %v1439_v43  ;;  %v3929_v36 = vadd.f32 %v791_v27, %v629_v56  ;;  %v3931_v5 = vadd.f32 %v792_v6, %v630_v11  ;;  %v5387_v55 = vld [vmem:[#allocation67_spill] sm:$0xff] }
 0x15e   :  { %884 = vmax.xlane.f32.xlu1 %v883_v35  ;;  %v1509_v35 = vmul.f32 %v3061_v46, %v5380_v10  ;;  %v427_v59 = vadd.f32 %v379_v17, %v5384_v4  ;;  %v585_v39 = vmul.f32 %v3068_v18, %v5385_v42  ;;  %v586_v57 = vmul.f32 %v3070_v20, %v5385_v42  ;;  %v5391_v17 = vld [vmem:[#allocation6_spill] sm:$0xff] }
 0x15f   :  { %5382 = vst [vmem:[#allocation49_spill] sm:$0xff] %v3929_v36  ;;  %5383 = vst [vmem:[#allocation65_spill] sm:$0xff] %v3931_v5  ;;  %v428_v16 = vadd.f32 %v380_v32, %v5386_v52  ;;  %v1556_v62 = vadd.f32 %v1508_v1, %v5387_v55  ;;  %v1618_v26 = vmul.f32 %v3072_v41, %v5385_v42  ;;  %v5392_v32 = vld [vmem:[#allocation30_spill] sm:$0xff]  ;;  %v5393_v52 = vld [vmem:[#allocation68_spill] sm:$0xff] }
 0x160   :  { %v1619_v27 = vmul.f32 %v3104_v38, %v5385_v42  ;;  %v5388_v56 = vmax.f32 %v3756_v19, %v3758_v48  ;;  %v3947_v43 = vadd.f32 %v1728_v3, %v1662_v24  ;;  %v3949_v10 = vadd.f32 %v1729_v7, %v1663_v45  ;;  %v3967_v3 = vpop.permute.xlu1 %314 }
 0x161   :  { %v795_v6 = vmul.f32 %v3106_v25, %v5391_v17  ;;  %v796_v1 = vmul.f32 %v3108_v40, %v5391_v17  ;;  %v799_v11 = vmul.f32 %v3106_v25, %v5392_v32  ;;  %v800_v4 = vmul.f32 %v3108_v40, %v5392_v32 }
 0x162   :  { %1821 = vmax.xlane.f32.xlu1 %v5388_v56  ;;  %5389 = vst [vmem:[#allocation57_spill] sm:$0xff] %v3947_v43  ;;  %5390 = vst [vmem:[#allocation9_spill] sm:$0xff] %v3949_v10  ;;  %v637_v42 = vadd.f32 %v3675_v61, %v427_v59  ;;  %v1557_v55 = vadd.f32 %v1509_v35, %v5393_v52  ;;  %v1736_v24 = vmul.f32 %v3110_v14, %v5392_v32 }
 0x163   :  { %v3965_v45 = vmul.f32 %v3122_v60, %v5392_v32  ;;  %v633_v7 = vadd.f32 %v585_v39, %v423_v37  ;;  %v634_v56 = vadd.f32 %v586_v57, %v424_v9  ;;  %v638_v29 = vadd.f32 %v3679_v58, %v428_v16 }
 0x164   :  { %v1670_v54 = vadd.f32 %v3683_v63, %v1556_v62  ;;  %v895_v61 = vmax.f32 %v3929_v36, %v3931_v5  ;;  %v1832_v35 = vmax.f32 %v3947_v43, %v3949_v10  ;;  %v1666_v59 = vadd.f32 %v1618_v26, %v1552_v30  ;;  %v5431_v36 = vld [vmem:[#allocation73_spill] sm:$0xff] }
 0x165   :  { %v1667_v52 = vadd.f32 %v1619_v27, %v1553_v23  ;;  %v3975_v48 = vadd.f32 %v795_v6, %v633_v7  ;;  %v3977_v32 = vadd.f32 %v796_v1, %v634_v56  ;;  %v1732_v9 = vmul.f32 %v3110_v14, %v5391_v17  ;;  %v5399_v6 = vld [vmem:[#allocation69_spill] sm:$0xff] }
 0x166   :  { %890 = vmax.xlane.f32.xlu1 %v889_v13  ;;  %v1733_v58 = vmul.f32 %v3122_v60, %v5391_v17  ;;  %v389_v63 = vmul.f32 %v3046_v51, %v3750_v34  ;;  %v390_v13 = vmul.f32 %v3048_v50, %v3750_v34  ;;  %v3987_v37 = vadd.f32 %v799_v11, %v637_v42  ;;  %v4008_v17 = vpop.permute.xlu1 %726 }
 0x167   :  { %5394 = vst [vmem:[#allocation61_spill] sm:$0xff] %v3975_v48  ;;  %5395 = vst [vmem:[#allocation11_spill] sm:$0xff] %v3977_v32  ;;  %v3990_v30 = vadd.f32 %v3687_v21, %v1557_v55  ;;  %v227_v23 = vmul.f32 %v5363_v22, %v3723_v12  ;;  %v228_v39 = vmul.f32 %v5365_v0, %v3723_v12 }
 0x168   :  { %5396 = vst [vmem:[#allocation67_spill] sm:$0xff] %v3987_v37  ;;  %v3996_v57 = vadd.f32 %v800_v4, %v638_v29  ;;  %v3998_v16 = vadd.f32 %v1736_v24, %v1670_v54  ;;  %v1518_v62 = vmul.f32 %v3059_v8, %v3750_v34  ;;  %v1519_v26 = vmul.f32 %v3061_v46, %v3750_v34 }
 0x169   :  { %v599_v21 = vmul.f32 %v3068_v18, %v3897_v2  ;;  %v600_v27 = vmul.f32 %v3070_v20, %v3897_v2  ;;  %v221_v29 = vmul.f32 %v5363_v22, %v5399_v6  ;;  %v901_v54 = vmax.f32 %v3975_v48, %v3977_v32  ;;  %v5402_v48 = vld [vmem:[#allocation76_spill] sm:$0xff] }
 0x16a   :  { %5397 = vst [vmem:[#allocation6_spill] sm:$0xff] %v3996_v57  ;;  %5398 = vst [vmem:[#allocation30_spill] sm:$0xff] %v3998_v16  ;;  %1827 = vmax.xlane.f32.xlu1 %v1826_v15  ;;  %v4014_v1 = vadd.f32 %v1732_v9, %v1666_v59  ;;  %v4016_v11 = vadd.f32 %v1733_v58, %v1667_v52  ;;  %v1452_v34 = vmul.f32 %v5366_v53, %v3723_v12  ;;  %v4030_v59 = vpop.permute.xlu0 %734  ;;  %v731_v52 = vpop.permute.xlu1 %730 }
 0x16b   :  { %v1453_v4 = vmul.f32 %v5367_v31, %v3723_v12  ;;  %v437_v42 = vadd.f32 %v389_v63, %v227_v23  ;;  %v438_v15 = vadd.f32 %v390_v13, %v228_v39  ;;  %v222_v55 = vmul.f32 %v5365_v0, %v5399_v6 }
 0x16c   :  { %5400 = vst [vmem:[#allocation68_spill] sm:$0xff] %v4014_v1  ;;  %5401 = vst [vmem:[#allocation69_spill] sm:$0xff] %v4016_v11  ;;  %v1446_v24 = vmul.f32 %v5366_v53, %v5399_v6  ;;  %v1632_v7 = vmul.f32 %v3072_v41, %v3897_v2  ;;  %v1633_v56 = vmul.f32 %v3104_v38, %v3897_v2 }
 0x16d   :  { %v647_v9 = vadd.f32 %v599_v21, %v437_v42  ;;  %v648_v12 = vadd.f32 %v600_v27, %v438_v15  ;;  %v1566_v58 = vadd.f32 %v1518_v62, %v1452_v34  ;;  %v1567_v63 = vadd.f32 %v1519_v26, %v1453_v4 }
 0x16e   :  { %896 = vmax.xlane.f32.xlu1 %v895_v61  ;;  %v809_v13 = vmul.f32 %v3106_v25, %v731_v52  ;;  %v810_v23 = vmul.f32 %v3108_v40, %v731_v52  ;;  %v1746_v39 = vmul.f32 %v3110_v14, %v731_v52  ;;  %v1747_v32 = vmul.f32 %v3122_v60, %v731_v52 }
 0x16f   :  { %v383_v10 = vmul.f32 %v3046_v51, %v5402_v48  ;;  %v384_v2 = vmul.f32 %v3048_v50, %v5402_v48  ;;  %v1512_v61 = vmul.f32 %v3059_v8, %v5402_v48  ;;  %v1513_v62 = vmul.f32 %v3061_v46, %v5402_v48 }
 0x170   :  { %v4044_v26 = vadd.f32 %v809_v13, %v647_v9  ;;  %v4046_v21 = vadd.f32 %v810_v23, %v648_v12  ;;  %v1680_v27 = vadd.f32 %v1632_v7, %v1566_v58  ;;  %v1681_v34 = vadd.f32 %v1633_v56, %v1567_v63  ;;  %v4058_v9 = vpop.permute.xlu1 %528  ;;  %v4066_v12 = vpop.permute.xlu0 %746 }
 0x171   :  { %v1447_v4 = vmul.f32 %v5367_v31, %v5399_v6  ;;  %v593_v42 = vmul.f32 %v3068_v18, %v3639_v49  ;;  %v594_v15 = vmul.f32 %v3070_v20, %v3639_v49  ;;  %v1626_v52 = vmul.f32 %v3072_v41, %v3639_v49 }
 0x172   :  { %5403 = vst [vmem:[#allocation76_spill] sm:$0xff] %v4044_v26  ;;  %5404 = vst [vmem:[#allocation90_spill] sm:$0xff] %v4046_v21  ;;  %1833 = vmax.xlane.f32.xlu1 %v1832_v35  ;;  %v1627_v48 = vmul.f32 %v3104_v38, %v3639_v49  ;;  %v922_v7 = vmax.f32 %v4044_v26, %v4046_v21  ;;  %v4062_v56 = vadd.f32 %v1746_v39, %v1680_v27 }
 0x173   :  { %v4064_v6 = vadd.f32 %v1747_v32, %v1681_v34  ;;  %v431_v58 = vadd.f32 %v383_v10, %v221_v29  ;;  %v432_v63 = vadd.f32 %v384_v2, %v222_v55  ;;  %v1560_v13 = vadd.f32 %v1512_v61, %v1446_v24 }
 0x174   :  { %5405 = vst [vmem:[#allocation91_spill] sm:$0xff] %v4062_v56  ;;  %v1561_v23 = vadd.f32 %v1513_v62, %v1447_v4  ;;  %923 = vmax.xlane.f32.xlu0 %v922_v7  ;;  %v803_v35 = vmul.f32 %v3106_v25, %v3815_v47  ;;  %v804_v49 = vmul.f32 %v3108_v40, %v3815_v47  ;;  %v4094_v27 = vpop.permute.xlu1 %156 }
 0x175   :  { %5406 = vst [vmem:[#allocation92_spill] sm:$0xff] %v4064_v6  ;;  %v1740_v21 = vmul.f32 %v3110_v14, %v3815_v47  ;;  %v1741_v32 = vmul.f32 %v3122_v60, %v3815_v47  ;;  %v225_v39 = vmul.f32 %v5363_v22, %v3689_v44  ;;  %v4080_v10 = vadd.f32 %v3965_v45, %v3990_v30 }
 0x176   :  { %902 = vmax.xlane.f32.xlu1 %v901_v54  ;;  %v641_v29 = vadd.f32 %v593_v42, %v431_v58  ;;  %v642_v55 = vadd.f32 %v594_v15, %v432_v63  ;;  %v226_v24 = vmul.f32 %v5365_v0, %v3689_v44  ;;  %v1859_v2 = vmax.f32 %v4062_v56, %v4064_v6  ;;  %v5412_v58 = vld [vmem:[#allocation28_spill] sm:$0xff] }
 0x177   :  { %5407 = vst [vmem:[#allocation93_spill] sm:$0xff] %v4080_v10  ;;  %v1674_v61 = vadd.f32 %v1626_v52, %v1560_v13  ;;  %v1675_v62 = vadd.f32 %v1627_v48, %v1561_v23  ;;  %v1450_v47 = vmul.f32 %v5366_v53, %v3689_v44  ;;  %v1451_v54 = vmul.f32 %v5367_v31, %v3689_v44  ;;  %v4104_v52 = vpop.permute.xlu0 %750 }
 0x178   :  { %v1838_v45 = vmax.f32 %v4014_v1, %v4016_v11  ;;  %v907_v30 = vmax.f32 %v3987_v37, %v3996_v57  ;;  %1860 = vmax.xlane.f32.xlu0 %v1859_v2  ;;  %v4096_v34 = vadd.f32 %v803_v35, %v641_v29  ;;  %v4098_v4 = vadd.f32 %v804_v49, %v642_v55  ;;  %v5413_v35 = vld [vmem:[#allocation31_spill] sm:$0xff]  ;;  %v5414_v55 = vld [vmem:[#allocation89_spill] sm:$0xff]  ;;  %v5419_v57 = vld [vmem:[#allocation32_spill] sm:$0xff] }
 0x179   :  { %v4100_v42 = vadd.f32 %v1740_v21, %v1674_v61  ;;  %v4102_v15 = vadd.f32 %v1741_v32, %v1675_v62  ;;  %v597_v44 = vmul.f32 %v3068_v18, %v3864_v28  ;;  %v598_v48 = vmul.f32 %v3070_v20, %v3864_v28  ;;  %v5426_v11 = vld [vmem:[#allocation42_spill] sm:$0xff] }
 0x17a   :  { %5408 = vst [vmem:[#allocation94_spill] sm:$0xff] %v4096_v34  ;;  %5409 = vst [vmem:[#allocation95_spill] sm:$0xff] %v4098_v4  ;;  %1839 = vmax.xlane.f32.xlu1 %v1838_v45  ;;  %v1844_v7 = vmax.f32 %v3998_v16, %v4080_v10  ;;  %v435_v63 = vadd.f32 %v5412_v58, %v225_v39  ;;  %v1630_v21 = vmul.f32 %v3072_v41, %v3864_v28  ;;  %v5415_v39 = vld [vmem:[#allocation54_spill] sm:$0xff] }
 0x17b   :  { %5410 = vst [vmem:[#allocation96_spill] sm:$0xff] %v4100_v42  ;;  %5411 = vst [vmem:[#allocation97_spill] sm:$0xff] %v4102_v15  ;;  %v391_v13 = vmul.f32 %v3046_v51, %v3967_v3  ;;  %v392_v23 = vmul.f32 %v3048_v50, %v3967_v3  ;;  %v436_v49 = vadd.f32 %v5413_v35, %v226_v24  ;;  %v4138_v35 = vpop.permute.xlu1 %322  ;;  %v5418_v10 = vld [vmem:[#allocation34_spill] sm:$0xff] }
 0x17c   :  { %v1631_v32 = vmul.f32 %v3104_v38, %v3864_v28  ;;  %v231_v29 = vmul.f32 %v5363_v22, %v3927_v33  ;;  %v1564_v2 = vadd.f32 %v5414_v55, %v1450_v47  ;;  %v1565_v61 = vadd.f32 %v5415_v39, %v1451_v54  ;;  %v4140_v54 = vpop.xlane.xlu0 %872 }
 0x17d   :  { %v232_v62 = vmul.f32 %v5365_v0, %v3927_v33  ;;  %v1456_v45 = vmul.f32 %v5366_v53, %v3927_v33  ;;  %v913_v58 = vmax.f32 %v4096_v34, %v4098_v4  ;;  %v1850_v24 = vmax.f32 %v4100_v42, %v4102_v15  ;;  %v5416_v4 = vld [vmem:[#allocation13_spill] sm:$0xff]  ;;  %v5417_v15 = vld [vmem:[#allocation70_spill] sm:$0xff] }
 0x17e   :  { %v1457_v28 = vmul.f32 %v5367_v31, %v3927_v33  ;;  %v1520_v47 = vmul.f32 %v3059_v8, %v3967_v3  ;;  %908 = vmax.xlane.f32.xlu1 %v907_v30  ;;  %v645_v55 = vadd.f32 %v597_v44, %v435_v63  ;;  %v646_v39 = vadd.f32 %v598_v48, %v436_v49 }
 0x17f   :  { %v1521_v6 = vmul.f32 %v3061_v46, %v3967_v3  ;;  %v1678_v56 = vadd.f32 %v1630_v21, %v1564_v2  ;;  %v439_v34 = vadd.f32 %v391_v13, %v5416_v4  ;;  %v440_v42 = vadd.f32 %v392_v23, %v5417_v15  ;;  %v5420_v4 = vld [vmem:[#allocation39_spill] sm:$0xff]  ;;  %v327_v13 = vpop.permute.xlu1 %326  ;;  %v5421_v23 = vld [vmem:[#allocation37_spill] sm:$0xff]  ;;  %v5423_v2 = vld [vmem:[#allocation26_spill] sm:$0xff] }
 0x180   :  { %v807_v33 = vmul.f32 %v3106_v25, %v4008_v17  ;;  %v808_v26 = vmul.f32 %v3108_v40, %v4008_v17  ;;  %v441_v30 = vadd.f32 %v5418_v10, %v231_v29  ;;  %v1679_v16 = vadd.f32 %v1631_v32, %v1565_v61  ;;  %v1810_v10 = vpop.xlane.xlu0 %1809 }
 0x181   :  { %v442_v44 = vadd.f32 %v5419_v57, %v232_v62  ;;  %v1744_v48 = vmul.f32 %v3110_v14, %v4008_v17  ;;  %v1745_v3 = vmul.f32 %v3122_v60, %v4008_v17  ;;  %v1570_v63 = vadd.f32 %v5420_v4, %v1456_v45  ;;  %v5422_v57 = vld [vmem:[#allocation71_spill] sm:$0xff]  ;;  %v5425_v45 = vld [vmem:[#allocation72_spill] sm:$0xff] }
 0x182   :  { %v603_v15 = vmul.f32 %v3068_v18, %v4058_v9  ;;  %v604_v21 = vmul.f32 %v3070_v20, %v4058_v9  ;;  %1845 = vmax.xlane.f32.xlu1 %v1844_v7  ;;  %v1571_v49 = vadd.f32 %v5421_v23, %v1457_v28  ;;  %v1568_v32 = vadd.f32 %v1520_v47, %v5422_v57  ;;  %v5424_v17 = vld [vmem:[#allocation83_spill] sm:$0xff] }
 0x183   :  { %v397_v29 = vmul.f32 %v3046_v51, %v327_v13  ;;  %v649_v61 = vadd.f32 %v5423_v2, %v439_v34  ;;  %v650_v62 = vadd.f32 %v5424_v17, %v440_v42  ;;  %v1569_v4 = vadd.f32 %v1521_v6, %v5425_v45  ;;  %v5427_v42 = vld [vmem:[#allocation43_spill] sm:$0xff]  ;;  %v5429_v17 = vld [vmem:[#allocation45_spill] sm:$0xff]  ;;  %v739_v5 = vpop.permute.xlu1 %738 }
 0x184   :  { %v398_v37 = vmul.f32 %v3048_v50, %v327_v13  ;;  %v1880_v1 = vsub.f32 %v5426_v11, %v1810_v10  ;;  %v4169_v43 = vadd.f32 %v807_v33, %v645_v55  ;;  %v4171_v7 = vadd.f32 %v808_v26, %v646_v39  ;;  %v1813_v11 = vpop.xlane.xlu0 %1812  ;;  %v5428_v39 = vld [vmem:[#allocation44_spill] sm:$0xff] }
 0x185   :  { %v1636_v28 = vmul.f32 %v3072_v41, %v4058_v9  ;;  %v1637_v47 = vmul.f32 %v3104_v38, %v4058_v9  ;;  %v4177_v23 = vadd.f32 %v1744_v48, %v1678_v56  ;;  %v4179_v34 = vadd.f32 %v1745_v3, %v1679_v16  ;;  %v5430_v9 = vld [vmem:[#allocation14_spill] sm:$0xff] }
 0x186   :  { %v1526_v6 = vmul.f32 %v3059_v8, %v327_v13  ;;  %v1881_v57 = vsub.f32 %v5427_v42, %v1810_v10  ;;  %914 = vmax.xlane.f32.xlu1 %v913_v58  ;;  %v651_v55 = vadd.f32 %v603_v15, %v441_v30  ;;  %v652_v33 = vadd.f32 %v604_v21, %v442_v44 }
 0x187   :  { %v1527_v26 = vmul.f32 %v3061_v46, %v327_v13  ;;  %v1882_v2 = vsub.f32 %v5428_v39, %v1813_v11  ;;  %v1883_v45 = vsub.f32 %v5429_v17, %v1813_v11  ;;  %v445_v56 = vadd.f32 %v397_v29, %v5430_v9  ;;  %v5432_v39 = vld [vmem:[#allocation74_spill] sm:$0xff] }
 0x188   :  { %v1928_v48 = vmul.f32 1.442695, %v1880_v1  ;;  %v813_v16 = vmul.f32 %v3106_v25, %v739_v5  ;;  %v814_v3 = vmul.f32 %v3108_v40, %v739_v5  ;;  %v446_v10 = vadd.f32 %v398_v37, %v5431_v36  ;;  %v4199_v37 = vpop.permute.xlu1 %532 }
 0x189   :  { %v1932_v58 = vmul.f32 1.442695, %v1882_v2  ;;  %v1934_v42 = vmul.f32 1.442695, %v1883_v45  ;;  %v1750_v30 = vmul.f32 %v3110_v14, %v739_v5  ;;  %v1751_v44 = vmul.f32 %v3122_v60, %v739_v5  ;;  %v5434_v2 = vld [vmem:[#allocation75_spill] sm:$0xff] }
 0x18a   :  { %v1930_v15 = vmul.f32 1.442695, %v1881_v57  ;;  %1851 = vmax.xlane.f32.xlu1 %v1850_v24  ;;  %v919_v21 = vmax.f32 %v4169_v43, %v4171_v7  ;;  %v4194_v13 = vadd.f32 %v813_v16, %v651_v55  ;;  %v4196_v1 = vadd.f32 %v814_v3, %v652_v33  ;;  %v5433_v57 = vld [vmem:[#allocation86_spill] sm:$0xff]  ;;  %v5436_v45 = vld [vmem:[#allocation87_spill] sm:$0xff]  ;;  %v5439_v16 = vld [vmem:[#allocation85_spill] sm:$0xff] }
 0x18b   :  { %2402 = vpow2.f32 %v1932_v58  ;;  %v1684_v29 = vadd.f32 %v1636_v28, %v1570_v63  ;;  %v1685_v11 = vadd.f32 %v1637_v47, %v1571_v49  ;;  %v1574_v36 = vadd.f32 %v1526_v6, %v5432_v39  ;;  %v5437_v6 = vld [vmem:[#allocation24_spill] sm:$0xff] }
 0x18c   :  { %2404 = vpow2.f32 %v1934_v42  ;;  %v928_v5 = vmax.f32 %v4194_v13, %v4196_v1  ;;  %v655_v24 = vadd.f32 %v5433_v57, %v445_v56  ;;  %v1575_v17 = vadd.f32 %v1527_v26, %v5434_v2  ;;  %v5438_v56 = vld [vmem:[#allocation84_spill] sm:$0xff] }
 0x18d   :  { %2406 = vpow2.f32 %v1928_v48  ;;  %v4205_v55 = vadd.f32 %v1750_v30, %v1684_v29  ;;  %v4207_v33 = vadd.f32 %v1751_v44, %v1685_v11  ;;  %v656_v63 = vadd.f32 %v5436_v45, %v446_v10  ;;  %v4230_v44 = vpop.permute.xlu1 %166  ;;  %v5442_v29 = vld [vmem:[#allocation88_spill] sm:$0xff] }
 0x18e   :  { %2408 = vpow2.f32 %v1930_v15  ;;  %920 = vmax.xlane.f32.xlu1 %v919_v21  ;;  %929 = vmax.xlane.f32.xlu0 %v928_v5  ;;  %v811_v49 = vmul.f32 %v3106_v25, %v4030_v59  ;;  %v812_v28 = vmul.f32 %v3108_v40, %v4030_v59  ;;  %v817_v47 = vmul.f32 %v3106_v25, %v4066_v12 }
 0x18f   :  { %5435 = vst [vmem:[#allocation28_spill] sm:$0xff] %v4207_v33  ;;  %v1641_v26 = vmul.f32 %v3104_v38, %v5437_v6  ;;  %v818_v9 = vmul.f32 %v3108_v40, %v4066_v12  ;;  %v1682_v48 = vadd.f32 %v5438_v56, %v1568_v32  ;;  %v1683_v3 = vadd.f32 %v5439_v16, %v1569_v4 }
 0x190   :  { %v1856_v10 = vmax.f32 %v4177_v23, %v4179_v34  ;;  %v4224_v58 = vadd.f32 %v811_v49, %v649_v61  ;;  %v4226_v42 = vadd.f32 %v812_v28, %v650_v62  ;;  %v4228_v30 = vadd.f32 %v817_v47, %v655_v24  ;;  %v5447_v49 = vld [vmem:[#allocation40_spill] sm:$0xff] }
 0x191   :  { %v1865_v15 = vmax.f32 %v4205_v55, %v4207_v33  ;;  %v4234_v21 = vadd.f32 %v818_v9, %v656_v63  ;;  %v1688_v32 = vadd.f32 %v5442_v29, %v1574_v36  ;;  %v1689_v11 = vadd.f32 %v1641_v26, %v1575_v17  ;;  %v4253_v2 = vpop.permute.xlu1 %171 }
 0x192   :  { %5440 = vst [vmem:[#allocation31_spill] sm:$0xff] %v4228_v30  ;;  %1857 = vmax.xlane.f32.xlu1 %v1856_v10  ;;  %v1748_v4 = vmul.f32 %v3110_v14, %v4030_v59  ;;  %v1749_v61 = vmul.f32 %v3122_v60, %v4030_v59  ;;  %v1754_v62 = vmul.f32 %v3110_v14, %v4066_v12 }
 0x193   :  { %5441 = vst [vmem:[#allocation89_spill] sm:$0xff] %v4234_v21  ;;  %1866 = vmax.xlane.f32.xlu0 %v1865_v15  ;;  %v1755_v39 = vmul.f32 %v3122_v60, %v4066_v12  ;;  %v925_v5 = vmax.f32 %v4224_v58, %v4226_v42  ;;  %v934_v59 = vmax.f32 %v4228_v30, %v4234_v21 }
 0x194   :  { %v4247_v57 = vadd.f32 %v1748_v4, %v1682_v48  ;;  %v4249_v36 = vadd.f32 %v1749_v61, %v1683_v3  ;;  %v4257_v17 = vadd.f32 %v1754_v62, %v1688_v32  ;;  %v943_v28 = vsub.f32 %v5447_v49, %v4140_v54 }
 0x195   :  { %v4251_v24 = vpop.eup %2402  ;;  %v4259_v45 = vadd.f32 %v1755_v39, %v1689_v11  ;;  %v395_v6 = vmul.f32 %v3046_v51, %v4138_v35  ;;  %v396_v9 = vmul.f32 %v3048_v50, %v4138_v35  ;;  %v233_v3 = vmul.f32 %v5363_v22, %v4094_v27  ;;  %v4289_v32 = vpop.permute.xlu1 %334  ;;  %v5448_v11 = vld [vmem:[#allocation41_spill] sm:$0xff] }
 0x196   :  { %5443 = vst [vmem:[#allocation54_spill] sm:$0xff] %v4247_v57  ;;  %5444 = vst [vmem:[#allocation13_spill] sm:$0xff] %v4249_v36  ;;  %v4261_v63 = vpop.eup %2404  ;;  %926 = vmax.xlane.f32.xlu1 %v925_v5  ;;  %v1862_v26 = vmax.f32 %v4247_v57, %v4249_v36  ;;  %v234_v10 = vmul.f32 %v5365_v0, %v4094_v27  ;;  %v1524_v15 = vmul.f32 %v3059_v8, %v4138_v35  ;;  %v5449_v5 = vld [vmem:[#allocation38_spill] sm:$0xff] }
 0x197   :  { %5445 = vst [vmem:[#allocation70_spill] sm:$0xff] %v4257_v17  ;;  %5446 = vst [vmem:[#allocation34_spill] sm:$0xff] %v4259_v45  ;;  %v4263_v12 = vpop.eup %2406  ;;  %935 = vmax.xlane.f32.xlu0 %v934_v59  ;;  %v1871_v56 = vmax.f32 %v4257_v17, %v4259_v45  ;;  %v1525_v29 = vmul.f32 %v3061_v46, %v4138_v35  ;;  %v944_v4 = vsub.f32 %v5448_v11, %v4140_v54 }
 0x198   :  { %v4267_v47 = vpop.eup %2408  ;;  %v991_v61 = vmul.f32 1.442695, %v943_v28  ;;  %v605_v62 = vmul.f32 %v3068_v18, %v4199_v37  ;;  %v606_v39 = vmul.f32 %v3070_v20, %v4199_v37  ;;  %v399_v59 = vmul.f32 %v3046_v51, %v5449_v5 }
 0x199   :  { %v400_v35 = vmul.f32 %v3048_v50, %v5449_v5  ;;  %v1458_v49 = vmul.f32 %v5366_v53, %v4094_v27  ;;  %v1459_v54 = vmul.f32 %v5367_v31, %v4094_v27  ;;  %v1528_v28 = vmul.f32 %v3059_v8, %v5449_v5  ;;  %v743_v30 = vpop.permute.xlu1 %742 }
 0x19a   :  { %1863 = vmax.xlane.f32.xlu1 %v1862_v26  ;;  %v1638_v26 = vmul.f32 %v3072_v41, %v4199_v37  ;;  %v443_v11 = vadd.f32 %v395_v6, %v233_v3  ;;  %v1529_v16 = vmul.f32 %v3061_v46, %v5449_v5  ;;  %v1639_v48 = vmul.f32 %v3104_v38, %v4199_v37 }
 0x19b   :  { %1872 = vmax.xlane.f32.xlu0 %v1871_v56  ;;  %v444_v56 = vadd.f32 %v396_v9, %v234_v10  ;;  %v1572_v45 = vadd.f32 %v1524_v15, %v1458_v49  ;;  %v1573_v17 = vadd.f32 %v1525_v29, %v1459_v54  ;;  %2410 = vpow2.f32 %v991_v61 }
 0x19c   :  { %v993_v21 = vmul.f32 1.442695, %v944_v4  ;;  %v653_v27 = vadd.f32 %v605_v62, %v443_v11  ;;  %v237_v57 = vmul.f32 %v5363_v22, %v4230_v44  ;;  %v815_v33 = vmul.f32 %v3106_v25, %v743_v30 }
 0x19d   :  { %v654_v36 = vadd.f32 %v606_v39, %v444_v56  ;;  %v816_v6 = vmul.f32 %v3108_v40, %v743_v30  ;;  %v1752_v9 = vmul.f32 %v3110_v14, %v743_v30  ;;  %v238_v3 = vmul.f32 %v5365_v0, %v4230_v44 }
 0x19e   :  { %v1462_v37 = vmul.f32 %v5366_v53, %v4230_v44  ;;  %v1686_v10 = vadd.f32 %v1638_v26, %v1572_v45  ;;  %v1753_v15 = vmul.f32 %v3122_v60, %v743_v30  ;;  %v1463_v29 = vmul.f32 %v5367_v31, %v4230_v44  ;;  %v541_v49 = vpop.permute.xlu1 %540 }
 0x19f   :  { %v4325_v4 = vadd.f32 %v815_v33, %v653_v27  ;;  %v4327_v61 = vadd.f32 %v816_v6, %v654_v36  ;;  %v1687_v62 = vadd.f32 %v1639_v48, %v1573_v17  ;;  %2412 = vpow2.f32 %v993_v21 }
 0x1a0   :  { %v819_v39 = vmul.f32 %v3106_v25, %v4104_v52  ;;  %v820_v5 = vmul.f32 %v3108_v40, %v4104_v52  ;;  %v1756_v45 = vmul.f32 %v3110_v14, %v4104_v52  ;;  %v4337_v44 = vadd.f32 %v1752_v9, %v1686_v10 }
 0x1a1   :  { %v931_v30 = vmax.f32 %v4325_v4, %v4327_v61  ;;  %v4339_v33 = vadd.f32 %v1753_v15, %v1687_v62  ;;  %v447_v36 = vadd.f32 %v399_v59, %v237_v57  ;;  %v609_v21 = vmul.f32 %v3068_v18, %v541_v49 }
 0x1a2   :  { %v610_v17 = vmul.f32 %v3070_v20, %v541_v49  ;;  %v448_v48 = vadd.f32 %v400_v35, %v238_v3  ;;  %v1576_v54 = vadd.f32 %v1528_v28, %v1462_v37  ;;  %v239_v26 = vmul.f32 %v5363_v22, %v4253_v2  ;;  %v545_v28 = vpop.permute.xlu1 %544 }
 0x1a3   :  { %v1642_v11 = vmul.f32 %v3072_v41, %v541_v49  ;;  %v1643_v56 = vmul.f32 %v3104_v38, %v541_v49  ;;  %932 = vmax.xlane.f32.xlu1 %v931_v30  ;;  %v1577_v27 = vadd.f32 %v1529_v16, %v1463_v29  ;;  %v240_v6 = vmul.f32 %v5365_v0, %v4253_v2 }
 0x1a4   :  { %v401_v57 = vmul.f32 %v3046_v51, %v4289_v32  ;;  %v402_v59 = vmul.f32 %v3048_v50, %v4289_v32  ;;  %v657_v35 = vadd.f32 %v609_v21, %v447_v36  ;;  %v1868_v22 = vmax.f32 %v4337_v44, %v4339_v33 }
 0x1a5   :  { %v658_v9 = vadd.f32 %v610_v17, %v448_v48  ;;  %v1690_v3 = vadd.f32 %v1642_v11, %v1576_v54  ;;  %v1691_v37 = vadd.f32 %v1643_v56, %v1577_v27  ;;  %v4355_v10 = vpop.eup %2410  ;;  %v1530_v16 = vmul.f32 %v3059_v8, %v4289_v32 }
 0x1a6   :  { %v1531_v0 = vmul.f32 %v3061_v46, %v4289_v32  ;;  %v611_v51 = vmul.f32 %v3068_v18, %v545_v28  ;;  %v612_v50 = vmul.f32 %v3070_v20, %v545_v28  ;;  %v1464_v15 = vmul.f32 %v5366_v53, %v4253_v2 }
 0x1a7   :  { %1869 = vmax.xlane.f32.xlu1 %v1868_v22  ;;  %v4365_v29 = vadd.f32 %v819_v39, %v657_v35  ;;  %v4367_v62 = vadd.f32 %v820_v5, %v658_v9  ;;  %v1757_v49 = vmul.f32 %v3122_v60, %v4104_v52  ;;  %v1465_v8 = vmul.f32 %v5367_v31, %v4253_v2  ;;  %v755_v36 = vpop.permute.xlu1 %754  ;;  %v5450_v22 = vld [vmem:[#allocation47_spill] sm:$0xff] }
 0x1a8   :  { %v1644_v46 = vmul.f32 %v3072_v41, %v545_v28  ;;  %v449_v32 = vadd.f32 %v401_v57, %v239_v26  ;;  %v450_v18 = vadd.f32 %v402_v59, %v240_v6  ;;  %v1645_v20 = vmul.f32 %v3104_v38, %v545_v28  ;;  %v882_v57 = vpop.xlane.xlu0 %881 }
 0x1a9   :  { %v937_v53 = vmax.f32 %v4365_v29, %v4367_v62  ;;  %v4377_v30 = vadd.f32 %v1756_v45, %v1690_v3  ;;  %v4379_v39 = vadd.f32 %v1757_v49, %v1691_v37  ;;  %v4381_v5 = vpop.eup %2412  ;;  %v1578_v17 = vadd.f32 %v1530_v16, %v1464_v15  ;;  %v5451_v3 = vld [vmem:[#allocation48_spill] sm:$0xff]  ;;  %v5452_v16 = vld [vmem:[#allocation50_spill] sm:$0xff] }
 0x1aa   :  { %v659_v52 = vadd.f32 %v611_v51, %v449_v32  ;;  %v660_v21 = vadd.f32 %v612_v50, %v450_v18  ;;  %v1579_v31 = vadd.f32 %v1531_v0, %v1465_v8  ;;  %v821_v41 = vmul.f32 %v3106_v25, %v755_v36  ;;  %v5453_v51 = vld [vmem:[#allocation51_spill] sm:$0xff] }
 0x1ab   :  { %938 = vmax.xlane.f32.xlu1 %v937_v53  ;;  %v822_v2 = vmul.f32 %v3108_v40, %v755_v36  ;;  %v1758_v38 = vmul.f32 %v3110_v14, %v755_v36  ;;  %v1759_v48 = vmul.f32 %v3122_v60, %v755_v36  ;;  %v1692_v45 = vadd.f32 %v1644_v46, %v1578_v17  ;;  %v5454_v46 = vld [vmem:[#allocation52_spill] sm:$0xff]  ;;  %v5455_v53 = vld [vmem:[#allocation53_spill] sm:$0xff] }
 0x1ac   :  { %v1874_v54 = vmax.f32 %v4377_v30, %v4379_v39  ;;  %v4389_v26 = vadd.f32 %v821_v41, %v659_v52  ;;  %v1693_v56 = vadd.f32 %v1645_v20, %v1579_v31  ;;  %v1087_v14 = vadd.f32 %v4381_v5, %v4355_v10  ;;  %v1819_v59 = vpop.xlane.xlu0 %1818 }
 0x1ad   :  { %v4391_v11 = vadd.f32 %v822_v2, %v660_v21  ;;  %v4395_v25 = vadd.f32 %v1758_v38, %v1692_v45  ;;  %v2024_v6 = vadd.f32 %v4267_v47, %v4263_v12  ;;  %v949_v9 = vsub.f32 %v5450_v22, %v882_v57  ;;  %v5456_v21 = vld [vmem:[#allocation55_spill] sm:$0xff]  ;;  %v5457_v2 = vld [vmem:[#allocation12_spill] sm:$0xff] }
 0x1ae   :  { %v4397_v40 = vadd.f32 %v1759_v48, %v1693_v56  ;;  %v950_v37 = vsub.f32 %v5451_v3, %v882_v57  ;;  %v1886_v0 = vsub.f32 %v5452_v16, %v1819_v59  ;;  %v1887_v50 = vsub.f32 %v5453_v51, %v1819_v59  ;;  %v5458_v48 = vld [vmem:[#allocation15_spill] sm:$0xff]  ;;  %v5459_v56 = vld [vmem:[#allocation56_spill] sm:$0xff]  ;;  %v5460_v57 = vld [vmem:[#allocation58_spill] sm:$0xff] }
 0x1af   :  { %1875 = vmax.xlane.f32.xlu1 %v1874_v54  ;;  %v940_v27 = vmax.f32 %v4389_v26, %v4391_v11  ;;  %v1003_v15 = vmul.f32 1.442695, %v949_v9  ;;  %v5461_v22 = vld [vmem:[#allocation20_spill] sm:$0xff]  ;;  %v5462_v3 = vld [vmem:[#allocation78_spill] sm:$0xff] }
 0x1b0   :  { %v1877_v60 = vmax.f32 %v4395_v25, %v4397_v40  ;;  %v888_v35 = vpop.xlane.xlu0 %887  ;;  %v1005_v8 = vmul.f32 1.442695, %v950_v37  ;;  %v1940_v18 = vmul.f32 1.442695, %v1886_v0  ;;  %v1942_v20 = vmul.f32 1.442695, %v1887_v50 }
 0x1b1   :  { %941 = vmax.xlane.f32.xlu0 %v940_v27  ;;  %v953_v32 = vsub.f32 %v5454_v46, %v888_v35  ;;  %2414 = vpow2.f32 %v1003_v15  ;;  %v954_v36 = vsub.f32 %v5455_v53, %v888_v35  ;;  %v5465_v53 = vld [vmem:[#allocation80_spill] sm:$0xff] }
 0x1b2   :  { %2416 = vpow2.f32 %v1005_v8 }
 0x1b3   :  { %1088 = vadd.xlane.f32.xlu1 %v1087_v14  ;;  %v1011_v52 = vmul.f32 1.442695, %v953_v32  ;;  %2418 = vpow2.f32 %v1940_v18  ;;  %v1013_v54 = vmul.f32 1.442695, %v954_v36  ;;  %v5464_v18 = vld [vmem:[#allocation79_spill] sm:$0xff] }
 0x1b4   :  { %v1825_v28 = vpop.xlane.xlu0 %1824  ;;  %2420 = vpow2.f32 %v1942_v20 }
 0x1b5   :  { %1878 = vmax.xlane.f32.xlu0 %v1877_v60  ;;  %v1890_v17 = vsub.f32 %v5456_v21, %v1825_v28  ;;  %v1891_v27 = vsub.f32 %v5459_v56, %v1825_v28  ;;  %2422 = vpow2.f32 %v1011_v52  ;;  %v5463_v28 = vld [vmem:[#allocation59_spill] sm:$0xff] }
 0x1b7   :  { %2025 = vadd.xlane.f32.xlu1 %v2024_v6  ;;  %v1948_v6 = vmul.f32 1.442695, %v1890_v17  ;;  %v1950_v16 = vmul.f32 1.442695, %v1891_v27  ;;  %v5467_v17 = vld [vmem:[#allocation18_spill] sm:$0xff] }
 0x1b8   :  { %v894_v49 = vpop.xlane.xlu0 %893 }
 0x1b9   :  { %v957_v59 = vsub.f32 %v5460_v57, %v894_v49  ;;  %v958_v15 = vsub.f32 %v5463_v28, %v894_v49 }
 0x1bb   :  { %v1019_v8 = vmul.f32 1.442695, %v957_v59  ;;  %v4419_v32 = vpop.eup %2414 }
 0x1bc   :  { %v1831_v41 = vpop.xlane.xlu0 %1830  ;;  %v4423_v52 = vpop.eup %2416 }
 0x1bd   :  { %v4425_v21 = vpop.eup %2418 }
 0x1be   :  { %5466 = vst [vmem:[#allocation32_spill] sm:$0xff] %v4425_v21  ;;  %v4428_v49 = vpop.eup %2420 }
 0x1bf   :  { %5468 = vst [vmem:[#allocation39_spill] sm:$0xff] %v4428_v49  ;;  %v4435_v59 = vpop.eup %2422 }
 0x1c0   :  { %v900_v0 = vpop.xlane.xlu0 %899  ;;  %5472 = vst [vmem:[#allocation37_spill] sm:$0xff] %v4435_v59 }
 0x1c4   :  { %v4431_v27 = vpop.xlane.xlu0 %1836 }
 0x1dd   :  { %v876_v31 = vpop.xlane.xlu1 %875 }
 0x1de   :  { %v945_v38 = vsub.f32 %v5457_v2, %v876_v31  ;;  %v946_v45 = vsub.f32 %v5458_v48, %v876_v31  ;;  %v1894_v31 = vsub.f32 %v5467_v17, %v1831_v41  ;;  %v1021_v48 = vmul.f32 1.442695, %v958_v15 }
 0x1e0   :  { %v995_v14 = vmul.f32 1.442695, %v945_v38  ;;  %v997_v60 = vmul.f32 1.442695, %v946_v45  ;;  %v5469_v45 = vld [vmem:[#allocation60_spill] sm:$0xff] }
 0x1e1   :  { %v879_v35 = vpop.xlane.xlu1 %878 }
 0x1e2   :  { %2424 = vpow2.f32 %v995_v14  ;;  %v947_v9 = vsub.f32 %v5461_v22, %v879_v35  ;;  %v948_v37 = vsub.f32 %v5462_v3, %v879_v35  ;;  %v5470_v14 = vld [vmem:[#allocation27_spill] sm:$0xff]  ;;  %v1956_v22 = vmul.f32 1.442695, %v1894_v31 }
 0x1e3   :  { %2426 = vpow2.f32 %v997_v60 }
 0x1e4   :  { %2428 = vpow2.f32 %v1013_v54  ;;  %v999_v51 = vmul.f32 1.442695, %v947_v9  ;;  %v1001_v50 = vmul.f32 1.442695, %v948_v37  ;;  %v1895_v54 = vsub.f32 %v5469_v45, %v1831_v41  ;;  %v5473_v9 = vld [vmem:[#allocation62_spill] sm:$0xff] }
 0x1e5   :  { %2430 = vpow2.f32 %v1948_v6  ;;  %v5471_v6 = vld [vmem:[#allocation23_spill] sm:$0xff]  ;;  %v961_v3 = vsub.f32 %v5473_v9, %v900_v0 }
 0x1e6   :  { %2432 = vpow2.f32 %v999_v51  ;;  %v1958_v41 = vmul.f32 1.442695, %v1895_v54 }
 0x1e7   :  { %v1816_v46 = vpop.xlane.xlu1 %1815  ;;  %2434 = vpow2.f32 %v1001_v50  ;;  %v5474_v50 = vld [vmem:[#allocation63_spill] sm:$0xff] }
 0x1e8   :  { %v1884_v20 = vsub.f32 %v5464_v18, %v1816_v46  ;;  %v1885_v36 = vsub.f32 %v5465_v53, %v1816_v46  ;;  %2436 = vpow2.f32 %v1950_v16  ;;  %v962_v28 = vsub.f32 %v5474_v50, %v900_v0  ;;  %v4445_v46 = vpop.xlane.xlu0 %905 }
 0x1e9   :  { %2438 = vpow2.f32 %v1019_v8  ;;  %v1027_v0 = vmul.f32 1.442695, %v961_v3 }
 0x1ea   :  { %v1936_v2 = vmul.f32 1.442695, %v1884_v20  ;;  %v1938_v38 = vmul.f32 1.442695, %v1885_v36  ;;  %v5476_v20 = vld [vmem:[#allocation82_spill] sm:$0xff] }
 0x1eb   :  { %v885_v56 = vpop.xlane.xlu1 %884  ;;  %v1029_v45 = vmul.f32 1.442695, %v962_v28 }
 0x1ec   :  { %2440 = vpow2.f32 %v1936_v2  ;;  %v951_v60 = vsub.f32 %v5470_v14, %v885_v56  ;;  %v952_v57 = vsub.f32 %v5471_v6, %v885_v56  ;;  %v4437_v35 = vpop.eup %2424  ;;  %v2027_v14 = vadd.f32 %v4261_v63, %v4251_v24  ;;  %v5479_v6 = vld [vmem:[#allocation33_spill] sm:$0xff]  ;;  %v4473_v28 = vpop.xlane.xlu0 %1842 }
 0x1ed   :  { %2442 = vpow2.f32 %v1938_v38  ;;  %v4440_v51 = vpop.eup %2426 }
 0x1ee   :  { %v1007_v37 = vmul.f32 1.442695, %v951_v60  ;;  %v1009_v16 = vmul.f32 1.442695, %v952_v57  ;;  %2444 = vpow2.f32 %v1021_v48  ;;  %v4443_v8 = vpop.eup %2428  ;;  %v1090_v36 = vadd.f32 %v4440_v51, %v4437_v35 }
 0x1ef   :  { %v1822_v15 = vpop.xlane.xlu1 %1821  ;;  %5475 = vst [vmem:[#allocation71_spill] sm:$0xff] %v4443_v8  ;;  %v4451_v17 = vpop.eup %2430 }
 0x1f0   :  { %2446 = vpow2.f32 %v1007_v37  ;;  %v1888_v18 = vsub.f32 %v3756_v19, %v1822_v15  ;;  %v1889_v53 = vsub.f32 %v5476_v20, %v1822_v15  ;;  %5477 = vst [vmem:[#allocation26_spill] sm:$0xff] %v4451_v17  ;;  %v4453_v31 = vpop.eup %2432  ;;  %1091 = vadd.xlane.f32.xlu0 %v1090_v36  ;;  %v5478_v19 = vld [vmem:[#allocation5_spill] sm:$0xff]  ;;  %v5485_v36 = vld [vmem:[#allocation7_spill] sm:$0xff] }
 0x1f1   :  { %2448 = vpow2.f32 %v1009_v16  ;;  %v4455_v48 = vpop.eup %2434  ;;  %v1898_v54 = vsub.f32 %v5478_v19, %v4431_v27  ;;  %v5486_v19 = vld [vmem:[#allocation35_spill] sm:$0xff] }
 0x1f2   :  { %2450 = vpow2.f32 %v1956_v22  ;;  %v1944_v2 = vmul.f32 1.442695, %v1888_v18  ;;  %v1946_v38 = vmul.f32 1.442695, %v1889_v53  ;;  %v4461_v60 = vpop.eup %2436  ;;  %v5480_v22 = vld [vmem:[#allocation36_spill] sm:$0xff]  ;;  %v1093_v3 = vadd.f32 %v4455_v48, %v4453_v31 }
 0x1f3   :  { %2452 = vpow2.f32 %v1958_v41  ;;  %v891_v56 = vpop.xlane.xlu1 %890  ;;  %v4467_v37 = vpop.eup %2438  ;;  %v5483_v41 = vld [vmem:[#allocation64_spill] sm:$0xff]  ;;  %v1964_v53 = vmul.f32 1.442695, %v1898_v54 }
 0x1f4   :  { %2454 = vpow2.f32 %v1944_v2  ;;  %v955_v57 = vsub.f32 %v5479_v6, %v891_v56  ;;  %v956_v9 = vsub.f32 %v5480_v22, %v891_v56  ;;  %5481 = vst [vmem:[#allocation83_spill] sm:$0xff] %v4467_v37  ;;  %v1899_v50 = vsub.f32 %v5483_v41, %v4431_v27  ;;  %1094 = vadd.xlane.f32.xlu1 %v1093_v3  ;;  %v5487_v56 = vld [vmem:[#allocation46_spill] sm:$0xff]  ;;  %v5490_v22 = vld [vmem:[#allocation8_spill] sm:$0xff]  ;;  %v4491_v3 = vpop.xlane.xlu0 %911 }
 0x1f5   :  { %2456 = vpow2.f32 %v1946_v38  ;;  %2028 = vadd.xlane.f32.xlu0 %v2027_v14  ;;  %v965_v2 = vsub.f32 %v5485_v36, %v4445_v46 }
 0x1f6   :  { %v4469_v16 = vpop.eup %2440  ;;  %2458 = vpow2.f32 %v1027_v0  ;;  %v1015_v15 = vmul.f32 1.442695, %v955_v57  ;;  %v1017_v18 = vmul.f32 1.442695, %v956_v9  ;;  %v1096_v0 = vadd.f32 %v4423_v52, %v4419_v32 }
 0x1f7   :  { %5482 = vst [vmem:[#allocation72_spill] sm:$0xff] %v4469_v16  ;;  %v4475_v20 = vpop.eup %2442  ;;  %2460 = vpow2.f32 %v1029_v45  ;;  %v1828_v38 = vpop.xlane.xlu1 %1827  ;;  %v1966_v54 = vmul.f32 1.442695, %v1899_v50  ;;  %v966_v9 = vsub.f32 %v5490_v22, %v4445_v46  ;;  %v2033_v50 = vadd.f32 %v4428_v49, %v4425_v21  ;;  %v5494_v46 = vld [vmem:[#allocation49_spill] sm:$0xff] }
 0x1f8   :  { %5484 = vst [vmem:[#allocation42_spill] sm:$0xff] %v4475_v20  ;;  %2462 = vpow2.f32 %v1015_v15  ;;  %v1892_v27 = vsub.f32 %v5486_v19, %v1828_v38  ;;  %v1893_v6 = vsub.f32 %v5487_v56, %v1828_v38  ;;  %v2030_v57 = vadd.f32 %v4475_v20, %v4469_v16  ;;  %v4485_v14 = vpop.eup %2444  ;;  %v5492_v19 = vld [vmem:[#allocation10_spill] sm:$0xff] }
 0x1f9   :  { %5488 = vst [vmem:[#allocation43_spill] sm:$0xff] %v4485_v14  ;;  %2464 = vpow2.f32 %v1017_v18  ;;  %1097 = vadd.xlane.f32.xlu0 %v1096_v0  ;;  %v1035_v38 = vmul.f32 1.442695, %v965_v2  ;;  %v1902_v56 = vsub.f32 %v5492_v19, %v4473_v28  ;;  %v1037_v2 = vmul.f32 1.442695, %v966_v9 }
 0x1fa   :  { %v4487_v45 = vpop.eup %2446  ;;  %v1952_v41 = vmul.f32 1.442695, %v1892_v27  ;;  %v1954_v15 = vmul.f32 1.442695, %v1893_v6  ;;  %2031 = vadd.xlane.f32.xlu1 %v2030_v57  ;;  %2466 = vpow2.f32 %v1964_v53  ;;  %v5495_v27 = vld [vmem:[#allocation65_spill] sm:$0xff] }
 0x1fb   :  { %5489 = vst [vmem:[#allocation44_spill] sm:$0xff] %v4487_v45  ;;  %v4493_v36 = vpop.eup %2448  ;;  %v897_v18 = vpop.xlane.xlu1 %896 }
 0x1fc   :  { %5491 = vst [vmem:[#allocation45_spill] sm:$0xff] %v4493_v36  ;;  %v4499_v16 = vpop.eup %2450  ;;  %2468 = vpow2.f32 %v1952_v41  ;;  %v959_v22 = vsub.f32 %v5494_v46, %v897_v18  ;;  %v960_v6 = vsub.f32 %v5495_v27, %v897_v18  ;;  %v1099_v0 = vadd.f32 %v4493_v36, %v4487_v45  ;;  %v5499_v41 = vld [vmem:[#allocation66_spill] sm:$0xff]  ;;  %v1849_v36 = vpop.xlane.xlu0 %1848 }
 0x1fd   :  { %5493 = vst [vmem:[#allocation14_spill] sm:$0xff] %v4499_v16  ;;  %v4505_v57 = vpop.eup %2452  ;;  %2470 = vpow2.f32 %v1954_v15  ;;  %2034 = vadd.xlane.f32.xlu0 %v2033_v50  ;;  %v1903_v18 = vsub.f32 %v5499_v41, %v4473_v28  ;;  %v1972_v46 = vmul.f32 1.442695, %v1902_v56  ;;  %v1102_v45 = vadd.f32 %v4443_v8, %v4435_v59  ;;  %v5504_v56 = vld [vmem:[#allocation16_spill] sm:$0xff]  ;;  %v5508_v8 = vld [vmem:[#allocation11_spill] sm:$0xff] }
 0x1fe   :  { %5496 = vst [vmem:[#allocation73_spill] sm:$0xff] %v4505_v57  ;;  %v4507_v53 = vpop.eup %2454  ;;  %2472 = vpow2.f32 %v1966_v54  ;;  %v1023_v19 = vmul.f32 1.442695, %v959_v22  ;;  %v1025_v20 = vmul.f32 1.442695, %v960_v6  ;;  %1100 = vadd.xlane.f32.xlu1 %v1099_v0  ;;  %v5501_v54 = vld [vmem:[#allocation57_spill] sm:$0xff]  ;;  %v969_v0 = vsub.f32 %v5504_v56, %v4491_v3 }
 0x1ff   :  { %5497 = vst [vmem:[#allocation74_spill] sm:$0xff] %v4507_v53  ;;  %v4509_v21 = vpop.eup %2456  ;;  %2474 = vpow2.f32 %v1035_v38  ;;  %v1834_v27 = vpop.xlane.xlu1 %1833  ;;  %v5502_v22 = vld [vmem:[#allocation9_spill] sm:$0xff] }
 0x200   :  { %5498 = vst [vmem:[#allocation86_spill] sm:$0xff] %v4509_v21  ;;  %v4515_v15 = vpop.eup %2458  ;;  %2476 = vpow2.f32 %v1023_v19  ;;  %v1896_v9 = vsub.f32 %v5501_v54, %v1834_v27  ;;  %v1897_v6 = vsub.f32 %v5502_v22, %v1834_v27  ;;  %v2036_v50 = vadd.f32 %v4509_v21, %v4507_v53  ;;  %v5506_v54 = vld [vmem:[#allocation17_spill] sm:$0xff] }
 0x201   :  { %5500 = vst [vmem:[#allocation75_spill] sm:$0xff] %v4515_v15  ;;  %v4521_v38 = vpop.eup %2460  ;;  %2478 = vpow2.f32 %v1025_v20  ;;  %1103 = vadd.xlane.f32.xlu0 %v1102_v45  ;;  %v1974_v27 = vmul.f32 1.442695, %v1903_v18  ;;  %v970_v22 = vsub.f32 %v5506_v54, %v4491_v3  ;;  %v2039_v20 = vadd.f32 %v4461_v60, %v4451_v17  ;;  %v5515_v17 = vld [vmem:[#allocation69_spill] sm:$0xff] }
 0x202   :  { %v4523_v28 = vpop.eup %2462  ;;  %2480 = vpow2.f32 %v1037_v2  ;;  %v1960_v41 = vmul.f32 1.442695, %v1896_v9  ;;  %v1962_v59 = vmul.f32 1.442695, %v1897_v6  ;;  %2037 = vadd.xlane.f32.xlu1 %v2036_v50  ;;  %v5507_v2 = vld [vmem:[#allocation61_spill] sm:$0xff]  ;;  %v5511_v6 = vld [vmem:[#allocation22_spill] sm:$0xff]  ;;  %v918_v50 = vpop.xlane.xlu0 %917 }
 0x203   :  { %5503 = vst [vmem:[#allocation87_spill] sm:$0xff] %v4523_v28  ;;  %v4527_v19 = vpop.eup %2464  ;;  %2482 = vpow2.f32 %v1972_v46  ;;  %v903_v53 = vpop.xlane.xlu1 %902  ;;  %v1043_v18 = vmul.f32 1.442695, %v969_v0  ;;  %v1906_v3 = vsub.f32 %v5511_v6, %v1849_v36  ;;  %v5514_v0 = vld [vmem:[#allocation68_spill] sm:$0xff] }
 0x204   :  { %5505 = vst [vmem:[#allocation24_spill] sm:$0xff] %v4527_v19  ;;  %2484 = vpow2.f32 %v1960_v41  ;;  %v963_v21 = vsub.f32 %v5507_v2, %v903_v53  ;;  %v964_v56 = vsub.f32 %v5508_v8, %v903_v53  ;;  %v1105_v9 = vadd.f32 %v4527_v19, %v4523_v28  ;;  %v4537_v45 = vpop.eup %2466  ;;  %v5513_v53 = vld [vmem:[#allocation19_spill] sm:$0xff] }
 0x205   :  { %5509 = vst [vmem:[#allocation84_spill] sm:$0xff] %v4537_v45  ;;  %2486 = vpow2.f32 %v1962_v59  ;;  %2040 = vadd.xlane.f32.xlu0 %v2039_v20  ;;  %v1045_v8 = vmul.f32 1.442695, %v970_v22  ;;  %v1907_v2 = vsub.f32 %v5513_v53, %v1849_v36  ;;  %v1108_v59 = vadd.f32 %v4485_v14, %v4467_v37  ;;  %v5528_v14 = vld [vmem:[#allocation93_spill] sm:$0xff] }
 0x206   :  { %v4539_v46 = vpop.eup %2468  ;;  %v1031_v54 = vmul.f32 1.442695, %v963_v21  ;;  %v1033_v49 = vmul.f32 1.442695, %v964_v56  ;;  %1106 = vadd.xlane.f32.xlu1 %v1105_v9  ;;  %2488 = vpow2.f32 %v1974_v27  ;;  %v1980_v36 = vmul.f32 1.442695, %v1906_v3 }
 0x207   :  { %5510 = vst [vmem:[#allocation85_spill] sm:$0xff] %v4539_v46  ;;  %v4542_v41 = vpop.eup %2470  ;;  %v1840_v28 = vpop.xlane.xlu1 %1839 }
 0x208   :  { %5512 = vst [vmem:[#allocation88_spill] sm:$0xff] %v4542_v41  ;;  %v4547_v19 = vpop.eup %2472  ;;  %2490 = vpow2.f32 %v1031_v54  ;;  %v1900_v6 = vsub.f32 %v5514_v0, %v1840_v28  ;;  %v1901_v21 = vsub.f32 %v5515_v17, %v1840_v28  ;;  %v2042_v20 = vadd.f32 %v4542_v41, %v4539_v46  ;;  %v5519_v0 = vld [vmem:[#allocation25_spill] sm:$0xff] }
 0x209   :  { %v4553_v56 = vpop.eup %2474  ;;  %2492 = vpow2.f32 %v1033_v49  ;;  %1109 = vadd.xlane.f32.xlu0 %v1108_v59  ;;  %v1982_v54 = vmul.f32 1.442695, %v1907_v2  ;;  %v973_v17 = vsub.f32 %v5519_v0, %v918_v50  ;;  %v2045_v46 = vadd.f32 %v4505_v57, %v4499_v16  ;;  %v1855_v49 = vpop.xlane.xlu0 %1854  ;;  %v5524_v2 = vld [vmem:[#allocation77_spill] sm:$0xff] }
 0x20a   :  { %5516 = vst [vmem:[#allocation40_spill] sm:$0xff] %v4553_v56  ;;  %v4555_v27 = vpop.eup %2476  ;;  %2494 = vpow2.f32 %v1043_v18  ;;  %v1968_v22 = vmul.f32 1.442695, %v1900_v6  ;;  %v1970_v9 = vmul.f32 1.442695, %v1901_v21  ;;  %2043 = vadd.xlane.f32.xlu1 %v2042_v20  ;;  %v5521_v18 = vld [vmem:[#allocation67_spill] sm:$0xff]  ;;  %v974_v0 = vsub.f32 %v5524_v2, %v918_v50 }
 0x20b   :  { %5517 = vst [vmem:[#allocation41_spill] sm:$0xff] %v4555_v27  ;;  %v4557_v53 = vpop.eup %2478  ;;  %2496 = vpow2.f32 %v1045_v8  ;;  %v909_v28 = vpop.xlane.xlu1 %908  ;;  %v5522_v6 = vld [vmem:[#allocation6_spill] sm:$0xff] }
 0x20c   :  { %5518 = vst [vmem:[#allocation38_spill] sm:$0xff] %v4557_v53  ;;  %v4562_v41 = vpop.eup %2480  ;;  %2498 = vpow2.f32 %v1968_v22  ;;  %v967_v3 = vsub.f32 %v5521_v18, %v909_v28  ;;  %v968_v21 = vsub.f32 %v5522_v6, %v909_v28  ;;  %v1111_v59 = vadd.f32 %v4557_v53, %v4555_v27  ;;  %v5526_v28 = vld [vmem:[#allocation21_spill] sm:$0xff]  ;;  %v5527_v53 = vld [vmem:[#allocation30_spill] sm:$0xff] }
 0x20d   :  { %5520 = vst [vmem:[#allocation47_spill] sm:$0xff] %v4562_v41  ;;  %v4568_v20 = vpop.eup %2482  ;;  %2500 = vpow2.f32 %v1970_v9  ;;  %2046 = vadd.xlane.f32.xlu0 %v2045_v46  ;;  %v1051_v18 = vmul.f32 1.442695, %v973_v17  ;;  %v1910_v6 = vsub.f32 %v5526_v28, %v1855_v49  ;;  %v1114_v27 = vadd.f32 %v4521_v38, %v4515_v15  ;;  %v924_v9 = vpop.xlane.xlu0 %923 }
 0x20e   :  { %v4570_v8 = vpop.eup %2484  ;;  %2502 = vpow2.f32 %v1980_v36  ;;  %v1039_v16 = vmul.f32 1.442695, %v967_v3  ;;  %v1041_v57 = vmul.f32 1.442695, %v968_v21  ;;  %1112 = vadd.xlane.f32.xlu1 %v1111_v59  ;;  %v1053_v17 = vmul.f32 1.442695, %v974_v0 }
 0x20f   :  { %5523 = vst [vmem:[#allocation48_spill] sm:$0xff] %v4570_v8  ;;  %v4573_v22 = vpop.eup %2486  ;;  %2504 = vpow2.f32 %v1982_v54  ;;  %v1846_v37 = vpop.xlane.xlu1 %1845  ;;  %v5530_v21 = vld [vmem:[#allocation81_spill] sm:$0xff]  ;;  %v5532_v0 = vld [vmem:[#allocation94_spill] sm:$0xff] }
 0x210   :  { %5525 = vst [vmem:[#allocation50_spill] sm:$0xff] %v4573_v22  ;;  %2506 = vpow2.f32 %v1039_v16  ;;  %v1904_v36 = vsub.f32 %v5527_v53, %v1846_v37  ;;  %v1905_v50 = vsub.f32 %v5528_v14, %v1846_v37  ;;  %v2048_v3 = vadd.f32 %v4573_v22, %v4570_v8  ;;  %v4582_v46 = vpop.eup %2488  ;;  %v5531_v37 = vld [vmem:[#allocation76_spill] sm:$0xff] }
 0x211   :  { %2508 = vpow2.f32 %v1041_v57  ;;  %v1911_v59 = vsub.f32 %v5530_v21, %v1855_v49  ;;  %1115 = vadd.xlane.f32.xlu0 %v1114_v27  ;;  %v1988_v53 = vmul.f32 1.442695, %v1910_v6  ;;  %v977_v14 = vsub.f32 %v5531_v37, %v924_v9  ;;  %v5533_v49 = vld [vmem:[#allocation95_spill] sm:$0xff] }
 0x212   :  { %v4584_v54 = vpop.eup %2490  ;;  %v1976_v2 = vmul.f32 1.442695, %v1904_v36  ;;  %v1978_v28 = vmul.f32 1.442695, %v1905_v50  ;;  %2049 = vadd.xlane.f32.xlu1 %v2048_v3  ;;  %2510 = vpow2.f32 %v1051_v18  ;;  %v2051_v8 = vadd.f32 %v4547_v19, %v4537_v45 }
 0x213   :  { %5529 = vst [vmem:[#allocation51_spill] sm:$0xff] %v4584_v54  ;;  %v4587_v16 = vpop.eup %2492  ;;  %v915_v15 = vpop.xlane.xlu1 %914  ;;  %v1990_v6 = vmul.f32 1.442695, %v1911_v59 }
 0x214   :  { %v4592_v57 = vpop.eup %2494  ;;  %2512 = vpow2.f32 %v1976_v2  ;;  %v971_v22 = vsub.f32 %v5532_v0, %v915_v15  ;;  %v972_v36 = vsub.f32 %v5533_v49, %v915_v15  ;;  %v1117_v27 = vadd.f32 %v4587_v16, %v4584_v54  ;;  %v5535_v2 = vld [vmem:[#allocation90_spill] sm:$0xff]  ;;  %v1861_v49 = vpop.xlane.xlu0 %1860 }
 0x215   :  { %v4598_v50 = vpop.eup %2496  ;;  %2514 = vpow2.f32 %v1978_v28  ;;  %2052 = vadd.xlane.f32.xlu0 %v2051_v8  ;;  %v978_v0 = vsub.f32 %v5535_v2, %v924_v9  ;;  %v1059_v15 = vmul.f32 1.442695, %v977_v14  ;;  %v1120_v54 = vadd.f32 %v4562_v41, %v4553_v56 }
 0x216   :  { %v4600_v18 = vpop.eup %2498  ;;  %2516 = vpow2.f32 %v1053_v17  ;;  %v1047_v3 = vmul.f32 1.442695, %v971_v22  ;;  %v1049_v21 = vmul.f32 1.442695, %v972_v36  ;;  %1118 = vadd.xlane.f32.xlu1 %v1117_v27  ;;  %v5536_v17 = vld [vmem:[#allocation96_spill] sm:$0xff]  ;;  %v5537_v22 = vld [vmem:[#allocation97_spill] sm:$0xff] }
 0x217   :  { %5534 = vst [vmem:[#allocation52_spill] sm:$0xff] %v4600_v18  ;;  %v4602_v37 = vpop.eup %2500  ;;  %2518 = vpow2.f32 %v1988_v53  ;;  %v1852_v45 = vpop.xlane.xlu1 %1851  ;;  %v5539_v53 = vld [vmem:[#allocation91_spill] sm:$0xff] }
 0x218   :  { %v4607_v28 = vpop.eup %2502  ;;  %2520 = vpow2.f32 %v1047_v3  ;;  %v1908_v59 = vsub.f32 %v5536_v17, %v1852_v45  ;;  %v1909_v36 = vsub.f32 %v5537_v22, %v1852_v45  ;;  %v2054_v8 = vadd.f32 %v4602_v37, %v4600_v18  ;;  %v5540_v45 = vld [vmem:[#allocation92_spill] sm:$0xff] }
 0x219   :  { %v4613_v27 = vpop.eup %2504  ;;  %2522 = vpow2.f32 %v1049_v21  ;;  %v1914_v14 = vsub.f32 %v5539_v53, %v1861_v49  ;;  %1121 = vadd.xlane.f32.xlu0 %v1120_v54  ;;  %v1061_v17 = vmul.f32 1.442695, %v978_v0  ;;  %v1915_v22 = vsub.f32 %v5540_v45, %v1861_v49 }
 0x21a   :  { %v4615_v9 = vpop.eup %2506  ;;  %2524 = vpow2.f32 %v1990_v6  ;;  %v1984_v2 = vmul.f32 1.442695, %v1908_v59  ;;  %v1986_v56 = vmul.f32 1.442695, %v1909_v36  ;;  %2055 = vadd.xlane.f32.xlu1 %v2054_v8  ;;  %v2057_v59 = vadd.f32 %v4582_v46, %v4568_v20 }
 0x21b   :  { %5538 = vst [vmem:[#allocation53_spill] sm:$0xff] %v4615_v9  ;;  %v4618_v3 = vpop.eup %2508  ;;  %2526 = vpow2.f32 %v1059_v15  ;;  %v921_v41 = vpop.xlane.xlu1 %920  ;;  %v1126_v15 = vadd.f32 %v4598_v50, %v4592_v57 }
 0x21c   :  { %v930_v18 = vpop.xlane.xlu0 %929  ;;  %2528 = vpow2.f32 %v1984_v2  ;;  %v975_v6 = vsub.f32 %v4169_v43, %v921_v41  ;;  %v976_v53 = vsub.f32 %v4171_v7, %v921_v41  ;;  %v4627_v54 = vpop.eup %2510  ;;  %v1123_v0 = vadd.f32 %v4618_v3, %v4615_v9 }
 0x21d   :  { %5541 = vst [vmem:[#allocation55_spill] sm:$0xff] %v4627_v54  ;;  %2530 = vpow2.f32 %v1986_v56  ;;  %v1996_v43 = vmul.f32 1.442695, %v1914_v14  ;;  %v981_v41 = vsub.f32 %v4194_v13, %v930_v18  ;;  %2058 = vadd.xlane.f32.xlu0 %v2057_v59  ;;  %v1998_v56 = vmul.f32 1.442695, %v1915_v22 }
 0x21e   :  { %v4635_v36 = vpop.eup %2512  ;;  %v1055_v8 = vmul.f32 1.442695, %v975_v6  ;;  %v1057_v7 = vmul.f32 1.442695, %v976_v53  ;;  %2532 = vpow2.f32 %v1061_v17  ;;  %v982_v45 = vsub.f32 %v4196_v1, %v930_v18  ;;  %1124 = vadd.xlane.f32.xlu1 %v1123_v0  ;;  %v5546_v18 = vld [vmem:[#allocation54_spill] sm:$0xff] }
 0x21f   :  { %5542 = vst [vmem:[#allocation12_spill] sm:$0xff] %v4635_v36  ;;  %v4638_v2 = vpop.eup %2514  ;;  %v1858_v21 = vpop.xlane.xlu1 %1857  ;;  %v2063_v1 = vadd.f32 %v4613_v27, %v4607_v28  ;;  %v1067_v59 = vmul.f32 1.442695, %v981_v41 }
 0x220   :  { %v4643_v49 = vpop.eup %2516  ;;  %2534 = vpow2.f32 %v1055_v8  ;;  %v1912_v14 = vsub.f32 %v4177_v23, %v1858_v21  ;;  %v1913_v6 = vsub.f32 %v4179_v34, %v1858_v21  ;;  %v1867_v13 = vpop.xlane.xlu0 %1866  ;;  %v2060_v53 = vadd.f32 %v4638_v2, %v4635_v36 }
 0x221   :  { %v4649_v17 = vpop.eup %2518  ;;  %2536 = vpow2.f32 %v1057_v7  ;;  %1127 = vadd.xlane.f32.xlu0 %v1126_v15  ;;  %v1069_v21 = vmul.f32 1.442695, %v982_v45  ;;  %v1918_v8 = vsub.f32 %v4205_v55, %v1867_v13 }
 0x222   :  { %v4655_v22 = vpop.eup %2520  ;;  %2538 = vpow2.f32 %v1996_v43  ;;  %v1992_v23 = vmul.f32 1.442695, %v1912_v14  ;;  %v1994_v0 = vmul.f32 1.442695, %v1913_v6  ;;  %2061 = vadd.xlane.f32.xlu1 %v2060_v53  ;;  %v5545_v6 = vld [vmem:[#allocation28_spill] sm:$0xff] }
 0x223   :  { %5543 = vst [vmem:[#allocation15_spill] sm:$0xff] %v4655_v22  ;;  %v4657_v34 = vpop.eup %2522  ;;  %2540 = vpow2.f32 %v1998_v56  ;;  %v927_v7 = vpop.xlane.xlu1 %926  ;;  %v1919_v53 = vsub.f32 %v5545_v6, %v1867_v13 }
 0x224   :  { %v4662_v36 = vpop.eup %2524  ;;  %2542 = vpow2.f32 %v1992_v23  ;;  %v979_v43 = vsub.f32 %v4224_v58, %v927_v7  ;;  %v980_v41 = vsub.f32 %v4226_v42, %v927_v7  ;;  %v936_v14 = vpop.xlane.xlu0 %935  ;;  %v1129_v15 = vadd.f32 %v4657_v34, %v4655_v22  ;;  %v5547_v22 = vld [vmem:[#allocation13_spill] sm:$0xff] }
 0x225   :  { %v4668_v56 = vpop.eup %2526  ;;  %2544 = vpow2.f32 %v1994_v0  ;;  %2064 = vadd.xlane.f32.xlu0 %v2063_v1  ;;  %v2004_v42 = vmul.f32 1.442695, %v1918_v8  ;;  %v1132_v0 = vadd.f32 %v4643_v49, %v4627_v54 }
 0x226   :  { %v4672_v45 = vpop.eup %2528  ;;  %2546 = vpow2.f32 %v1067_v59  ;;  %v1063_v23 = vmul.f32 1.442695, %v979_v43  ;;  %v1065_v9 = vmul.f32 1.442695, %v980_v41  ;;  %1130 = vadd.xlane.f32.xlu1 %v1129_v15  ;;  %v2006_v41 = vmul.f32 1.442695, %v1919_v53 }
 0x227   :  { %5544 = vst [vmem:[#allocation56_spill] sm:$0xff] %v4672_v45  ;;  %v4675_v58 = vpop.eup %2530  ;;  %2548 = vpow2.f32 %v1069_v21  ;;  %v1864_v7 = vpop.xlane.xlu1 %1863  ;;  %v5549_v15 = vld [vmem:[#allocation31_spill] sm:$0xff] }
 0x228   :  { %2550 = vpow2.f32 %v1063_v23  ;;  %v1916_v59 = vsub.f32 %v5546_v18, %v1864_v7  ;;  %v1917_v13 = vsub.f32 %v5547_v22, %v1864_v7  ;;  %v2066_v1 = vadd.f32 %v4675_v58, %v4672_v45  ;;  %v4685_v43 = vpop.eup %2532  ;;  %v1873_v54 = vpop.xlane.xlu0 %1872  ;;  %v5550_v22 = vld [vmem:[#allocation89_spill] sm:$0xff] }
 0x229   :  { %2552 = vpow2.f32 %v1065_v9  ;;  %v985_v6 = vsub.f32 %v5549_v15, %v936_v14  ;;  %1133 = vadd.xlane.f32.xlu0 %v1132_v0  ;;  %v986_v7 = vsub.f32 %v5550_v22, %v936_v14  ;;  %v5552_v14 = vld [vmem:[#allocation70_spill] sm:$0xff] }
 0x22a   :  { %v4689_v8 = vpop.eup %2534  ;;  %v2000_v55 = vmul.f32 1.442695, %v1916_v59  ;;  %v2002_v23 = vmul.f32 1.442695, %v1917_v13  ;;  %2554 = vpow2.f32 %v2004_v42  ;;  %2067 = vadd.xlane.f32.xlu1 %v2066_v1  ;;  %v2069_v59 = vadd.f32 %v4662_v36, %v4649_v17  ;;  %v5554_v22 = vld [vmem:[#allocation34_spill] sm:$0xff] }
 0x22b   :  { %5548 = vst [vmem:[#allocation58_spill] sm:$0xff] %v4689_v8  ;;  %v4692_v18 = vpop.eup %2536  ;;  %v1922_v42 = vsub.f32 %v5552_v14, %v1873_v54  ;;  %v1075_v15 = vmul.f32 1.442695, %v985_v6  ;;  %v1077_v21 = vmul.f32 1.442695, %v986_v7  ;;  %v1138_v14 = vadd.f32 %v4685_v43, %v4668_v56 }
 0x22c   :  { %v4697_v45 = vpop.eup %2538  ;;  %2556 = vpow2.f32 %v2000_v55  ;;  %v1135_v53 = vadd.f32 %v4692_v18, %v4689_v8  ;;  %v1923_v55 = vsub.f32 %v5554_v22, %v1873_v54 }
 0x22d   :  { %5551 = vst [vmem:[#allocation20_spill] sm:$0xff] %v4697_v45  ;;  %v4705_v13 = vpop.eup %2540  ;;  %2558 = vpow2.f32 %v2002_v23  ;;  %2070 = vadd.xlane.f32.xlu0 %v2069_v59  ;;  %v2012_v6 = vmul.f32 1.442695, %v1922_v42 }
 0x22e   :  { %v4708_v1 = vpop.eup %2542  ;;  %2560 = vpow2.f32 %v2006_v41  ;;  %1136 = vadd.xlane.f32.xlu1 %v1135_v53  ;;  %v2014_v7 = vmul.f32 1.442695, %v1923_v55  ;;  %v2075_v8 = vadd.f32 %v4705_v13, %v4697_v45 }
 0x22f   :  { %5553 = vst [vmem:[#allocation78_spill] sm:$0xff] %v4708_v1  ;;  %v4711_v9 = vpop.eup %2544  ;;  %2562 = vpow2.f32 %v1075_v15 }
 0x230   :  { %v4715_v0 = vpop.eup %2546  ;;  %v2072_v23 = vadd.f32 %v4711_v9, %v4708_v1  ;;  %2564 = vpow2.f32 %v1077_v21  ;;  %v933_v22 = vpop.xlane.xlu1 %932 }
 0x231   :  { %v4723_v54 = vpop.eup %2548  ;;  %1139 = vadd.xlane.f32.xlu0 %v1138_v14  ;;  %v983_v41 = vsub.f32 %v4325_v4, %v933_v22  ;;  %v984_v42 = vsub.f32 %v4327_v61, %v933_v22  ;;  %2566 = vpow2.f32 %v2012_v6 }
 0x232   :  { %v4725_v59 = vpop.eup %2550  ;;  %2073 = vadd.xlane.f32.xlu1 %v2072_v23  ;;  %2568 = vpow2.f32 %v2014_v7  ;;  %v1144_v61 = vadd.f32 %v4723_v54, %v4715_v0 }
 0x233   :  { %5555 = vst [vmem:[#allocation59_spill] sm:$0xff] %v4725_v59  ;;  %v4727_v53 = vpop.eup %2552  ;;  %v1071_v23 = vmul.f32 1.442695, %v983_v41  ;;  %v1073_v45 = vmul.f32 1.442695, %v984_v42 }
 0x234   :  { %v1141_v15 = vadd.f32 %v4727_v53, %v4725_v59  ;;  %v4739_v14 = vpop.eup %2554  ;;  %v1870_v4 = vpop.xlane.xlu1 %1869 }
 0x235   :  { %2076 = vadd.xlane.f32.xlu0 %v2075_v8  ;;  %2570 = vpow2.f32 %v1071_v23  ;;  %v1920_v6 = vsub.f32 %v4337_v44, %v1870_v4  ;;  %v1921_v7 = vsub.f32 %v4339_v33, %v1870_v4 }
 0x236   :  { %v4741_v21 = vpop.eup %2556  ;;  %1142 = vadd.xlane.f32.xlu1 %v1141_v15  ;;  %2572 = vpow2.f32 %v1073_v45 }
 0x237   :  { %5556 = vst [vmem:[#allocation79_spill] sm:$0xff] %v4741_v21  ;;  %v4743_v1 = vpop.eup %2558  ;;  %v2008_v42 = vmul.f32 1.442695, %v1920_v6  ;;  %v2010_v15 = vmul.f32 1.442695, %v1921_v7 }
 0x238   :  { %v4749_v55 = vpop.eup %2560  ;;  %v2078_v8 = vadd.f32 %v4743_v1, %v4741_v21  ;;  %v939_v59 = vpop.xlane.xlu1 %938 }
 0x239   :  { %1145 = vadd.xlane.f32.xlu0 %v1144_v61  ;;  %v4757_v22 = vpop.eup %2562  ;;  %2574 = vpow2.f32 %v2008_v42  ;;  %v987_v23 = vsub.f32 %v4365_v29, %v939_v59  ;;  %v988_v44 = vsub.f32 %v4367_v62, %v939_v59  ;;  %v2081_v33 = vadd.f32 %v4749_v55, %v4739_v14 }
 0x23a   :  { %2079 = vadd.xlane.f32.xlu1 %v2078_v8  ;;  %v4763_v4 = vpop.eup %2564  ;;  %2576 = vpow2.f32 %v2010_v15 }
 0x23b   :  { %v1079_v45 = vmul.f32 1.442695, %v987_v23  ;;  %v1081_v41 = vmul.f32 1.442695, %v988_v44  ;;  %v4765_v6 = vpop.eup %2566  ;;  %v1150_v62 = vadd.f32 %v4763_v4, %v4757_v22 }
 0x23c   :  { %v1876_v61 = vpop.xlane.xlu1 %1875  ;;  %v4767_v7 = vpop.eup %2568 }
 0x23d   :  { %2082 = vadd.xlane.f32.xlu0 %v2081_v33  ;;  %2578 = vpow2.f32 %v1079_v45  ;;  %v1924_v8 = vsub.f32 %v4377_v30, %v1876_v61  ;;  %v1925_v29 = vsub.f32 %v4379_v39, %v1876_v61  ;;  %v2087_v30 = vadd.f32 %v4767_v7, %v4765_v6 }
 0x23e   :  { %2580 = vpow2.f32 %v1081_v41  ;;  %v942_v59 = vpop.xlane.xlu0 %941 }
 0x23f   :  { %v4773_v42 = vpop.eup %2570  ;;  %v2016_v15 = vmul.f32 1.442695, %v1924_v8  ;;  %v2018_v23 = vmul.f32 1.442695, %v1925_v29  ;;  %v989_v44 = vsub.f32 %v4389_v26, %v942_v59  ;;  %v990_v33 = vsub.f32 %v4391_v11, %v942_v59 }
 0x240   :  { %v4777_v21 = vpop.eup %2572 }
 0x241   :  { %1151 = vadd.xlane.f32.xlu0 %v1150_v62  ;;  %2582 = vpow2.f32 %v2016_v15  ;;  %v1083_v41 = vmul.f32 1.442695, %v989_v44  ;;  %v1085_v45 = vmul.f32 1.442695, %v990_v33  ;;  %v1147_v61 = vadd.f32 %v4777_v21, %v4773_v42 }
 0x242   :  { %2584 = vpow2.f32 %v2018_v23  ;;  %v1879_v8 = vpop.xlane.xlu0 %1878 }
 0x243   :  { %v4787_v11 = vpop.eup %2574  ;;  %2586 = vpow2.f32 %v1083_v41  ;;  %1148 = vadd.xlane.f32.xlu1 %v1147_v61  ;;  %v1926_v29 = vsub.f32 %v4395_v25, %v1879_v8  ;;  %v1927_v62 = vsub.f32 %v4397_v40, %v1879_v8  ;;  %v50_v41 = vld [vmem:[%s5030_s3] sm:$0xf] }
 0x244   :  { %5557 = vst [vmem:[#allocation80_spill] sm:$0xff] %v4787_v11  ;;  %v4791_v59 = vpop.eup %2576  ;;  %2588 = vpow2.f32 %v1085_v45 }
 0x245   :  { %2088 = vadd.xlane.f32.xlu0 %v2087_v30  ;;  %v2020_v23 = vmul.f32 1.442695, %v1926_v29  ;;  %v2022_v44 = vmul.f32 1.442695, %v1927_v62  ;;  %v2084_v33 = vadd.f32 %v4791_v59, %v4787_v11 }
 0x247   :  { %v4799_v61 = vpop.eup %2578  ;;  %2590 = vpow2.f32 %v2020_v23  ;;  %2085 = vadd.xlane.f32.xlu1 %v2084_v33  ;;  %v4834_v23 = vld [vmem:[%s5029_s2] sm:$0xff]  ;;  %v1089_v33 = vpop.xlane.xlu1 %1088 }
 0x248   :  { %5558 = vst [vmem:[#allocation18_spill] sm:$0xff] %v4799_v61  ;;  %v4801_v25 = vpop.eup %2580  ;;  %2592 = vpow2.f32 %v2022_v44  ;;  %5566 = vst [vmem:[#allocation33_spill] sm:$0xff] %v4834_v23 }
 0x249   :  { %5559 = vst [vmem:[#allocation60_spill] sm:$0xff] %v4801_v25  ;;  %v1153_v40 = vadd.f32 %v4801_v25, %v4799_v61  ;;  %2594 = vrcp.f32 %v1089_v33  ;;  %v1159_v33 = vpack.c.bf16 %v4437_v35, %v4355_v10  ;;  %v5568_v10 = vpack.c.bf16 %v4251_v24, %v4263_v12 }
 0x24b   :  { %v4805_v30 = vpop.eup %2582  ;;  %1154 = vadd.xlane.f32.xlu1 %v1153_v40 }
 0x24c   :  { %5560 = vst [vmem:[#allocation27_spill] sm:$0xff] %v4805_v30  ;;  %v4807_v45 = vpop.eup %2584 }
 0x24d   :  { %5561 = vst [vmem:[#allocation23_spill] sm:$0xff] %v4807_v45  ;;  %v4809_v8 = vpop.eup %2586  ;;  %v2090_v29 = vadd.f32 %v4807_v45, %v4805_v30 }
 0x24e   :  { %5562 = vst [vmem:[#allocation62_spill] sm:$0xff] %v4809_v8  ;;  %v4813_v62 = vpop.eup %2588 }
 0x24f   :  { %5563 = vst [vmem:[#allocation63_spill] sm:$0xff] %v4813_v62  ;;  %2091 = vadd.xlane.f32.xlu1 %v2090_v29  ;;  %v1156_v44 = vadd.f32 %v4813_v62, %v4809_v8  ;;  %v2026_v29 = vpop.xlane.xlu1 %2025  ;;  %v1160_v8 = vpack.c.bf16 %v4440_v51, %v4381_v5  ;;  %v5567_v5 = vpack.c.bf16 %v4261_v63, %v4267_v47 }
 0x251   :  { %v4821_v40 = vpop.eup %2590  ;;  %1157 = vadd.xlane.f32.xlu0 %v1156_v44  ;;  %v2334_v44 = vcombine.high %v4834_v23, %v4834_v23 }
 0x252   :  { %5564 = vst [vmem:[#allocation82_spill] sm:$0xff] %v4821_v40  ;;  %v4823_v15 = vpop.eup %2592 }
 0x253   :  { %5565 = vst [vmem:[#allocation5_spill] sm:$0xff] %v4823_v15  ;;  %v2093_v39 = vadd.f32 %v4823_v15, %v4821_v40  ;;  %2335 = vmatprep.mubr.msk.bf16.mxu0 %vm1273_vm0, %v2334_v44  ;;  %2338 = vmatprep.mubr.msk.bf16.mxu1 %vm1273_vm0, %v2334_v44  ;;  %v2595_v15 = vpop.eup %2594 }
 0x255   :  { %2094 = vadd.xlane.f32.xlu0 %v2093_v39 }
 0x260   :  { %1336 = vperm.xlu1 %2398, %v50_v41  }
 0x27d   :  { %v1092_v39 = vpop.xlane.xlu0 %1091 }
 0x27e   :  { %2596 = vrcp.f32 %v1092_v39 }
 0x27f   :  { %2598 = vrcp.f32 %v2026_v29 }
 0x281   :  { %v1095_v26 = vpop.xlane.xlu1 %1094 }
 0x282   :  { %v2029_v30 = vpop.xlane.xlu0 %2028 }
 0x283   :  { %2600 = vrcp.f32 %v2029_v30 }
 0x284   :  { %2602 = vrcp.f32 %v1095_v26 }
 0x286   :  { %v1098_v45 = vpop.xlane.xlu0 %1097 }
 0x287   :  { %v2032_v40 = vpop.xlane.xlu1 %2031  ;;  %2604 = vrcp.f32 %v1098_v45 }
 0x288   :  { %v2597_v44 = vpop.eup %2596  ;;  %2606 = vrcp.f32 %v2032_v40 }
 0x289   :  { %v1231_v41 = vpack.c.bf16 %v2597_v44, %v2595_v15  ;;  %v2599_v30 = vpop.eup %2598 }
 0x28a   :  { %v2035_v61 = vpop.xlane.xlu0 %2034 }
 0x28b   :  { %v1101_v23 = vpop.xlane.xlu1 %1100  ;;  %2608 = vrcp.f32 %v2035_v61  ;;  %v1244_v39 = vmul.bf16 %v1231_v41, %v1160_v8  ;;  %v1243_v29 = vmul.bf16 %v1231_v41, %v1159_v33  ;;  %v5569_v33 = vld [vmem:[#allocation42_spill] sm:$0xff] }
 0x28c   :  { %2610 = vrcp.f32 %v1101_v23  ;;  %v1162_v23 = vpack.c.bf16 %v4423_v52, %v4455_v48  ;;  %v5572_v52 = vld [vmem:[#allocation32_spill] sm:$0xff] }
 0x28d   :  { %v2601_v25 = vpop.eup %2600  ;;  %1277 = vmatprep.subr.bf16.mxu0 %v1244_v39 }
 0x28e   :  { %v1104_v26 = vpop.xlane.xlu0 %1103  ;;  %1278 = vmatpush1.bf16.msra.mxu0 %v1243_v29  ;;  %v2168_v45 = vpack.c.bf16 %v2601_v25, %v2599_v30  ;;  %v2603_v11 = vpop.eup %2602  ;;  %v1161_v25 = vpack.c.bf16 %v4419_v32, %v4453_v31  ;;  %v5571_v30 = vld [vmem:[#allocation72_spill] sm:$0xff] }
 0x28f   :  { %v2038_v62 = vpop.xlane.xlu1 %2037  ;;  %2612 = vrcp.f32 %v1104_v26  ;;  %v2098_v48 = vpack.c.bf16 %v5572_v52, %v5571_v30 }
 0x290   :  { %v2181_v51 = vmul.bf16 %v2168_v45, %v5567_v5  ;;  %v2180_v35 = vmul.bf16 %v2168_v45, %v5568_v10  ;;  %2614 = vrcp.f32 %v2038_v62  ;;  %v5570_v62 = vld [vmem:[#allocation39_spill] sm:$0xff] }
 0x291   :  { %v2605_v15 = vpop.eup %2604  ;;  %v2099_v39 = vpack.c.bf16 %v5570_v62, %v5569_v33  ;;  %v5574_v10 = vld [vmem:[#allocation71_spill] sm:$0xff]  ;;  %v5578_v62 = vld [vmem:[#allocation74_spill] sm:$0xff] }
 0x292   :  { %v2041_v8 = vpop.xlane.xlu0 %2040  ;;  %2204 = vmatprep.subr.bf16.mxu1 %v2181_v51  ;;  %v1232_v40 = vpack.c.bf16 %v2605_v15, %v2603_v11  ;;  %v2607_v63 = vpop.eup %2606  ;;  %v5573_v51 = vld [vmem:[#allocation45_spill] sm:$0xff] }
 0x293   :  { %v1107_v61 = vpop.xlane.xlu1 %1106  ;;  %2616 = vrcp.f32 %v2041_v8  ;;  %2205 = vmatpush1.bf16.msra.mxu1 %v2180_v35  ;;  %v1164_v35 = vpack.c.bf16 %v5574_v10, %v5573_v51  ;;  %v5576_v8 = vld [vmem:[#allocation37_spill] sm:$0xff]  ;;  %v5582_v10 = vld [vmem:[#allocation87_spill] sm:$0xff] }
 0x294   :  { %v1246_v47 = vmul.bf16 %v1232_v40, %v1162_v23  ;;  %v1245_v44 = vmul.bf16 %v1232_v40, %v1161_v25  ;;  %2618 = vrcp.f32 %v1107_v61  ;;  %v5575_v61 = vld [vmem:[#allocation44_spill] sm:$0xff] }
 0x295   :  { %v2609_v41 = vpop.eup %2608  ;;  %v1163_v23 = vpack.c.bf16 %v5576_v8, %v5575_v61 }
 0x296   :  { %v1110_v12 = vpop.xlane.xlu0 %1109  ;;  %1279 = vmatprep.subr.bf16.mxu0 %v1246_v47  ;;  %v2169_v29 = vpack.c.bf16 %v2609_v41, %v2607_v63  ;;  %v2611_v32 = vpop.eup %2610 }
 0x297   :  { %v2044_v24 = vpop.xlane.xlu1 %2043  ;;  %2620 = vrcp.f32 %v1110_v12  ;;  %1280 = vmatpush1.bf16.msra.mxu0 %v1245_v44  ;;  %v5577_v12 = vld [vmem:[#allocation86_spill] sm:$0xff] }
 0x298   :  { %v2183_v31 = vmul.bf16 %v2169_v29, %v2099_v39  ;;  %v2182_v11 = vmul.bf16 %v2169_v29, %v2098_v48  ;;  %2622 = vrcp.f32 %v2044_v24  ;;  %v2101_v24 = vpack.c.bf16 %v4461_v60, %v5577_v12  ;;  %v5579_v39 = vld [vmem:[#allocation26_spill] sm:$0xff]  ;;  %v5583_v60 = vld [vmem:[#allocation83_spill] sm:$0xff]  ;;  %v5586_v12 = vld [vmem:[#allocation85_spill] sm:$0xff] }
 0x299   :  { %v2613_v26 = vpop.eup %2612  ;;  %v2100_v29 = vpack.c.bf16 %v5579_v39, %v5578_v62 }
 0x29a   :  { %v2047_v5 = vpop.xlane.xlu0 %2046  ;;  %2206 = vmatprep.subr.bf16.mxu1 %v2183_v31  ;;  %v1233_v15 = vpack.c.bf16 %v2613_v26, %v2611_v32  ;;  %v2615_v40 = vpop.eup %2614  ;;  %v5580_v26 = vld [vmem:[#allocation24_spill] sm:$0xff] }
 0x29b   :  { %v1113_v45 = vpop.xlane.xlu1 %1112  ;;  %2624 = vrcp.f32 %v2047_v5  ;;  %2207 = vmatpush1.bf16.msra.mxu1 %v2182_v11 }
 0x29c   :  { %v1248_v25 = vmul.bf16 %v1233_v15, %v1164_v35  ;;  %v1247_v63 = vmul.bf16 %v1233_v15, %v1163_v23  ;;  %2626 = vrcp.f32 %v1113_v45  ;;  %v5581_v45 = vld [vmem:[#allocation43_spill] sm:$0xff]  ;;  %v1165_v35 = vpack.c.bf16 %v5583_v60, %v5582_v10 }
 0x29d   :  { %v2617_v47 = vpop.eup %2616  ;;  %v1166_v5 = vpack.c.bf16 %v5581_v45, %v5580_v26  ;;  %v5589_v26 = vld [vmem:[#allocation41_spill] sm:$0xff]  ;;  %v5590_v45 = vld [vmem:[#allocation75_spill] sm:$0xff] }
 0x29e   :  { %v1116_v41 = vpop.xlane.xlu0 %1115  ;;  %1281 = vmatprep.subr.bf16.mxu0 %v1248_v25  ;;  %v2170_v33 = vpack.c.bf16 %v2617_v47, %v2615_v40  ;;  %v2619_v30 = vpop.eup %2618  ;;  %v5585_v47 = vld [vmem:[#allocation73_spill] sm:$0xff] }
 0x29f   :  { %v2050_v44 = vpop.xlane.xlu1 %2049  ;;  %2628 = vrcp.f32 %v1116_v41  ;;  %1282 = vmatpush1.bf16.msra.mxu0 %v1247_v63  ;;  %v5584_v63 = vld [vmem:[#allocation88_spill] sm:$0xff] }
 0x2a0   :  { %v2185_v52 = vmul.bf16 %v2170_v33, %v2101_v24  ;;  %v2184_v48 = vmul.bf16 %v2170_v33, %v2100_v29  ;;  %2630 = vrcp.f32 %v2050_v44  ;;  %v2103_v44 = vpack.c.bf16 %v5585_v47, %v5584_v63  ;;  %v5587_v24 = vld [vmem:[#allocation14_spill] sm:$0xff] }
 0x2a1   :  { %v2621_v32 = vpop.eup %2620  ;;  %v2102_v33 = vpack.c.bf16 %v5587_v24, %v5586_v12 }
 0x2a2   :  { %v2053_v11 = vpop.xlane.xlu0 %2052  ;;  %2208 = vmatprep.subr.bf16.mxu1 %v2185_v52  ;;  %v1234_v51 = vpack.c.bf16 %v2621_v32, %v2619_v30  ;;  %v2623_v15 = vpop.eup %2622  ;;  %v5588_v32 = vld [vmem:[#allocation38_spill] sm:$0xff] }
 0x2a3   :  { %v1119_v31 = vpop.xlane.xlu1 %1118  ;;  %2632 = vrcp.f32 %v2053_v11  ;;  %2209 = vmatpush1.bf16.msra.mxu1 %v2184_v48 }
 0x2a4   :  { %v1250_v61 = vmul.bf16 %v1234_v51, %v1166_v5  ;;  %v1249_v8 = vmul.bf16 %v1234_v51, %v1165_v35  ;;  %2634 = vrcp.f32 %v1119_v31  ;;  %v1168_v31 = vpack.c.bf16 %v4521_v38, %v5588_v32  ;;  %v5593_v38 = vld [vmem:[#allocation84_spill] sm:$0xff] }
 0x2a5   :  { %v2625_v23 = vpop.eup %2624  ;;  %v1167_v5 = vpack.c.bf16 %v5590_v45, %v5589_v26  ;;  %v2107_v45 = vpack.c.bf16 %v4582_v46, %v4602_v37  ;;  %v5598_v37 = vpack.c.bf16 %v4598_v50, %v4618_v3  ;;  %v5602_v50 = vld [vmem:[#allocation12_spill] sm:$0xff] }
 0x2a6   :  { %v1122_v25 = vpop.xlane.xlu0 %1121  ;;  %1283 = vmatprep.subr.bf16.mxu0 %v1250_v61  ;;  %v2171_v41 = vpack.c.bf16 %v2625_v23, %v2623_v15  ;;  %v2627_v62 = vpop.eup %2626  ;;  %v5603_v3 = vpack.c.bf16 %v4607_v28, %v5602_v50 }
 0x2a7   :  { %v2056_v40 = vpop.xlane.xlu1 %2055  ;;  %2636 = vrcp.f32 %v1122_v25  ;;  %1284 = vmatpush1.bf16.msra.mxu0 %v1249_v8  ;;  %v5591_v8 = vld [vmem:[#allocation50_spill] sm:$0xff]  ;;  %v5592_v25 = vld [vmem:[#allocation48_spill] sm:$0xff] }
 0x2a8   :  { %v2187_v39 = vmul.bf16 %v2171_v41, %v2103_v44  ;;  %v2186_v29 = vmul.bf16 %v2171_v41, %v2102_v33  ;;  %2638 = vrcp.f32 %v2056_v40  ;;  %v2105_v23 = vpack.c.bf16 %v4547_v19, %v5591_v8  ;;  %v5596_v19 = vld [vmem:[#allocation40_spill] sm:$0xff] }
 0x2a9   :  { %v2629_v30 = vpop.eup %2628  ;;  %v2104_v63 = vpack.c.bf16 %v5593_v38, %v5592_v25  ;;  %v5599_v25 = vld [vmem:[#allocation53_spill] sm:$0xff] }
 0x2aa   :  { %v2059_v52 = vpop.xlane.xlu0 %2058  ;;  %2210 = vmatprep.subr.bf16.mxu1 %v2187_v39  ;;  %v1235_v11 = vpack.c.bf16 %v2629_v30, %v2627_v62  ;;  %v2631_v51 = vpop.eup %2630  ;;  %v5594_v62 = vld [vmem:[#allocation47_spill] sm:$0xff]  ;;  %v5600_v38 = vpack.c.bf16 %v4592_v57, %v5599_v25 }
 0x2ab   :  { %v1125_v48 = vpop.xlane.xlu1 %1124  ;;  %2640 = vrcp.f32 %v2059_v52  ;;  %2211 = vmatpush1.bf16.msra.mxu1 %v2186_v29  ;;  %v1170_v39 = vpack.c.bf16 %v5594_v62, %v4587_v16  ;;  %v5595_v30 = vld [vmem:[#allocation51_spill] sm:$0xff] }
 0x2ac   :  { %v1252_v10 = vmul.bf16 %v1235_v11, %v1168_v31  ;;  %v1251_v60 = vmul.bf16 %v1235_v11, %v1167_v5  ;;  %2642 = vrcp.f32 %v1125_v48  ;;  %v1169_v52 = vpack.c.bf16 %v5596_v19, %v5595_v30 }
 0x2ad   :  { %v2633_v35 = vpop.eup %2632 }
 0x2ae   :  { %v1128_v15 = vpop.xlane.xlu0 %1127  ;;  %1285 = vmatprep.subr.bf16.mxu0 %v1252_v10  ;;  %v2172_v40 = vpack.c.bf16 %v2633_v35, %v2631_v51  ;;  %v2635_v47 = vpop.eup %2634  ;;  %v5597_v51 = vld [vmem:[#allocation52_spill] sm:$0xff] }
 0x2af   :  { %v2062_v61 = vpop.xlane.xlu1 %2061  ;;  %2644 = vrcp.f32 %v1128_v15  ;;  %1286 = vmatpush1.bf16.msra.mxu0 %v1251_v60  ;;  %v2106_v10 = vpack.c.bf16 %v4568_v20, %v5597_v51 }
 0x2b0   :  { %v2189_v44 = vmul.bf16 %v2172_v40, %v2105_v23  ;;  %v2188_v41 = vmul.bf16 %v2172_v40, %v2104_v63  ;;  %2646 = vrcp.f32 %v2062_v61 }
 0x2b1   :  { %v2637_v12 = vpop.eup %2636 }
 0x2b2   :  { %v2065_v24 = vpop.xlane.xlu0 %2064  ;;  %2212 = vmatprep.subr.bf16.mxu1 %v2189_v44  ;;  %v1236_v29 = vpack.c.bf16 %v2637_v12, %v2635_v47  ;;  %v2639_v48 = vpop.eup %2638 }
 0x2b3   :  { %v1131_v33 = vpop.xlane.xlu1 %1130  ;;  %2648 = vrcp.f32 %v2065_v24  ;;  %2213 = vmatpush1.bf16.msra.mxu1 %v2188_v41 }
 0x2b4   :  { %v1254_v31 = vmul.bf16 %v1236_v29, %v1170_v39  ;;  %v1253_v11 = vmul.bf16 %v1236_v29, %v1169_v52  ;;  %2650 = vrcp.f32 %v1131_v33  ;;  %v5601_v33 = vpack.c.bf16 %v4613_v27, %v4638_v2  ;;  %v5606_v27 = vld [vmem:[#allocation15_spill] sm:$0xff] }
 0x2b5   :  { %v2641_v32 = vpop.eup %2640 }
 0x2b6   :  { %v1134_v26 = vpop.xlane.xlu0 %1133  ;;  %v2173_v5 = vpack.c.bf16 %v2641_v32, %v2639_v48  ;;  %1287 = vmatprep.subr.bf16.mxu0 %v1254_v31  ;;  %v2643_v16 = vpop.eup %2642  ;;  %v5604_v48 = vpack.c.bf16 %v4643_v49, %v4657_v34  ;;  %v5605_v31 = vld [vmem:[#allocation55_spill] sm:$0xff]  ;;  %v5609_v49 = vld [vmem:[#allocation56_spill] sm:$0xff] }
 0x2b7   :  { %v2068_v60 = vpop.xlane.xlu1 %2067  ;;  %2652 = vrcp.f32 %v1134_v26  ;;  %1288 = vmatpush1.bf16.msra.mxu0 %v1253_v11  ;;  %v5607_v2 = vpack.c.bf16 %v5605_v31, %v5606_v27  ;;  %v5610_v34 = vpack.c.bf16 %v4649_v17, %v5609_v49 }
 0x2b8   :  { %v2191_v35 = vmul.bf16 %v2173_v5, %v2107_v45  ;;  %v2190_v15 = vmul.bf16 %v2173_v5, %v2106_v10  ;;  %2654 = vrcp.f32 %v2068_v60  ;;  %v5608_v10 = vpack.c.bf16 %v4662_v36, %v4675_v58 }
 0x2b9   :  { %v2645_v61 = vpop.eup %2644 }
 0x2ba   :  { %2214 = vmatprep.subr.bf16.mxu1 %v2191_v35  ;;  %v2071_v8 = vpop.xlane.xlu0 %2070  ;;  %v1237_v23 = vpack.c.bf16 %v2645_v61, %v2643_v16  ;;  %v2647_v46 = vpop.eup %2646 }
 0x2bb   :  { %v1137_v40 = vpop.xlane.xlu1 %1136  ;;  %2656 = vrcp.f32 %v2071_v8  ;;  %2215 = vmatpush1.bf16.msra.mxu1 %v2190_v15 }
 0x2bc   :  { %v1256_v20 = vmul.bf16 %v1237_v23, %v5598_v37  ;;  %v1255_v63 = vmul.bf16 %v1237_v23, %v5600_v38  ;;  %2658 = vrcp.f32 %v1137_v40  ;;  %v5611_v23 = vpack.c.bf16 %v4685_v43, %v4692_v18 }
 0x2bd   :  { %v2649_v47 = vpop.eup %2648  ;;  %v5614_v38 = vpack.c.bf16 %v4705_v13, %v4711_v9  ;;  %v5619_v9 = vld [vmem:[#allocation59_spill] sm:$0xff] }
 0x2be   :  { %1289 = vmatprep.subr.bf16.mxu0 %v1256_v20  ;;  %v1140_v44 = vpop.xlane.xlu0 %1139  ;;  %v2174_v41 = vpack.c.bf16 %v2649_v47, %v2647_v46  ;;  %v2651_v24 = vpop.eup %2650  ;;  %v5612_v46 = vld [vmem:[#allocation58_spill] sm:$0xff]  ;;  %v5615_v47 = vld [vmem:[#allocation20_spill] sm:$0xff]  ;;  %v5620_v13 = vpack.c.bf16 %v4715_v0, %v5619_v9 }
 0x2bf   :  { %v2074_v12 = vpop.xlane.xlu1 %2073  ;;  %2660 = vrcp.f32 %v1140_v44  ;;  %1290 = vmatpush1.bf16.msra.mxu0 %v1255_v63  ;;  %v5613_v36 = vpack.c.bf16 %v4668_v56, %v5612_v46  ;;  %v5616_v44 = vld [vmem:[#allocation78_spill] sm:$0xff]  ;;  %v5635_v46 = vld [vmem:[#allocation33_spill] sm:$0xff] }
 0x2c0   :  { %v2193_v62 = vmul.bf16 %v2174_v41, %v5601_v33  ;;  %v2192_v39 = vmul.bf16 %v2174_v41, %v5603_v3  ;;  %2662 = vrcp.f32 %v2074_v12  ;;  %v5617_v41 = vpack.c.bf16 %v5615_v47, %v5616_v44 }
 0x2c1   :  { %v2653_v29 = vpop.eup %2652 }
 0x2c2   :  { %2216 = vmatprep.subr.bf16.mxu1 %v2193_v62  ;;  %v2077_v57 = vpop.xlane.xlu0 %2076  ;;  %v1238_v30 = vpack.c.bf16 %v2653_v29, %v2651_v24  ;;  %v2655_v52 = vpop.eup %2654  ;;  %v5618_v62 = vpack.c.bf16 %v4723_v54, %v4727_v53 }
 0x2c3   :  { %v1143_v19 = vpop.xlane.xlu1 %1142  ;;  %2664 = vrcp.f32 %v2077_v57  ;;  %2217 = vmatpush1.bf16.msra.mxu1 %v2192_v39 }
 0x2c4   :  { %v1258_v32 = vmul.bf16 %v1238_v30, %v5604_v48  ;;  %v1257_v11 = vmul.bf16 %v1238_v30, %v5607_v2  ;;  %2666 = vrcp.f32 %v1143_v19  ;;  %v5621_v30 = vpack.c.bf16 %v4749_v55, %v4743_v1 }
 0x2c5   :  { %v2657_v26 = vpop.eup %2656  ;;  %v5625_v1 = vpack.c.bf16 %v4757_v22, %v4773_v42 }
 0x2c6   :  { %1291 = vmatprep.subr.bf16.mxu0 %v1258_v32  ;;  %v1146_v28 = vpop.xlane.xlu0 %1145  ;;  %v2175_v45 = vpack.c.bf16 %v2657_v26, %v2655_v52  ;;  %v2659_v51 = vpop.eup %2658  ;;  %v5622_v52 = vld [vmem:[#allocation79_spill] sm:$0xff] }
 0x2c7   :  { %v2080_v5 = vpop.xlane.xlu1 %2079  ;;  %2668 = vrcp.f32 %v1146_v28  ;;  %1292 = vmatpush1.bf16.msra.mxu0 %v1257_v11  ;;  %v5623_v48 = vpack.c.bf16 %v4739_v14, %v5622_v52  ;;  %v5624_v11 = vpack.c.bf16 %v4763_v4, %v4777_v21 }
 0x2c8   :  { %v2195_v60 = vmul.bf16 %v2175_v45, %v5608_v10  ;;  %v2194_v16 = vmul.bf16 %v2175_v45, %v5610_v34  ;;  %2670 = vrcp.f32 %v2080_v5 }
 0x2c9   :  { %v2661_v35 = vpop.eup %2660 }
 0x2ca   :  { %2218 = vmatprep.subr.bf16.mxu1 %v2195_v60  ;;  %v2083_v15 = vpop.xlane.xlu0 %2082  ;;  %v1239_v61 = vpack.c.bf16 %v2661_v35, %v2659_v51  ;;  %v2663_v8 = vpop.eup %2662  ;;  %v5626_v51 = vpack.c.bf16 %v4767_v7, %v4791_v59  ;;  %v5627_v60 = vld [vmem:[#allocation80_spill] sm:$0xff] }
 0x2cb   :  { %2672 = vrcp.f32 %v2083_v15  ;;  %2219 = vmatpush1.bf16.msra.mxu1 %v2194_v16  ;;  %v5628_v21 = vpack.c.bf16 %v4765_v6, %v5627_v60  ;;  %v5629_v16 = vld [vmem:[#allocation63_spill] sm:$0xff]  ;;  %v5630_v35 = vld [vmem:[#allocation60_spill] sm:$0xff]  ;;  %v2333_v6 = vcombine.low %v5635_v46, %v5635_v46 }
 0x2cc   :  { %v1260_v40 = vmul.bf16 %v1239_v61, %v5611_v23  ;;  %v1259_v58 = vmul.bf16 %v1239_v61, %v5613_v36  ;;  %v5631_v15 = vpack.c.bf16 %v5629_v16, %v5630_v35  ;;  %v5633_v23 = vld [vmem:[#allocation18_spill] sm:$0xff] }
 0x2cd   :  { %v2665_v37 = vpop.eup %2664 }
 0x2ce   :  { %1293 = vmatprep.subr.bf16.mxu0 %v1260_v40  ;;  %v1152_v17 = vpop.xlane.xlu0 %1151  ;;  %v2176_v20 = vpack.c.bf16 %v2665_v37, %v2663_v8  ;;  %v2667_v25 = vpop.eup %2666  ;;  %v5632_v8 = vld [vmem:[#allocation62_spill] sm:$0xff]  ;;  %v5637_v37 = vld [vmem:[#allocation23_spill] sm:$0xff] }
 0x2cf   :  { %1294 = vmatpush1.bf16.msra.mxu0 %v1259_v58  ;;  %2674 = vrcp.f32 %v1152_v17  ;;  %v5634_v40 = vpack.c.bf16 %v5632_v8, %v5633_v23  ;;  %v5636_v58 = vld [vmem:[#allocation5_spill] sm:$0xff] }
 0x2d0   :  { %v2197_v63 = vmul.bf16 %v2176_v20, %v5614_v38  ;;  %v2196_v12 = vmul.bf16 %v2176_v20, %v5617_v41  ;;  %v1149_v18 = vpop.xlane.xlu1 %1148  ;;  %v5638_v17 = vpack.c.bf16 %v5636_v58, %v5637_v37  ;;  %v5640_v38 = vld [vmem:[#allocation27_spill] sm:$0xff] }
 0x2d1   :  { %v2669_v43 = vpop.eup %2668  ;;  %2676 = vrcp.f32 %v1149_v18 }
 0x2d2   :  { %2220 = vmatprep.subr.bf16.mxu1 %v2197_v63  ;;  %v1240_v56 = vpack.c.bf16 %v2669_v43, %v2667_v25  ;;  %v2089_v24 = vpop.xlane.xlu0 %2088  ;;  %v2671_v33 = vpop.eup %2670  ;;  %v5639_v25 = vld [vmem:[#allocation82_spill] sm:$0xff] }
 0x2d3   :  { %2221 = vmatpush1.bf16.msra.mxu1 %v2196_v12  ;;  %2678 = vrcp.f32 %v2089_v24  ;;  %v5641_v63 = vpack.c.bf16 %v5639_v25, %v5640_v38 }
 0x2d4   :  { %v1262_v50 = vmul.bf16 %v1240_v56, %v5618_v62  ;;  %v1261_v3 = vmul.bf16 %v1240_v56, %v5620_v13  ;;  %v2086_v29 = vpop.xlane.xlu1 %2085 }
 0x2d5   :  { %v2673_v39 = vpop.eup %2672  ;;  %2680 = vrcp.f32 %v2086_v29  ;;  %v5642_v29 = vld [vmem:[#allocation29_spill] sm:$0xff] }
 0x2d6   :  { %1295 = vmatprep.subr.bf16.mxu0 %v1262_v50  ;;  %v2177_v57 = vpack.c.bf16 %v2673_v39, %v2671_v33 }
 0x2d7   :  { %1296 = vmatpush1.bf16.msra.mxu0 %v1261_v3 }
 0x2d8   :  { %v2199_v19 = vmul.bf16 %v2177_v57, %v5621_v30  ;;  %v2198_v54 = vmul.bf16 %v2177_v57, %v5623_v48  ;;  %v1155_v53 = vpop.xlane.xlu1 %1154 }
 0x2d9   :  { %v2675_v0 = vpop.eup %2674  ;;  %2682 = vrcp.f32 %v1155_v53 }
 0x2da   :  { %2222 = vmatprep.subr.bf16.mxu1 %v2199_v19 }
 0x2db   :  { %2223 = vmatpush1.bf16.msra.mxu1 %v2198_v54  ;;  %v2677_v32 = vpop.eup %2676 }
 0x2dc   :  { %v1241_v31 = vpack.c.bf16 %v2675_v0, %v2677_v32  ;;  %v2092_v14 = vpop.xlane.xlu1 %2091 }
 0x2dd   :  { %v2679_v27 = vpop.eup %2678 }
 0x2de   :  { %v1158_v2 = vpop.xlane.xlu0 %1157  ;;  %v1264_v26 = vmul.bf16 %v1241_v31, %v5624_v11  ;;  %v1263_v55 = vmul.bf16 %v1241_v31, %v5625_v1 }
 0x2df   :  { %v2681_v28 = vpop.eup %2680  ;;  %2684 = vrcp.f32 %v1158_v2 }
 0x2e0   :  { %1297 = vmatprep.subr.bf16.mxu0 %v1264_v26  ;;  %v2178_v45 = vpack.c.bf16 %v2679_v27, %v2681_v28  ;;  %2686 = vrcp.f32 %v2092_v14  ;;  %v1337_v19 = vpop.permute.xlu1 %1336 }
 0x2e1   :  { %1298 = vmatpush1.bf16.msra.mxu0 %v1263_v55 }
 0x2e2   :  { %v2095_v5 = vpop.xlane.xlu0 %2094  ;;  %v2201_v10 = vmul.bf16 %v2178_v45, %v5626_v51  ;;  %v2200_v4 = vmul.bf16 %v2178_v45, %v5628_v21 }
 0x2e3   :  { %2688 = vrcp.f32 %v2095_v5  ;;  %v2683_v22 = vpop.eup %2682 }
 0x2e4   :  { %2224 = vmatprep.subr.bf16.mxu1 %v2201_v10 }
 0x2e5   :  { %2225 = vmatpush1.bf16.msra.mxu1 %v2200_v4 }
 0x2e9   :  { %v2685_v42 = vpop.eup %2684 }
 0x2ea   :  { %v1242_v49 = vpack.c.bf16 %v2685_v42, %v2683_v22  ;;  %v2687_v34 = vpop.eup %2686 }
 0x2ec   :  { %v1266_v61 = vmul.bf16 %v1242_v49, %v5631_v15  ;;  %v1265_v7 = vmul.bf16 %v1242_v49, %v5634_v40  ;;  %v51_v15 = vld [vmem:[%s5031_s4] sm:$0xf] }
 0x2ed   :  { %v2689_v59 = vpop.eup %2688 }
 0x2ee   :  { %1299 = vmatprep.subr.bf16.mxu0 %v1266_v61  ;;  %v2179_v36 = vpack.c.bf16 %v2689_v59, %v2687_v34 }
 0x2ef   :  { %1300 = vmatpush1.bf16.msra.mxu0 %v1265_v7 }
 0x2f0   :  { %v2203_v20 = vmul.bf16 %v2179_v36, %v5638_v17  ;;  %v2202_v47 = vmul.bf16 %v2179_v36, %v5641_v63 }
 0x2f2   :  { %1310 = vmatmul.mubr.bf16.vlgmr.msra.gmra.mrb[0].mxu0 %v2333_v6  ;;  %2226 = vmatprep.subr.bf16.mxu1 %v2203_v20 }
 0x2f3   :  { %2227 = vmatpush1.bf16.msra.mxu1 %v2202_v47 }
 0x2f6   :  { %2237 = vmatmul.mubr.bf16.vlgmr.msra.gmra.mrb[0].mxu1 %v2333_v6 }
 0x3c5   :  { %v1311_v44 = vpop.f32.mrb[0].mxu0 }
 0x3c6   :  { %v1318_v41 = vadd.f32 1e-05, %v1311_v44  ;;  %v1313_v12 = vpop.f32.mrb[1].mxu0 }
 0x3c7   :  { %v1319_v43 = vadd.f32 1e-05, %v1313_v12  ;;  %v1315_v18 = vpop.f32.mrb[2].mxu0 }
 0x3c8   :  { %2690 = vrcp.f32 %v1318_v41  ;;  %v1316_v56 = vpop.f32.mrb[3].mxu0 }
 0x3c9   :  { %2692 = vrcp.f32 %v1319_v43  ;;  %v2238_v24 = vpop.f32.mrb[0].mxu1 }
 0x3ca   :  { %v2245_v33 = vadd.f32 1e-05, %v2238_v24  ;;  %v2240_v62 = vpop.f32.mrb[1].mxu1 }
 0x3cb   :  { %v2246_v50 = vadd.f32 1e-05, %v2240_v62  ;;  %v2242_v9 = vpop.f32.mrb[2].mxu1 }
 0x3cc   :  { %2694 = vrcp.f32 %v2245_v33  ;;  %v2243_v13 = vpop.f32.mrb[3].mxu1 }
 0x3cd   :  { %2696 = vrcp.f32 %v2246_v50 }
 0x3d2   :  { %v2691_v3 = vpop.eup %2690 }
 0x3d3   :  { %v2693_v39 = vpop.eup %2692  ;;  %v1327_v57 = vrot.slane %v2691_v3, %v5642_v29 }
 0x3d4   :  { %v1331_v30 = vrot.slane %v2693_v39, %v5642_v29 }
 0x3d5   :  { %v1332_v52 = vmul.f32 %v1327_v57, %v1311_v44 }
 0x3d6   :  { %v2695_v48 = vpop.eup %2694  ;;  %v1333_v54 = vmul.f32 %v1331_v30, %v1313_v12 }
 0x3d7   :  { %v2697_v53 = vpop.eup %2696  ;;  %v2254_v0 = vrot.slane %v2695_v48, %v5642_v29  ;;  %v1339_v32 = vadd.f32 %v1337_v19, %v1332_v52 }
 0x3d8   :  { %v2258_v31 = vrot.slane %v2697_v53, %v5642_v29  ;;  %v1340_v27 = vadd.f32 %v1337_v19, %v1333_v54 }
 0x3d9   :  { %v2259_v2 = vmul.f32 %v2254_v0, %v2238_v24  ;;  %v4969_v11 = vmax.f32 %v1339_v32, 0.0  ;;  %v52_v0 = vld [vmem:[%s5032_s5] sm:$0xf] }
 0x3da   :  { %v2260_v26 = vmul.f32 %v2258_v31, %v2240_v62  ;;  %v4971_v1 = vmax.f32 %v1340_v27, 0.0 }
 0x3db   :  { %v2261_v55 = vadd.f32 %v2259_v2, %v1337_v19  ;;  %v1344_v28 = vsel %vm1343_vm1, %v4969_v11, 0.0  ;;  %v1351_v22 = vsel %vm1343_vm1, %v4969_v11, -inf }
 0x3dc   :  { %v2262_v14 = vadd.f32 %v2260_v26, %v1337_v19  ;;  %v1345_v45 = vsel %vm1343_vm1, %v4971_v1, 0.0  ;;  %v1352_v42 = vsel %vm1343_vm1, %v4971_v1, -inf }
 0x3dd   :  { %v4977_v5 = vmax.f32 %v2261_v55, 0.0  ;;  %v1346_v51 = vadd.f32 %v1345_v45, %v1344_v28  ;;  %v1353_v49 = vmax.f32 %v1351_v22, %v1352_v42 }
 0x3de   :  { %v4979_v10 = vmax.f32 %v2262_v14, 0.0 }
 0x3df   :  { %1347 = vadd.xlane.f32.xlu0 %v1346_v51  ;;  %v2265_v60 = vsel %vm1343_vm1, %v4977_v5, 0.0  ;;  %v2271_v34 = vsel %vm1343_vm1, %v4977_v5, -inf }
 0x3e0   :  { %v2266_v21 = vsel %vm1343_vm1, %v4979_v10, 0.0  ;;  %v2272_v16 = vsel %vm1343_vm1, %v4979_v10, -inf }
 0x3e1   :  { %v2267_v4 = vadd.f32 %v2266_v21, %v2265_v60  ;;  %v2273_v35 = vmax.f32 %v2271_v34, %v2272_v16  ;;  %v2706_v16 = vld [vmem:[%s5027_s0] sm:$0xff] }
 0x3e3   :  { %2268 = vadd.xlane.f32.xlu0 %v2267_v4 }
 0x3e7   :  { %1354 = vmax.xlane.f32.xlu0 %v1353_v49 }
 0x3eb   :  { %2274 = vmax.xlane.f32.xlu0 %v2273_v35  ;;  %v1388_v35 = vcombine.high %v2706_v16, %v2706_v16 }
 0x46c   :  { %v1348_v61 = vpop.xlane.xlu0 %1347 }
 0x46d   :  { %v1350_v8 = vmul.f32 0.00390625, %v1348_v61 }
 0x46f   :  { %v1356_v23 = vmul.f32 %v1350_v8, %v51_v15 }
 0x470   :  { %v2269_v40 = vpop.xlane.xlu0 %2268 }
 0x471   :  { %v1358_v7 = vsel %vm1357_vm2, %v1356_v23, 0.0  ;;  %v2270_v59 = vmul.f32 0.00390625, %v2269_v40 }
 0x472   :  { %v1359_v46 = vrot.slane %v1358_v7, 4 }
 0x473   :  { %v2276_v6 = vmul.f32 %v2270_v59, %v51_v15 }
 0x474   :  { %v1360_v36 = vadd.f32 %v1359_v46, %v1358_v7  ;;  %v1355_v58 = vpop.xlane.xlu0 %1354  ;;  %v2707_v7 = vld [vmem:[%s5027_s0 + $0x8] sm:$0xff] }
 0x475   :  { %v2277_v37 = vsel %vm1357_vm2, %v2276_v6, 0.0  ;;  %v1366_v17 = vmul.f32 %v1355_v58, %v51_v15  ;;  %v2307_v59 = vcombine.high %v2707_v7, %v2707_v7 }
 0x476   :  { %v1361_v20 = vrot.slane %v1360_v36, 2  ;;  %v2278_v25 = vrot.slane %v2277_v37, 4 }
 0x477   :  { %v1367_v38 = vsel %vm1357_vm2, %v1366_v17, 0.0 }
 0x478   :  { %v1362_v63 = vadd.f32 %v1361_v20, %v1360_v36  ;;  %v2279_v47 = vadd.f32 %v2278_v25, %v2277_v37  ;;  %v1368_v44 = vrot.slane %v1367_v38, 4  ;;  %v2275_v41 = vpop.xlane.xlu0 %2274 }
 0x479   :  { %v2285_v12 = vmul.f32 %v2275_v41, %v51_v15 }
 0x47a   :  { %v2280_v43 = vrot.slane %v2279_v47, 2  ;;  %v1369_v18 = vadd.f32 %v1368_v44, %v1367_v38  ;;  %v1363_v24 = vrot.slane %v1362_v63, 1 }
 0x47b   :  { %v2286_v56 = vsel %vm1357_vm2, %v2285_v12, 0.0 }
 0x47c   :  { %v2281_v33 = vadd.f32 %v2280_v43, %v2279_v47  ;;  %v1370_v62 = vrot.slane %v1369_v18, 2  ;;  %v2287_v50 = vrot.slane %v2286_v56, 4  ;;  %v1364_v57 = vadd.f32 %v1363_v24, %v1362_v63 }
 0x47e   :  { %v1371_v9 = vadd.f32 %v1370_v62, %v1369_v18  ;;  %v2288_v13 = vadd.f32 %v2287_v50, %v2286_v56  ;;  %v2282_v3 = vrot.slane %v2281_v33, 1  ;;  %v1365_v48 = vmax.f32 %v1364_v57, 0.0 }
 0x480   :  { %v1372_v39 = vrot.slane %v1371_v9, 1  ;;  %v2289_v29 = vrot.slane %v2288_v13, 2  ;;  %v2283_v53 = vadd.f32 %v2282_v3, %v2281_v33 }
 0x482   :  { %v1373_v30 = vadd.f32 %v1372_v39, %v1371_v9  ;;  %v2290_v19 = vadd.f32 %v2289_v29, %v2288_v13  ;;  %v2284_v2 = vmax.f32 %v2283_v53, 0.0 }
 0x484   :  { %v2291_v52 = vrot.slane %v2290_v19, 1  ;;  %v1374_v54 = vmax.f32 %v1373_v30, 0.0 }
 0x486   :  { %v2292_v32 = vadd.f32 %v2291_v52, %v2290_v19  ;;  %v1375_v31 = vadd.f32 %v1374_v54, %v1365_v48 }
 0x488   :  { %v1376_v27 = vmul.f32 %v1375_v31, %v52_v0  ;;  %v2293_v26 = vmax.f32 %v2292_v32, 0.0 }
 0x48a   :  { %v1377_v55 = vsel %vm1357_vm2, %v1376_v27, 0.0  ;;  %v2294_v28 = vadd.f32 %v2293_v26, %v2284_v2 }
 0x48b   :  { %1378 = vadd.xlane.f32.xlu1 %v1377_v55 }
 0x48c   :  { %v2295_v14 = vmul.f32 %v2294_v28, %v52_v0 }
 0x48e   :  { %v2296_v45 = vsel %vm1357_vm2, %v2295_v14, 0.0 }
 0x48f   :  { %2297 = vadd.xlane.f32.xlu0 %v2296_v45 }
 0x518   :  { %v1379_v51 = vpop.xlane.xlu1 %1378 }
 0x519   :  { %v2336_v60 = vmul.f32 -1.442695, %v1379_v51 }
 0x51b   :  { %2698 = vpow2.f32 %v2336_v60 }
 0x51c   :  { %v2298_v21 = vpop.xlane.xlu0 %2297 }
 0x51d   :  { %v2339_v4 = vmul.f32 -1.442695, %v2298_v21 }
 0x51f   :  { %2700 = vpow2.f32 %v2339_v4 }
 0x525   :  { %v2699_v22 = vpop.eup %2698 }
 0x526   :  { %v1383_v42 = vadd.f32 1.0, %v2699_v22 }
 0x528   :  { %2702 = vrcp.f32 %v1383_v42 }
 0x529   :  { %v2701_v49 = vpop.eup %2700 }
 0x52a   :  { %v2302_v34 = vadd.f32 1.0, %v2701_v49 }
 0x52c   :  { %2704 = vrcp.f32 %v2302_v34 }
 0x532   :  { %v2703_v15 = vpop.eup %2702 }
 0x533   :  { %v1386_v61 = vmul.f32 %v2703_v15, %v4969_v11  ;;  %v1387_v8 = vmul.f32 %v2703_v15, %v4971_v1 }
 0x535   :  { %v1390_v23 = vadd.f32 %v2706_v16, %v1386_v61  ;;  %v1391_v40 = vadd.f32 %v1388_v35, %v1387_v8 }
 0x536   :  { %v2705_v46 = vpop.eup %2704 }
 0x537   :  { %v1394_v6 = vcombine.low %v1390_v23, %v1391_v40  ;;  %v2305_v36 = vmul.f32 %v2705_v46, %v4977_v5  ;;  %v2306_v58 = vmul.f32 %v2705_v46, %v4979_v10 }
 0x539   :  { %1396 = vst [vmem:[#allocation2] sm:$0xff] %v1394_v6  ;;  %v2309_v37 = vadd.f32 %v2707_v7, %v2305_v36  ;;  %v2310_v11 = vadd.f32 %v2307_v59, %v2306_v58 }
 0x53b   :  { %v2313_v17 = vcombine.low %v2309_v37, %v2310_v11 }
 0x53d   :  { %2316 = vst [vmem:[#allocation2 + $0x8] sm:$0xff] %v2313_v17 }
 0x53e   :  { %2719 = shalt.err (!%p2716_p4)
}
 0x53f   :  { %s2720_s12 = scalar_lea.hbm %s5033_s6, 256 }
 0x540   :  { %p2721_p5 = scmp.ne.s32.totalorder %s5033_s6, %s2720_s12  ;;  %p2724_p6 = scmp.lt.u32.totalorder %s2720_s12, %s5033_s6 }
 0x542   :  { %p2726_p7 = pnand %p2724_p6, %p2721_p5 }
 0x544   :  { %2729 = shalt.err (!%p2726_p7)
}
 0x545   :  { %s2737_s17 = smov 128   ;;  %s2738_s18 = smov 8  }
 0x546   :  { %2328 = dma.vmem_to_hbm [thread:$0]  %s2323_s9, 256, %s5033_s6, [#allocation3], %s2737_s17, %s2737_s17, %s2738_s18  }
 0x547   :  { %2730 = dma.done.wait [#allocation3], 256  }
 0x548   :  { %2731 = vsyncadd [#allocation3], 4294967040 }
 0x549   :  { %2332 = vsyncpa [#allocation3], 1 }

</bundles_post_ra>
